<compile_context>
chip_gen: v7x
topology: tpu7x:2x2x1
jax: 0.10.0
libtpu: 0.0.40
codegen_flags: <defaults>
</compile_context>

<pallas_src>
import functools

import jax
import jax.numpy as jnp
from jax.experimental import pallas as pl
from jax.experimental.pallas import tpu as pltpu


# ------------------------------ Pallas kernels ------------------------------


def _block_kernel(x_ref, dw_ref, b1_ref, pw_ref, b2_ref, out_ref, h_scr,
                  *, ho, wo, hpad, stride):
    """One Block: depthwise 3x3 (BN1 folded) + ReLU -> 1x1 matmul (BN2 folded) + ReLU.

    stride == 1: x_ref is the padded activation (H+2, W+2, Cin); all 9 taps are
                 formed in-kernel via contiguous slices.
    stride  > 1: x_ref is (3*hpad, Wo, Cin): three column-subsampled slabs
                 (kj = 0,1,2) stacked along rows; row subsampling happens here.
    dw_ref: (9, Cin) depthwise weights with BN1 scale folded in.
    pw_ref: (Cin, Cout) bf16 pointwise weights with BN2 scale folded in.
    h_scr:  (Ho*Wo, Cin) f32 VMEM scratch holding the post-BN1/ReLU activation.
    out_ref: (Ho*Wo, Cout) f32.
    """
    cin = x_ref.shape[-1]
    dw = dw_ref[...]                      # (9, Cin) f32
    b1 = b1_ref[...]                      # (1, Cin) f32

    # Depthwise MAC, one output row at a time (keeps live values small; the
    # loop is static  -- TODO(synk): switch to lax.fori_loop for very large Ho).
    for i in range(ho):
        racc = jnp.zeros((wo, cin), jnp.float32)
        for ki in range(3):
            for kj in range(3):
                if stride == 1:
                    tap = x_ref[i + ki, kj:kj + wo, :]                 # (Wo, Cin)
                else:
                    tap = x_ref[kj * hpad + i * stride + ki, :, :]     # (Wo, Cin)
                racc = racc + tap * dw[ki * 3 + kj]
        h_scr[i * wo:(i + 1) * wo, :] = jnp.maximum(racc + b1, 0.0)

    # Pointwise 1x1 conv as a single MXU matmul (bf16 inputs, f32 accumulate).
    hb = h_scr[...].astype(jnp.bfloat16)
    y = jnp.dot(hb, pw_ref[...], preferred_element_type=jnp.float32)
    out_ref[...] = jnp.maximum(y + b2_ref[...], 0.0)


def _head_kernel(x_ref, w_ref, b_ref, out_ref):
    """Fused avg_pool2d(2) + NCHW-flatten + Linear (pool folded into w_ref).

    x: (N, H*W*C) NHWC-flat, w: (H*W*C, branch_pad=128k), b: (1, branch_pad).
    """
    out_ref[...] = (jnp.dot(x_ref[...], w_ref[...],
                            preferred_element_type=jnp.float32) + b_ref[...])


# ------------------------------ wrappers (glue) ------------------------------


def block_forward(x_nhwc, p):
    n, h, w, cin = x_nhwc.shape
    s = p["stride"]
    cout = p["pw"].shape[1]
    ho = (h - 1) // s + 1          # kernel 3, padding 1
    wo = (w - 1) // s + 1
    hpad = h + 2

    xp = jnp.pad(x_nhwc, ((0, 0), (1, 1), (1, 1), (0, 0)))
    if s == 1:
        # Single padded copy; taps formed in-kernel (no 9x im2col HBM traffic).
        inp = xp
        in_spec = pl.BlockSpec((None, hpad, w + 2, cin), lambda i: (i, 0, 0, 0))
    else:
        # Column (W) subsampling done once in XLA (3 slabs ~ 1.5x activation
        # bytes vs 9x im2col); kj selection + row subsampling happen in-kernel.
        slabs = [xp[:, :, kj:kj + (wo - 1) * s + 1:s, :] for kj in range(3)]
        inp = jnp.concatenate(slabs, axis=1)              # (N, 3*hpad, Wo, Cin)
        in_spec = pl.BlockSpec((None, 3 * hpad, wo, cin), lambda i: (i, 0, 0, 0))

    in_block_bytes = (inp.size // n) * 4
    out_block_bytes = ho * wo * cout * 4
    weight_bytes = (p["dw"].size + p["b1"].size + p["b2"].size) * 4 + p["pw"].size * 2
    need = (2 * (in_block_bytes + out_block_bytes) + weight_bytes
            + ho * wo * cin * 4 + (8 << 20))
    vmem_limit = int(min(64 << 20, max(32 << 20, need)))   # headroom incl. v7x (64 MiB)

    kern = functools.partial(_block_kernel, ho=ho, wo=wo, hpad=hpad, stride=s)
    out2d = pl.pallas_call(
        kern,
        out_shape=jax.ShapeDtypeStruct((n, ho * wo, cout), jnp.float32),
        grid=(n,),
        in_specs=[in_spec,
                  pl.BlockSpec((9, cin), lambda i: (0, 0)),
                  pl.BlockSpec((1, cin), lambda i: (0, 0)),
                  pl.BlockSpec((cin, cout), lambda i: (0, 0)),
                  pl.BlockSpec((1, cout), lambda i: (0, 0))],
        out_specs=pl.BlockSpec((None, ho * wo, cout), lambda i: (i, 0, 0)),
        scratch_shapes=[pltpu.VMEM((ho * wo, cin), jnp.float32)],
        compiler_params=pltpu.CompilerParams(
            dimension_semantics=("parallel",),   # shard batch across TCs (v7x)
            vmem_limit_bytes=vmem_limit),
        cost_estimate=pl.CostEstimate(
            flops=int(n * ho * wo * cin * (18 + 2 * cout)),
            transcendentals=0,
            bytes_accessed=int(n * (in_block_bytes + out_block_bytes) + weight_bytes)),
    )(inp, p["dw"], p["b1"], p["pw"], p["b2"])
    return out2d.reshape(n, ho, wo, cout)


def head_forward(x_nhwc, head_w, head_b, branch):
    n, h, w, c = x_nhwc.shape
    assert h * w * c == head_w.shape[0]
    flat = x_nhwc.reshape(n, h * w * c)                   # NHWC flatten (pool folded in w)
    out = pl.pallas_call(
        _head_kernel,
        out_shape=jax.ShapeDtypeStruct((n, head_w.shape[1]), jnp.float32),
        in_specs=[pl.BlockSpec(memory_space=pltpu.MemorySpace.VMEM)] * 3,
        out_specs=pl.BlockSpec(memory_space=pltpu.MemorySpace.VMEM),
    )(flat, head_w, head_b)
    return out[:, :branch]                                # drop the lane padding


def mobile_tree_leaf_net_forward(x_nchw, prep):
    x = jnp.transpose(x_nchw, (0, 2, 3, 1))               # NCHW -> NHWC
    for p in prep["blocks"]:
        x = block_forward(x, p)
    return head_forward(x, prep["head_w"], prep["head_b"], prep["branch"])


# ------------------------------ parameters ------------------------------


def init_params(key, in_planes, cfg, branch, spatial_hw, eps=1e-5):
    """Module-style (PyTorch-equivalent) parameters."""
    h, w = spatial_hw
    blocks = []
    cin = in_planes
    for item in cfg:
        cout, stride = (item, 1) if isinstance(item, int) else (item[0], item[1])
        key, *ks = jax.random.split(key, 11)
        blocks.append(dict(
            stride=stride,
            dw=0.2 * jax.random.normal(ks[0], (3, 3, cin), jnp.float32),
            bn1_gamma=1.0 + 0.1 * jax.random.normal(ks[1], (cin,), jnp.float32),
            bn1_beta=0.1 * jax.random.normal(ks[2], (cin,), jnp.float32),
            bn1_mean=0.1 * jax.random.normal(ks[3], (cin,), jnp.float32),
            bn1_var=0.5 + jnp.abs(jax.random.normal(ks[4], (cin,), jnp.float32)),
            pw=jax.random.normal(ks[5], (cin, cout), jnp.float32) / jnp.sqrt(cin),
            bn2_gamma=1.0 + 0.1 * jax.random.normal(ks[6], (cout,), jnp.float32),
            bn2_beta=0.1 * jax.random.normal(ks[7], (cout,), jnp.float32),
            bn2_mean=0.1 * jax.random.normal(ks[8], (cout,), jnp.float32),
            bn2_var=0.5 + jnp.abs(jax.random.normal(ks[9], (cout,), jnp.float32)),
        ))
        h = (h - 1) // stride + 1
        w = (w - 1) // stride + 1
        cin = cout
    hp, wp = h // 2, w // 2
    fcl = cin * hp * wp
    key, kw, kb = jax.random.split(key, 3)
    return dict(
        eps=eps,
        blocks=blocks,
        lin_w=jax.random.normal(kw, (fcl, branch), jnp.float32) / jnp.sqrt(fcl),
        lin_b=0.1 * jax.random.normal(kb, (branch,), jnp.float32),
    )


def prepare_params(raw, spatial_hw):
    """Fold BN scales into dw/pw, cast pw to bf16, fold pool+flatten into linear."""
    eps = raw["eps"]
    h, w = spatial_hw
    blocks = []
    for b in raw["blocks"]:
        cin = b["dw"].shape[-1]
        cout = b["pw"].shape[1]
        s1 = b["bn1_gamma"] / jnp.sqrt(b["bn1_var"] + eps)
        b1 = b["bn1_beta"] - b["bn1_mean"] * s1
        s2 = b["bn2_gamma"] / jnp.sqrt(b["bn2_var"] + eps)
        b2 = b["bn2_beta"] - b["bn2_mean"] * s2
        blocks.append(dict(
            stride=b["stride"],
            dw=(b["dw"].reshape(9, cin) * s1[None, :]).astype(jnp.float32),
            b1=b1.reshape(1, cin).astype(jnp.float32),
            pw=(b["pw"] * s2[None, :]).astype(jnp.bfloat16),
            b2=b2.reshape(1, cout).astype(jnp.float32)))
        h = (h - 1) // b["stride"] + 1
        w = (w - 1) // b["stride"] + 1
    c = raw["blocks"][-1]["pw"].shape[1]
    assert h % 2 == 0 and w % 2 == 0, "avg_pool2d(2) requires even spatial dims"
    hp, wp = h // 2, w // 2
    branch = raw["lin_w"].shape[1]
    # lin_w rows are in PyTorch NCHW-flatten order (c*Hp*Wp + hp*Wp + wp); expand
    # to NHWC order over the *un-pooled* grid with the 1/4 pool factor folded in.
    lw = raw["lin_w"].reshape(c, hp, wp, branch).transpose(1, 2, 0, 3)   # (Hp,Wp,C,B)
    lw = jnp.repeat(jnp.repeat(lw, 2, axis=0), 2, axis=1) * 0.25          # (H,W,C,B)
    head_w = lw.reshape(h * w * c, branch)
    bpad = ((branch + 127) // 128) * 128          # lane-dense output (unmasked stores)
    head_w = jnp.pad(head_w, ((0, 0), (0, bpad - branch)))
    head_b = jnp.pad(raw["lin_b"].reshape(1, branch), ((0, 0), (0, bpad - branch)))
    return dict(blocks=blocks, head_w=head_w, head_b=head_b, branch=branch)


# ------------------------------ references ------------------------------


def ref_forward_f32(x_nchw, raw):
    """Module-faithful pure-f32 reference (BN in inference mode)."""
    eps = raw["eps"]
    x = jnp.transpose(x_nchw, (0, 2, 3, 1))
    for b in raw["blocks"]:
        s = b["stride"]
        cin = x.shape[-1]
        y = jax.lax.conv_general_dilated(
            x, b["dw"][:, :, None, :], (s, s), ((1, 1), (1, 1)),
            dimension_numbers=("NHWC", "HWIO", "NHWC"), feature_group_count=cin)
        y = (y - b["bn1_mean"]) / jnp.sqrt(b["bn1_var"] + eps) * b["bn1_gamma"] + b["bn1_beta"]
        y = jnp.maximum(y, 0.0)
        y = jnp.einsum("nhwc,cd->nhwd", y, b["pw"])
        y = (y - b["bn2_mean"]) / jnp.sqrt(b["bn2_var"] + eps) * b["bn2_gamma"] + b["bn2_beta"]
        x = jnp.maximum(y, 0.0)
    n, h, w, c = x.shape
    pooled = x.reshape(n, h // 2, 2, w // 2, 2, c).mean(axis=(2, 4))
    flat = jnp.transpose(pooled, (0, 3, 1, 2)).reshape(n, -1)
    return flat @ raw["lin_w"] + raw["lin_b"][None, :]


def ref_forward_matched(x_nchw, prep):
    """Reference mirroring the kernel math (folded BN, bf16 pointwise matmul)."""
    x = jnp.transpose(x_nchw, (0, 2, 3, 1))
    for p in prep["blocks"]:
        s = p["stride"]
        n, h, w, cin = x.shape
        ho, wo = (h - 1) // s + 1, (w - 1) // s + 1
        xp = jnp.pad(x, ((0, 0), (1, 1), (1, 1), (0, 0)))
        acc = jnp.zeros((n, ho, wo, cin), jnp.float32)
        for ki in range(3):
            for kj in range(3):
                tap = xp[:, ki:ki + (ho - 1) * s + 1:s, kj:kj + (wo - 1) * s + 1:s, :]
                acc = acc + tap * p["dw"][ki * 3 + kj]
        hact = jnp.maximum(acc + p["b1"][0], 0.0)
        y = jnp.einsum("nhwc,cd->nhwd", hact.astype(jnp.bfloat16), p["pw"],
                       preferred_element_type=jnp.float32)
        x = jnp.maximum(y + p["b2"][0], 0.0)
    n = x.shape[0]
    out = x.reshape(n, -1) @ prep["head_w"] + prep["head_b"]
    return out[:, :prep["branch"]]


# ------------------------------ main ------------------------------

if __name__ == "__main__":
    key = jax.random.PRNGKey(0)
    # Small config mirroring MobileTreeLeafNet(cfg=[512,...,(1024,2),1024],
    # in_planes=512, branch=6) at reduced widths / depth / spatial size.
    in_planes = 8
    cfg = [8, 8, (16, 2), 16]
    branch = 4
    N, H, W = 2, 8, 8     # 8x8 -> stride-2 block -> 4x4 -> avg_pool(2) -> 2x2

    kp, kx = jax.random.split(key)
    raw = init_params(kp, in_planes, cfg, branch, (H, W))
    prep = prepare_params(raw, (H, W))
    x = jax.random.normal(kx, (N, in_planes, H, W), jnp.float32)

    fwd = jax.jit(lambda inp: mobile_tree_leaf_net_forward(inp, prep))
    out = jax.block_until_ready(fwd(x))
    assert out.shape == (N, branch), out.shape

    # Tight check vs a reference with the same (folded BN + bf16 matmul) math.
    ref_m = ref_forward_matched(x, prep)
    assert jnp.allclose(out, ref_m, rtol=5e-3, atol=5e-3), (out, ref_m)
    # Loose check vs the module-faithful full-f32 reference (kernel uses bf16 MXU).
    ref_f = ref_forward_f32(x, raw)
    assert jnp.allclose(out, ref_f, rtol=5e-2, atol=5e-2), (out, ref_f)

    print("KERNEL_OK")
</pallas_src>

<mosaic_0001>
module attributes {stable_mosaic.version = 11 : i64} {
  func.func @_block_kernel(%arg0: i32, %arg1: memref<1x10x10x8xf32, #tpu.memory_space<vmem>>, %arg2: memref<9x8xf32, #tpu.memory_space<vmem>>, %arg3: memref<1x8xf32, #tpu.memory_space<vmem>>, %arg4: memref<8x8xbf16, #tpu.memory_space<vmem>>, %arg5: memref<1x8xf32, #tpu.memory_space<vmem>>, %arg6: memref<1x64x8xf32, #tpu.memory_space<vmem>>, %arg7: memref<64x8xf32, #tpu.memory_space<vmem>>) attributes {dimension_semantics = [#tpu.dimension_semantics<parallel>], iteration_bounds = array<i64: 2>, scalar_prefetch = 0 : i64, scratch_operands = 1 : i64, tpu.core_type = #tpu.core_type<tc>, window_params = [{transform_indices = @transform_0, window_bounds = array<i64: 1, 10, 10, 8>}, {pipeline_mode = #tpu.pipeline_mode<synchronous>, transform_indices = @transform_1, window_bounds = array<i64: 9, 8>}, {pipeline_mode = #tpu.pipeline_mode<synchronous>, transform_indices = @transform_2, window_bounds = array<i64: 1, 8>}, {pipeline_mode = #tpu.pipeline_mode<synchronous>, transform_indices = @transform_3, window_bounds = array<i64: 8, 8>}, {pipeline_mode = #tpu.pipeline_mode<synchronous>, transform_indices = @transform_4, window_bounds = array<i64: 1, 8>}, {transform_indices = @transform_5, window_bounds = array<i64: 1, 64, 8>}]} {
    %c0 = arith.constant 0 : index
    %c0_0 = arith.constant 0 : index
    %0 = vector.load %arg2[%c0, %c0_0] : memref<9x8xf32, #tpu.memory_space<vmem>>, vector<9x8xf32>
    %c0_1 = arith.constant 0 : index
    %c0_2 = arith.constant 0 : index
    %1 = vector.load %arg3[%c0_1, %c0_2] : memref<1x8xf32, #tpu.memory_space<vmem>>, vector<1x8xf32>
    %cst = arith.constant 0.000000e+00 : f32
    %2 = vector.broadcast %cst : f32 to vector<8x8xf32>
    %c0_3 = arith.constant 0 : index
    %c0_4 = arith.constant 0 : index
    %c0_5 = arith.constant 0 : index
    %c0_6 = arith.constant 0 : index
    %3 = vector.load %arg1[%c0_3, %c0_4, %c0_5, %c0_6] : memref<1x10x10x8xf32, #tpu.memory_space<vmem>>, vector<1x1x8x8xf32>
    %4 = vector.shape_cast %3 : vector<1x1x8x8xf32> to vector<8x8xf32>
    %5 = vector.extract_strided_slice %0 {offsets = [0, 0], sizes = [1, 8], strides = [1, 1]} : vector<9x8xf32> to vector<1x8xf32>
    %6 = vector.shape_cast %5 : vector<1x8xf32> to vector<8xf32>
    %7 = vector.shape_cast %6 : vector<8xf32> to vector<1x8xf32>
    %8 = vector.broadcast %7 : vector<1x8xf32> to vector<8x8xf32>
    %9 = arith.mulf %4, %8 : vector<8x8xf32>
    %10 = arith.addf %2, %9 : vector<8x8xf32>
    %c0_7 = arith.constant 0 : index
    %c0_8 = arith.constant 0 : index
    %c1 = arith.constant 1 : index
    %c0_9 = arith.constant 0 : index
    %11 = vector.load %arg1[%c0_7, %c0_8, %c1, %c0_9] : memref<1x10x10x8xf32, #tpu.memory_space<vmem>>, vector<1x1x8x8xf32>
    %12 = vector.shape_cast %11 : vector<1x1x8x8xf32> to vector<8x8xf32>
    %13 = vector.extract_strided_slice %0 {offsets = [1, 0], sizes = [1, 8], strides = [1, 1]} : vector<9x8xf32> to vector<1x8xf32>
    %14 = vector.shape_cast %13 : vector<1x8xf32> to vector<8xf32>
    %15 = vector.shape_cast %14 : vector<8xf32> to vector<1x8xf32>
    %16 = vector.broadcast %15 : vector<1x8xf32> to vector<8x8xf32>
    %17 = arith.mulf %12, %16 : vector<8x8xf32>
    %18 = arith.addf %10, %17 : vector<8x8xf32>
    %c0_10 = arith.constant 0 : index
    %c0_11 = arith.constant 0 : index
    %c2 = arith.constant 2 : index
    %c0_12 = arith.constant 0 : index
    %19 = vector.load %arg1[%c0_10, %c0_11, %c2, %c0_12] : memref<1x10x10x8xf32, #tpu.memory_space<vmem>>, vector<1x1x8x8xf32>
    %20 = vector.shape_cast %19 : vector<1x1x8x8xf32> to vector<8x8xf32>
    %21 = vector.extract_strided_slice %0 {offsets = [2, 0], sizes = [1, 8], strides = [1, 1]} : vector<9x8xf32> to vector<1x8xf32>
    %22 = vector.shape_cast %21 : vector<1x8xf32> to vector<8xf32>
    %23 = vector.shape_cast %22 : vector<8xf32> to vector<1x8xf32>
    %24 = vector.broadcast %23 : vector<1x8xf32> to vector<8x8xf32>
    %25 = arith.mulf %20, %24 : vector<8x8xf32>
    %26 = arith.addf %18, %25 : vector<8x8xf32>
    %c0_13 = arith.constant 0 : index
    %c1_14 = arith.constant 1 : index
    %c0_15 = arith.constant 0 : index
    %c0_16 = arith.constant 0 : index
    %27 = vector.load %arg1[%c0_13, %c1_14, %c0_15, %c0_16] : memref<1x10x10x8xf32, #tpu.memory_space<vmem>>, vector<1x1x8x8xf32>
    %28 = vector.shape_cast %27 : vector<1x1x8x8xf32> to vector<8x8xf32>
    %29 = vector.extract_strided_slice %0 {offsets = [3, 0], sizes = [1, 8], strides = [1, 1]} : vector<9x8xf32> to vector<1x8xf32>
    %30 = vector.shape_cast %29 : vector<1x8xf32> to vector<8xf32>
    %31 = vector.shape_cast %30 : vector<8xf32> to vector<1x8xf32>
    %32 = vector.broadcast %31 : vector<1x8xf32> to vector<8x8xf32>
    %33 = arith.mulf %28, %32 : vector<8x8xf32>
    %34 = arith.addf %26, %33 : vector<8x8xf32>
    %c0_17 = arith.constant 0 : index
    %c1_18 = arith.constant 1 : index
    %c1_19 = arith.constant 1 : index
    %c0_20 = arith.constant 0 : index
    %35 = vector.load %arg1[%c0_17, %c1_18, %c1_19, %c0_20] : memref<1x10x10x8xf32, #tpu.memory_space<vmem>>, vector<1x1x8x8xf32>
    %36 = vector.shape_cast %35 : vector<1x1x8x8xf32> to vector<8x8xf32>
    %37 = vector.extract_strided_slice %0 {offsets = [4, 0], sizes = [1, 8], strides = [1, 1]} : vector<9x8xf32> to vector<1x8xf32>
    %38 = vector.shape_cast %37 : vector<1x8xf32> to vector<8xf32>
    %39 = vector.shape_cast %38 : vector<8xf32> to vector<1x8xf32>
    %40 = vector.broadcast %39 : vector<1x8xf32> to vector<8x8xf32>
    %41 = arith.mulf %36, %40 : vector<8x8xf32>
    %42 = arith.addf %34, %41 : vector<8x8xf32>
    %c0_21 = arith.constant 0 : index
    %c1_22 = arith.constant 1 : index
    %c2_23 = arith.constant 2 : index
    %c0_24 = arith.constant 0 : index
    %43 = vector.load %arg1[%c0_21, %c1_22, %c2_23, %c0_24] : memref<1x10x10x8xf32, #tpu.memory_space<vmem>>, vector<1x1x8x8xf32>
    %44 = vector.shape_cast %43 : vector<1x1x8x8xf32> to vector<8x8xf32>
    %45 = vector.extract_strided_slice %0 {offsets = [5, 0], sizes = [1, 8], strides = [1, 1]} : vector<9x8xf32> to vector<1x8xf32>
    %46 = vector.shape_cast %45 : vector<1x8xf32> to vector<8xf32>
    %47 = vector.shape_cast %46 : vector<8xf32> to vector<1x8xf32>
    %48 = vector.broadcast %47 : vector<1x8xf32> to vector<8x8xf32>
    %49 = arith.mulf %44, %48 : vector<8x8xf32>
    %50 = arith.addf %42, %49 : vector<8x8xf32>
    %c0_25 = arith.constant 0 : index
    %c2_26 = arith.constant 2 : index
    %c0_27 = arith.constant 0 : index
    %c0_28 = arith.constant 0 : index
    %51 = vector.load %arg1[%c0_25, %c2_26, %c0_27, %c0_28] : memref<1x10x10x8xf32, #tpu.memory_space<vmem>>, vector<1x1x8x8xf32>
    %52 = vector.shape_cast %51 : vector<1x1x8x8xf32> to vector<8x8xf32>
    %53 = vector.extract_strided_slice %0 {offsets = [6, 0], sizes = [1, 8], strides = [1, 1]} : vector<9x8xf32> to vector<1x8xf32>
    %54 = vector.shape_cast %53 : vector<1x8xf32> to vector<8xf32>
    %55 = vector.shape_cast %54 : vector<8xf32> to vector<1x8xf32>
    %56 = vector.broadcast %55 : vector<1x8xf32> to vector<8x8xf32>
    %57 = arith.mulf %52, %56 : vector<8x8xf32>
    %58 = arith.addf %50, %57 : vector<8x8xf32>
    %c0_29 = arith.constant 0 : index
    %c2_30 = arith.constant 2 : index
    %c1_31 = arith.constant 1 : index
    %c0_32 = arith.constant 0 : index
    %59 = vector.load %arg1[%c0_29, %c2_30, %c1_31, %c0_32] : memref<1x10x10x8xf32, #tpu.memory_space<vmem>>, vector<1x1x8x8xf32>
    %60 = vector.shape_cast %59 : vector<1x1x8x8xf32> to vector<8x8xf32>
    %61 = vector.extract_strided_slice %0 {offsets = [7, 0], sizes = [1, 8], strides = [1, 1]} : vector<9x8xf32> to vector<1x8xf32>
    %62 = vector.shape_cast %61 : vector<1x8xf32> to vector<8xf32>
    %63 = vector.shape_cast %62 : vector<8xf32> to vector<1x8xf32>
    %64 = vector.broadcast %63 : vector<1x8xf32> to vector<8x8xf32>
    %65 = arith.mulf %60, %64 : vector<8x8xf32>
    %66 = arith.addf %58, %65 : vector<8x8xf32>
    %c0_33 = arith.constant 0 : index
    %c2_34 = arith.constant 2 : index
    %c2_35 = arith.constant 2 : index
    %c0_36 = arith.constant 0 : index
    %67 = vector.load %arg1[%c0_33, %c2_34, %c2_35, %c0_36] : memref<1x10x10x8xf32, #tpu.memory_space<vmem>>, vector<1x1x8x8xf32>
    %68 = vector.shape_cast %67 : vector<1x1x8x8xf32> to vector<8x8xf32>
    %69 = vector.extract_strided_slice %0 {offsets = [8, 0], sizes = [1, 8], strides = [1, 1]} : vector<9x8xf32> to vector<1x8xf32>
    %70 = vector.shape_cast %69 : vector<1x8xf32> to vector<8xf32>
    %71 = vector.shape_cast %70 : vector<8xf32> to vector<1x8xf32>
    %72 = vector.broadcast %71 : vector<1x8xf32> to vector<8x8xf32>
    %73 = arith.mulf %68, %72 : vector<8x8xf32>
    %74 = arith.addf %66, %73 : vector<8x8xf32>
    %75 = vector.broadcast %1 : vector<1x8xf32> to vector<8x8xf32>
    %76 = arith.addf %74, %75 : vector<8x8xf32>
    %cst_37 = arith.constant 0.000000e+00 : f32
    %77 = vector.broadcast %cst_37 : f32 to vector<8x8xf32>
    %78 = arith.maximumf %76, %77 : vector<8x8xf32>
    %c0_38 = arith.constant 0 : index
    %c0_39 = arith.constant 0 : index
    %79 = vector.load %arg7[%c0_38, %c0_39] : memref<64x8xf32, #tpu.memory_space<vmem>>, vector<8x8xf32>
    tpu.vector_store %arg7[%c0_38, %c0_39], %78 {strides = array<i32>} : memref<64x8xf32, #tpu.memory_space<vmem>>, vector<8x8xf32>,
    %cst_40 = arith.constant 0.000000e+00 : f32
    %80 = vector.broadcast %cst_40 : f32 to vector<8x8xf32>
    %c0_41 = arith.constant 0 : index
    %c1_42 = arith.constant 1 : index
    %c0_43 = arith.constant 0 : index
    %c0_44 = arith.constant 0 : index
    %81 = vector.load %arg1[%c0_41, %c1_42, %c0_43, %c0_44] : memref<1x10x10x8xf32, #tpu.memory_space<vmem>>, vector<1x1x8x8xf32>
    %82 = vector.shape_cast %81 : vector<1x1x8x8xf32> to vector<8x8xf32>
    %83 = vector.extract_strided_slice %0 {offsets = [0, 0], sizes = [1, 8], strides = [1, 1]} : vector<9x8xf32> to vector<1x8xf32>
    %84 = vector.shape_cast %83 : vector<1x8xf32> to vector<8xf32>
    %85 = vector.shape_cast %84 : vector<8xf32> to vector<1x8xf32>
    %86 = vector.broadcast %85 : vector<1x8xf32> to vector<8x8xf32>
    %87 = arith.mulf %82, %86 : vector<8x8xf32>
    %88 = arith.addf %80, %87 : vector<8x8xf32>
    %c0_45 = arith.constant 0 : index
    %c1_46 = arith.constant 1 : index
    %c1_47 = arith.constant 1 : index
    %c0_48 = arith.constant 0 : index
    %89 = vector.load %arg1[%c0_45, %c1_46, %c1_47, %c0_48] : memref<1x10x10x8xf32, #tpu.memory_space<vmem>>, vector<1x1x8x8xf32>
    %90 = vector.shape_cast %89 : vector<1x1x8x8xf32> to vector<8x8xf32>
    %91 = vector.extract_strided_slice %0 {offsets = [1, 0], sizes = [1, 8], strides = [1, 1]} : vector<9x8xf32> to vector<1x8xf32>
    %92 = vector.shape_cast %91 : vector<1x8xf32> to vector<8xf32>
    %93 = vector.shape_cast %92 : vector<8xf32> to vector<1x8xf32>
    %94 = vector.broadcast %93 : vector<1x8xf32> to vector<8x8xf32>
    %95 = arith.mulf %90, %94 : vector<8x8xf32>
    %96 = arith.addf %88, %95 : vector<8x8xf32>
    %c0_49 = arith.constant 0 : index
    %c1_50 = arith.constant 1 : index
    %c2_51 = arith.constant 2 : index
    %c0_52 = arith.constant 0 : index
    %97 = vector.load %arg1[%c0_49, %c1_50, %c2_51, %c0_52] : memref<1x10x10x8xf32, #tpu.memory_space<vmem>>, vector<1x1x8x8xf32>
    %98 = vector.shape_cast %97 : vector<1x1x8x8xf32> to vector<8x8xf32>
    %99 = vector.extract_strided_slice %0 {offsets = [2, 0], sizes = [1, 8], strides = [1, 1]} : vector<9x8xf32> to vector<1x8xf32>
    %100 = vector.shape_cast %99 : vector<1x8xf32> to vector<8xf32>
    %101 = vector.shape_cast %100 : vector<8xf32> to vector<1x8xf32>
    %102 = vector.broadcast %101 : vector<1x8xf32> to vector<8x8xf32>
    %103 = arith.mulf %98, %102 : vector<8x8xf32>
    %104 = arith.addf %96, %103 : vector<8x8xf32>
    %c0_53 = arith.constant 0 : index
    %c2_54 = arith.constant 2 : index
    %c0_55 = arith.constant 0 : index
    %c0_56 = arith.constant 0 : index
    %105 = vector.load %arg1[%c0_53, %c2_54, %c0_55, %c0_56] : memref<1x10x10x8xf32, #tpu.memory_space<vmem>>, vector<1x1x8x8xf32>
    %106 = vector.shape_cast %105 : vector<1x1x8x8xf32> to vector<8x8xf32>
    %107 = vector.extract_strided_slice %0 {offsets = [3, 0], sizes = [1, 8], strides = [1, 1]} : vector<9x8xf32> to vector<1x8xf32>
    %108 = vector.shape_cast %107 : vector<1x8xf32> to vector<8xf32>
    %109 = vector.shape_cast %108 : vector<8xf32> to vector<1x8xf32>
    %110 = vector.broadcast %109 : vector<1x8xf32> to vector<8x8xf32>
    %111 = arith.mulf %106, %110 : vector<8x8xf32>
    %112 = arith.addf %104, %111 : vector<8x8xf32>
    %c0_57 = arith.constant 0 : index
    %c2_58 = arith.constant 2 : index
    %c1_59 = arith.constant 1 : index
    %c0_60 = arith.constant 0 : index
    %113 = vector.load %arg1[%c0_57, %c2_58, %c1_59, %c0_60] : memref<1x10x10x8xf32, #tpu.memory_space<vmem>>, vector<1x1x8x8xf32>
    %114 = vector.shape_cast %113 : vector<1x1x8x8xf32> to vector<8x8xf32>
    %115 = vector.extract_strided_slice %0 {offsets = [4, 0], sizes = [1, 8], strides = [1, 1]} : vector<9x8xf32> to vector<1x8xf32>
    %116 = vector.shape_cast %115 : vector<1x8xf32> to vector<8xf32>
    %117 = vector.shape_cast %116 : vector<8xf32> to vector<1x8xf32>
    %118 = vector.broadcast %117 : vector<1x8xf32> to vector<8x8xf32>
    %119 = arith.mulf %114, %118 : vector<8x8xf32>
    %120 = arith.addf %112, %119 : vector<8x8xf32>
    %c0_61 = arith.constant 0 : index
    %c2_62 = arith.constant 2 : index
    %c2_63 = arith.constant 2 : index
    %c0_64 = arith.constant 0 : index
    %121 = vector.load %arg1[%c0_61, %c2_62, %c2_63, %c0_64] : memref<1x10x10x8xf32, #tpu.memory_space<vmem>>, vector<1x1x8x8xf32>
    %122 = vector.shape_cast %121 : vector<1x1x8x8xf32> to vector<8x8xf32>
    %123 = vector.extract_strided_slice %0 {offsets = [5, 0], sizes = [1, 8], strides = [1, 1]} : vector<9x8xf32> to vector<1x8xf32>
    %124 = vector.shape_cast %123 : vector<1x8xf32> to vector<8xf32>
    %125 = vector.shape_cast %124 : vector<8xf32> to vector<1x8xf32>
    %126 = vector.broadcast %125 : vector<1x8xf32> to vector<8x8xf32>
    %127 = arith.mulf %122, %126 : vector<8x8xf32>
    %128 = arith.addf %120, %127 : vector<8x8xf32>
    %c0_65 = arith.constant 0 : index
    %c3 = arith.constant 3 : index
    %c0_66 = arith.constant 0 : index
    %c0_67 = arith.constant 0 : index
    %129 = vector.load %arg1[%c0_65, %c3, %c0_66, %c0_67] : memref<1x10x10x8xf32, #tpu.memory_space<vmem>>, vector<1x1x8x8xf32>
    %130 = vector.shape_cast %129 : vector<1x1x8x8xf32> to vector<8x8xf32>
    %131 = vector.extract_strided_slice %0 {offsets = [6, 0], sizes = [1, 8], strides = [1, 1]} : vector<9x8xf32> to vector<1x8xf32>
    %132 = vector.shape_cast %131 : vector<1x8xf32> to vector<8xf32>
    %133 = vector.shape_cast %132 : vector<8xf32> to vector<1x8xf32>
    %134 = vector.broadcast %133 : vector<1x8xf32> to vector<8x8xf32>
    %135 = arith.mulf %130, %134 : vector<8x8xf32>
    %136 = arith.addf %128, %135 : vector<8x8xf32>
    %c0_68 = arith.constant 0 : index
    %c3_69 = arith.constant 3 : index
    %c1_70 = arith.constant 1 : index
    %c0_71 = arith.constant 0 : index
    %137 = vector.load %arg1[%c0_68, %c3_69, %c1_70, %c0_71] : memref<1x10x10x8xf32, #tpu.memory_space<vmem>>, vector<1x1x8x8xf32>
    %138 = vector.shape_cast %137 : vector<1x1x8x8xf32> to vector<8x8xf32>
    %139 = vector.extract_strided_slice %0 {offsets = [7, 0], sizes = [1, 8], strides = [1, 1]} : vector<9x8xf32> to vector<1x8xf32>
    %140 = vector.shape_cast %139 : vector<1x8xf32> to vector<8xf32>
    %141 = vector.shape_cast %140 : vector<8xf32> to vector<1x8xf32>
    %142 = vector.broadcast %141 : vector<1x8xf32> to vector<8x8xf32>
    %143 = arith.mulf %138, %142 : vector<8x8xf32>
    %144 = arith.addf %136, %143 : vector<8x8xf32>
    %c0_72 = arith.constant 0 : index
    %c3_73 = arith.constant 3 : index
    %c2_74 = arith.constant 2 : index
    %c0_75 = arith.constant 0 : index
    %145 = vector.load %arg1[%c0_72, %c3_73, %c2_74, %c0_75] : memref<1x10x10x8xf32, #tpu.memory_space<vmem>>, vector<1x1x8x8xf32>
    %146 = vector.shape_cast %145 : vector<1x1x8x8xf32> to vector<8x8xf32>
    %147 = vector.extract_strided_slice %0 {offsets = [8, 0], sizes = [1, 8], strides = [1, 1]} : vector<9x8xf32> to vector<1x8xf32>
    %148 = vector.shape_cast %147 : vector<1x8xf32> to vector<8xf32>
    %149 = vector.shape_cast %148 : vector<8xf32> to vector<1x8xf32>
    %150 = vector.broadcast %149 : vector<1x8xf32> to vector<8x8xf32>
    %151 = arith.mulf %146, %150 : vector<8x8xf32>
    %152 = arith.addf %144, %151 : vector<8x8xf32>
    %153 = vector.broadcast %1 : vector<1x8xf32> to vector<8x8xf32>
    %154 = arith.addf %152, %153 : vector<8x8xf32>
    %cst_76 = arith.constant 0.000000e+00 : f32
    %155 = vector.broadcast %cst_76 : f32 to vector<8x8xf32>
    %156 = arith.maximumf %154, %155 : vector<8x8xf32>
    %c8 = arith.constant 8 : index
    %c0_77 = arith.constant 0 : index
    %157 = vector.load %arg7[%c8, %c0_77] : memref<64x8xf32, #tpu.memory_space<vmem>>, vector<8x8xf32>
    tpu.vector_store %arg7[%c8, %c0_77], %156 {strides = array<i32>} : memref<64x8xf32, #tpu.memory_space<vmem>>, vector<8x8xf32>,
    %cst_78 = arith.constant 0.000000e+00 : f32
    %158 = vector.broadcast %cst_78 : f32 to vector<8x8xf32>
    %c0_79 = arith.constant 0 : index
    %c2_80 = arith.constant 2 : index
    %c0_81 = arith.constant 0 : index
    %c0_82 = arith.constant 0 : index
    %159 = vector.load %arg1[%c0_79, %c2_80, %c0_81, %c0_82] : memref<1x10x10x8xf32, #tpu.memory_space<vmem>>, vector<1x1x8x8xf32>
    %160 = vector.shape_cast %159 : vector<1x1x8x8xf32> to vector<8x8xf32>
    %161 = vector.extract_strided_slice %0 {offsets = [0, 0], sizes = [1, 8], strides = [1, 1]} : vector<9x8xf32> to vector<1x8xf32>
    %162 = vector.shape_cast %161 : vector<1x8xf32> to vector<8xf32>
    %163 = vector.shape_cast %162 : vector<8xf32> to vector<1x8xf32>
    %164 = vector.broadcast %163 : vector<1x8xf32> to vector<8x8xf32>
    %165 = arith.mulf %160, %164 : vector<8x8xf32>
    %166 = arith.addf %158, %165 : vector<8x8xf32>
    %c0_83 = arith.constant 0 : index
    %c2_84 = arith.constant 2 : index
    %c1_85 = arith.constant 1 : index
    %c0_86 = arith.constant 0 : index
    %167 = vector.load %arg1[%c0_83, %c2_84, %c1_85, %c0_86] : memref<1x10x10x8xf32, #tpu.memory_space<vmem>>, vector<1x1x8x8xf32>
    %168 = vector.shape_cast %167 : vector<1x1x8x8xf32> to vector<8x8xf32>
    %169 = vector.extract_strided_slice %0 {offsets = [1, 0], sizes = [1, 8], strides = [1, 1]} : vector<9x8xf32> to vector<1x8xf32>
    %170 = vector.shape_cast %169 : vector<1x8xf32> to vector<8xf32>
    %171 = vector.shape_cast %170 : vector<8xf32> to vector<1x8xf32>
    %172 = vector.broadcast %171 : vector<1x8xf32> to vector<8x8xf32>
    %173 = arith.mulf %168, %172 : vector<8x8xf32>
    %174 = arith.addf %166, %173 : vector<8x8xf32>
    %c0_87 = arith.constant 0 : index
    %c2_88 = arith.constant 2 : index
    %c2_89 = arith.constant 2 : index
    %c0_90 = arith.constant 0 : index
    %175 = vector.load %arg1[%c0_87, %c2_88, %c2_89, %c0_90] : memref<1x10x10x8xf32, #tpu.memory_space<vmem>>, vector<1x1x8x8xf32>
    %176 = vector.shape_cast %175 : vector<1x1x8x8xf32> to vector<8x8xf32>
    %177 = vector.extract_strided_slice %0 {offsets = [2, 0], sizes = [1, 8], strides = [1, 1]} : vector<9x8xf32> to vector<1x8xf32>
    %178 = vector.shape_cast %177 : vector<1x8xf32> to vector<8xf32>
    %179 = vector.shape_cast %178 : vector<8xf32> to vector<1x8xf32>
    %180 = vector.broadcast %179 : vector<1x8xf32> to vector<8x8xf32>
    %181 = arith.mulf %176, %180 : vector<8x8xf32>
    %182 = arith.addf %174, %181 : vector<8x8xf32>
    %c0_91 = arith.constant 0 : index
    %c3_92 = arith.constant 3 : index
    %c0_93 = arith.constant 0 : index
    %c0_94 = arith.constant 0 : index
    %183 = vector.load %arg1[%c0_91, %c3_92, %c0_93, %c0_94] : memref<1x10x10x8xf32, #tpu.memory_space<vmem>>, vector<1x1x8x8xf32>
    %184 = vector.shape_cast %183 : vector<1x1x8x8xf32> to vector<8x8xf32>
    %185 = vector.extract_strided_slice %0 {offsets = [3, 0], sizes = [1, 8], strides = [1, 1]} : vector<9x8xf32> to vector<1x8xf32>
    %186 = vector.shape_cast %185 : vector<1x8xf32> to vector<8xf32>
    %187 = vector.shape_cast %186 : vector<8xf32> to vector<1x8xf32>
    %188 = vector.broadcast %187 : vector<1x8xf32> to vector<8x8xf32>
    %189 = arith.mulf %184, %188 : vector<8x8xf32>
    %190 = arith.addf %182, %189 : vector<8x8xf32>
    %c0_95 = arith.constant 0 : index
    %c3_96 = arith.constant 3 : index
    %c1_97 = arith.constant 1 : index
    %c0_98 = arith.constant 0 : index
    %191 = vector.load %arg1[%c0_95, %c3_96, %c1_97, %c0_98] : memref<1x10x10x8xf32, #tpu.memory_space<vmem>>, vector<1x1x8x8xf32>
    %192 = vector.shape_cast %191 : vector<1x1x8x8xf32> to vector<8x8xf32>
    %193 = vector.extract_strided_slice %0 {offsets = [4, 0], sizes = [1, 8], strides = [1, 1]} : vector<9x8xf32> to vector<1x8xf32>
    %194 = vector.shape_cast %193 : vector<1x8xf32> to vector<8xf32>
    %195 = vector.shape_cast %194 : vector<8xf32> to vector<1x8xf32>
    %196 = vector.broadcast %195 : vector<1x8xf32> to vector<8x8xf32>
    %197 = arith.mulf %192, %196 : vector<8x8xf32>
    %198 = arith.addf %190, %197 : vector<8x8xf32>
    %c0_99 = arith.constant 0 : index
    %c3_100 = arith.constant 3 : index
    %c2_101 = arith.constant 2 : index
    %c0_102 = arith.constant 0 : index
    %199 = vector.load %arg1[%c0_99, %c3_100, %c2_101, %c0_102] : memref<1x10x10x8xf32, #tpu.memory_space<vmem>>, vector<1x1x8x8xf32>
    %200 = vector.shape_cast %199 : vector<1x1x8x8xf32> to vector<8x8xf32>
    %201 = vector.extract_strided_slice %0 {offsets = [5, 0], sizes = [1, 8], strides = [1, 1]} : vector<9x8xf32> to vector<1x8xf32>
    %202 = vector.shape_cast %201 : vector<1x8xf32> to vector<8xf32>
    %203 = vector.shape_cast %202 : vector<8xf32> to vector<1x8xf32>
    %204 = vector.broadcast %203 : vector<1x8xf32> to vector<8x8xf32>
    %205 = arith.mulf %200, %204 : vector<8x8xf32>
    %206 = arith.addf %198, %205 : vector<8x8xf32>
    %c0_103 = arith.constant 0 : index
    %c4 = arith.constant 4 : index
    %c0_104 = arith.constant 0 : index
    %c0_105 = arith.constant 0 : index
    %207 = vector.load %arg1[%c0_103, %c4, %c0_104, %c0_105] : memref<1x10x10x8xf32, #tpu.memory_space<vmem>>, vector<1x1x8x8xf32>
    %208 = vector.shape_cast %207 : vector<1x1x8x8xf32> to vector<8x8xf32>
    %209 = vector.extract_strided_slice %0 {offsets = [6, 0], sizes = [1, 8], strides = [1, 1]} : vector<9x8xf32> to vector<1x8xf32>
    %210 = vector.shape_cast %209 : vector<1x8xf32> to vector<8xf32>
    %211 = vector.shape_cast %210 : vector<8xf32> to vector<1x8xf32>
    %212 = vector.broadcast %211 : vector<1x8xf32> to vector<8x8xf32>
    %213 = arith.mulf %208, %212 : vector<8x8xf32>
    %214 = arith.addf %206, %213 : vector<8x8xf32>
    %c0_106 = arith.constant 0 : index
    %c4_107 = arith.constant 4 : index
    %c1_108 = arith.constant 1 : index
    %c0_109 = arith.constant 0 : index
    %215 = vector.load %arg1[%c0_106, %c4_107, %c1_108, %c0_109] : memref<1x10x10x8xf32, #tpu.memory_space<vmem>>, vector<1x1x8x8xf32>
    %216 = vector.shape_cast %215 : vector<1x1x8x8xf32> to vector<8x8xf32>
    %217 = vector.extract_strided_slice %0 {offsets = [7, 0], sizes = [1, 8], strides = [1, 1]} : vector<9x8xf32> to vector<1x8xf32>
    %218 = vector.shape_cast %217 : vector<1x8xf32> to vector<8xf32>
    %219 = vector.shape_cast %218 : vector<8xf32> to vector<1x8xf32>
    %220 = vector.broadcast %219 : vector<1x8xf32> to vector<8x8xf32>
    %221 = arith.mulf %216, %220 : vector<8x8xf32>
    %222 = arith.addf %214, %221 : vector<8x8xf32>
    %c0_110 = arith.constant 0 : index
    %c4_111 = arith.constant 4 : index
    %c2_112 = arith.constant 2 : index
    %c0_113 = arith.constant 0 : index
    %223 = vector.load %arg1[%c0_110, %c4_111, %c2_112, %c0_113] : memref<1x10x10x8xf32, #tpu.memory_space<vmem>>, vector<1x1x8x8xf32>
    %224 = vector.shape_cast %223 : vector<1x1x8x8xf32> to vector<8x8xf32>
    %225 = vector.extract_strided_slice %0 {offsets = [8, 0], sizes = [1, 8], strides = [1, 1]} : vector<9x8xf32> to vector<1x8xf32>
    %226 = vector.shape_cast %225 : vector<1x8xf32> to vector<8xf32>
    %227 = vector.shape_cast %226 : vector<8xf32> to vector<1x8xf32>
    %228 = vector.broadcast %227 : vector<1x8xf32> to vector<8x8xf32>
    %229 = arith.mulf %224, %228 : vector<8x8xf32>
    %230 = arith.addf %222, %229 : vector<8x8xf32>
    %231 = vector.broadcast %1 : vector<1x8xf32> to vector<8x8xf32>
    %232 = arith.addf %230, %231 : vector<8x8xf32>
    %cst_114 = arith.constant 0.000000e+00 : f32
    %233 = vector.broadcast %cst_114 : f32 to vector<8x8xf32>
    %234 = arith.maximumf %232, %233 : vector<8x8xf32>
    %c16 = arith.constant 16 : index
    %c0_115 = arith.constant 0 : index
    %235 = vector.load %arg7[%c16, %c0_115] : memref<64x8xf32, #tpu.memory_space<vmem>>, vector<8x8xf32>
    tpu.vector_store %arg7[%c16, %c0_115], %234 {strides = array<i32>} : memref<64x8xf32, #tpu.memory_space<vmem>>, vector<8x8xf32>,
    %cst_116 = arith.constant 0.000000e+00 : f32
    %236 = vector.broadcast %cst_116 : f32 to vector<8x8xf32>
    %c0_117 = arith.constant 0 : index
    %c3_118 = arith.constant 3 : index
    %c0_119 = arith.constant 0 : index
    %c0_120 = arith.constant 0 : index
    %237 = vector.load %arg1[%c0_117, %c3_118, %c0_119, %c0_120] : memref<1x10x10x8xf32, #tpu.memory_space<vmem>>, vector<1x1x8x8xf32>
    %238 = vector.shape_cast %237 : vector<1x1x8x8xf32> to vector<8x8xf32>
    %239 = vector.extract_strided_slice %0 {offsets = [0, 0], sizes = [1, 8], strides = [1, 1]} : vector<9x8xf32> to vector<1x8xf32>
    %240 = vector.shape_cast %239 : vector<1x8xf32> to vector<8xf32>
    %241 = vector.shape_cast %240 : vector<8xf32> to vector<1x8xf32>
    %242 = vector.broadcast %241 : vector<1x8xf32> to vector<8x8xf32>
    %243 = arith.mulf %238, %242 : vector<8x8xf32>
    %244 = arith.addf %236, %243 : vector<8x8xf32>
    %c0_121 = arith.constant 0 : index
    %c3_122 = arith.constant 3 : index
    %c1_123 = arith.constant 1 : index
    %c0_124 = arith.constant 0 : index
    %245 = vector.load %arg1[%c0_121, %c3_122, %c1_123, %c0_124] : memref<1x10x10x8xf32, #tpu.memory_space<vmem>>, vector<1x1x8x8xf32>
    %246 = vector.shape_cast %245 : vector<1x1x8x8xf32> to vector<8x8xf32>
    %247 = vector.extract_strided_slice %0 {offsets = [1, 0], sizes = [1, 8], strides = [1, 1]} : vector<9x8xf32> to vector<1x8xf32>
    %248 = vector.shape_cast %247 : vector<1x8xf32> to vector<8xf32>
    %249 = vector.shape_cast %248 : vector<8xf32> to vector<1x8xf32>
    %250 = vector.broadcast %249 : vector<1x8xf32> to vector<8x8xf32>
    %251 = arith.mulf %246, %250 : vector<8x8xf32>
    %252 = arith.addf %244, %251 : vector<8x8xf32>
    %c0_125 = arith.constant 0 : index
    %c3_126 = arith.constant 3 : index
    %c2_127 = arith.constant 2 : index
    %c0_128 = arith.constant 0 : index
    %253 = vector.load %arg1[%c0_125, %c3_126, %c2_127, %c0_128] : memref<1x10x10x8xf32, #tpu.memory_space<vmem>>, vector<1x1x8x8xf32>
    %254 = vector.shape_cast %253 : vector<1x1x8x8xf32> to vector<8x8xf32>
    %255 = vector.extract_strided_slice %0 {offsets = [2, 0], sizes = [1, 8], strides = [1, 1]} : vector<9x8xf32> to vector<1x8xf32>
    %256 = vector.shape_cast %255 : vector<1x8xf32> to vector<8xf32>
    %257 = vector.shape_cast %256 : vector<8xf32> to vector<1x8xf32>
    %258 = vector.broadcast %257 : vector<1x8xf32> to vector<8x8xf32>
    %259 = arith.mulf %254, %258 : vector<8x8xf32>
    %260 = arith.addf %252, %259 : vector<8x8xf32>
    %c0_129 = arith.constant 0 : index
    %c4_130 = arith.constant 4 : index
    %c0_131 = arith.constant 0 : index
    %c0_132 = arith.constant 0 : index
    %261 = vector.load %arg1[%c0_129, %c4_130, %c0_131, %c0_132] : memref<1x10x10x8xf32, #tpu.memory_space<vmem>>, vector<1x1x8x8xf32>
    %262 = vector.shape_cast %261 : vector<1x1x8x8xf32> to vector<8x8xf32>
    %263 = vector.extract_strided_slice %0 {offsets = [3, 0], sizes = [1, 8], strides = [1, 1]} : vector<9x8xf32> to vector<1x8xf32>
    %264 = vector.shape_cast %263 : vector<1x8xf32> to vector<8xf32>
    %265 = vector.shape_cast %264 : vector<8xf32> to vector<1x8xf32>
    %266 = vector.broadcast %265 : vector<1x8xf32> to vector<8x8xf32>
    %267 = arith.mulf %262, %266 : vector<8x8xf32>
    %268 = arith.addf %260, %267 : vector<8x8xf32>
    %c0_133 = arith.constant 0 : index
    %c4_134 = arith.constant 4 : index
    %c1_135 = arith.constant 1 : index
    %c0_136 = arith.constant 0 : index
    %269 = vector.load %arg1[%c0_133, %c4_134, %c1_135, %c0_136] : memref<1x10x10x8xf32, #tpu.memory_space<vmem>>, vector<1x1x8x8xf32>
    %270 = vector.shape_cast %269 : vector<1x1x8x8xf32> to vector<8x8xf32>
    %271 = vector.extract_strided_slice %0 {offsets = [4, 0], sizes = [1, 8], strides = [1, 1]} : vector<9x8xf32> to vector<1x8xf32>
    %272 = vector.shape_cast %271 : vector<1x8xf32> to vector<8xf32>
    %273 = vector.shape_cast %272 : vector<8xf32> to vector<1x8xf32>
    %274 = vector.broadcast %273 : vector<1x8xf32> to vector<8x8xf32>
    %275 = arith.mulf %270, %274 : vector<8x8xf32>
    %276 = arith.addf %268, %275 : vector<8x8xf32>
    %c0_137 = arith.constant 0 : index
    %c4_138 = arith.constant 4 : index
    %c2_139 = arith.constant 2 : index
    %c0_140 = arith.constant 0 : index
    %277 = vector.load %arg1[%c0_137, %c4_138, %c2_139, %c0_140] : memref<1x10x10x8xf32, #tpu.memory_space<vmem>>, vector<1x1x8x8xf32>
    %278 = vector.shape_cast %277 : vector<1x1x8x8xf32> to vector<8x8xf32>
    %279 = vector.extract_strided_slice %0 {offsets = [5, 0], sizes = [1, 8], strides = [1, 1]} : vector<9x8xf32> to vector<1x8xf32>
    %280 = vector.shape_cast %279 : vector<1x8xf32> to vector<8xf32>
    %281 = vector.shape_cast %280 : vector<8xf32> to vector<1x8xf32>
    %282 = vector.broadcast %281 : vector<1x8xf32> to vector<8x8xf32>
    %283 = arith.mulf %278, %282 : vector<8x8xf32>
    %284 = arith.addf %276, %283 : vector<8x8xf32>
    %c0_141 = arith.constant 0 : index
    %c5 = arith.constant 5 : index
    %c0_142 = arith.constant 0 : index
    %c0_143 = arith.constant 0 : index
    %285 = vector.load %arg1[%c0_141, %c5, %c0_142, %c0_143] : memref<1x10x10x8xf32, #tpu.memory_space<vmem>>, vector<1x1x8x8xf32>
    %286 = vector.shape_cast %285 : vector<1x1x8x8xf32> to vector<8x8xf32>
    %287 = vector.extract_strided_slice %0 {offsets = [6, 0], sizes = [1, 8], strides = [1, 1]} : vector<9x8xf32> to vector<1x8xf32>
    %288 = vector.shape_cast %287 : vector<1x8xf32> to vector<8xf32>
    %289 = vector.shape_cast %288 : vector<8xf32> to vector<1x8xf32>
    %290 = vector.broadcast %289 : vector<1x8xf32> to vector<8x8xf32>
    %291 = arith.mulf %286, %290 : vector<8x8xf32>
    %292 = arith.addf %284, %291 : vector<8x8xf32>
    %c0_144 = arith.constant 0 : index
    %c5_145 = arith.constant 5 : index
    %c1_146 = arith.constant 1 : index
    %c0_147 = arith.constant 0 : index
    %293 = vector.load %arg1[%c0_144, %c5_145, %c1_146, %c0_147] : memref<1x10x10x8xf32, #tpu.memory_space<vmem>>, vector<1x1x8x8xf32>
    %294 = vector.shape_cast %293 : vector<1x1x8x8xf32> to vector<8x8xf32>
    %295 = vector.extract_strided_slice %0 {offsets = [7, 0], sizes = [1, 8], strides = [1, 1]} : vector<9x8xf32> to vector<1x8xf32>
    %296 = vector.shape_cast %295 : vector<1x8xf32> to vector<8xf32>
    %297 = vector.shape_cast %296 : vector<8xf32> to vector<1x8xf32>
    %298 = vector.broadcast %297 : vector<1x8xf32> to vector<8x8xf32>
    %299 = arith.mulf %294, %298 : vector<8x8xf32>
    %300 = arith.addf %292, %299 : vector<8x8xf32>
    %c0_148 = arith.constant 0 : index
    %c5_149 = arith.constant 5 : index
    %c2_150 = arith.constant 2 : index
    %c0_151 = arith.constant 0 : index
    %301 = vector.load %arg1[%c0_148, %c5_149, %c2_150, %c0_151] : memref<1x10x10x8xf32, #tpu.memory_space<vmem>>, vector<1x1x8x8xf32>
    %302 = vector.shape_cast %301 : vector<1x1x8x8xf32> to vector<8x8xf32>
    %303 = vector.extract_strided_slice %0 {offsets = [8, 0], sizes = [1, 8], strides = [1, 1]} : vector<9x8xf32> to vector<1x8xf32>
    %304 = vector.shape_cast %303 : vector<1x8xf32> to vector<8xf32>
    %305 = vector.shape_cast %304 : vector<8xf32> to vector<1x8xf32>
    %306 = vector.broadcast %305 : vector<1x8xf32> to vector<8x8xf32>
    %307 = arith.mulf %302, %306 : vector<8x8xf32>
    %308 = arith.addf %300, %307 : vector<8x8xf32>
    %309 = vector.broadcast %1 : vector<1x8xf32> to vector<8x8xf32>
    %310 = arith.addf %308, %309 : vector<8x8xf32>
    %cst_152 = arith.constant 0.000000e+00 : f32
    %311 = vector.broadcast %cst_152 : f32 to vector<8x8xf32>
    %312 = arith.maximumf %310, %311 : vector<8x8xf32>
    %c24 = arith.constant 24 : index
    %c0_153 = arith.constant 0 : index
    %313 = vector.load %arg7[%c24, %c0_153] : memref<64x8xf32, #tpu.memory_space<vmem>>, vector<8x8xf32>
    tpu.vector_store %arg7[%c24, %c0_153], %312 {strides = array<i32>} : memref<64x8xf32, #tpu.memory_space<vmem>>, vector<8x8xf32>,
    %cst_154 = arith.constant 0.000000e+00 : f32
    %314 = vector.broadcast %cst_154 : f32 to vector<8x8xf32>
    %c0_155 = arith.constant 0 : index
    %c4_156 = arith.constant 4 : index
    %c0_157 = arith.constant 0 : index
    %c0_158 = arith.constant 0 : index
    %315 = vector.load %arg1[%c0_155, %c4_156, %c0_157, %c0_158] : memref<1x10x10x8xf32, #tpu.memory_space<vmem>>, vector<1x1x8x8xf32>
    %316 = vector.shape_cast %315 : vector<1x1x8x8xf32> to vector<8x8xf32>
    %317 = vector.extract_strided_slice %0 {offsets = [0, 0], sizes = [1, 8], strides = [1, 1]} : vector<9x8xf32> to vector<1x8xf32>
    %318 = vector.shape_cast %317 : vector<1x8xf32> to vector<8xf32>
    %319 = vector.shape_cast %318 : vector<8xf32> to vector<1x8xf32>
    %320 = vector.broadcast %319 : vector<1x8xf32> to vector<8x8xf32>
    %321 = arith.mulf %316, %320 : vector<8x8xf32>
    %322 = arith.addf %314, %321 : vector<8x8xf32>
    %c0_159 = arith.constant 0 : index
    %c4_160 = arith.constant 4 : index
    %c1_161 = arith.constant 1 : index
    %c0_162 = arith.constant 0 : index
    %323 = vector.load %arg1[%c0_159, %c4_160, %c1_161, %c0_162] : memref<1x10x10x8xf32, #tpu.memory_space<vmem>>, vector<1x1x8x8xf32>
    %324 = vector.shape_cast %323 : vector<1x1x8x8xf32> to vector<8x8xf32>
    %325 = vector.extract_strided_slice %0 {offsets = [1, 0], sizes = [1, 8], strides = [1, 1]} : vector<9x8xf32> to vector<1x8xf32>
    %326 = vector.shape_cast %325 : vector<1x8xf32> to vector<8xf32>
    %327 = vector.shape_cast %326 : vector<8xf32> to vector<1x8xf32>
    %328 = vector.broadcast %327 : vector<1x8xf32> to vector<8x8xf32>
    %329 = arith.mulf %324, %328 : vector<8x8xf32>
    %330 = arith.addf %322, %329 : vector<8x8xf32>
    %c0_163 = arith.constant 0 : index
    %c4_164 = arith.constant 4 : index
    %c2_165 = arith.constant 2 : index
    %c0_166 = arith.constant 0 : index
    %331 = vector.load %arg1[%c0_163, %c4_164, %c2_165, %c0_166] : memref<1x10x10x8xf32, #tpu.memory_space<vmem>>, vector<1x1x8x8xf32>
    %332 = vector.shape_cast %331 : vector<1x1x8x8xf32> to vector<8x8xf32>
    %333 = vector.extract_strided_slice %0 {offsets = [2, 0], sizes = [1, 8], strides = [1, 1]} : vector<9x8xf32> to vector<1x8xf32>
    %334 = vector.shape_cast %333 : vector<1x8xf32> to vector<8xf32>
    %335 = vector.shape_cast %334 : vector<8xf32> to vector<1x8xf32>
    %336 = vector.broadcast %335 : vector<1x8xf32> to vector<8x8xf32>
    %337 = arith.mulf %332, %336 : vector<8x8xf32>
    %338 = arith.addf %330, %337 : vector<8x8xf32>
    %c0_167 = arith.constant 0 : index
    %c5_168 = arith.constant 5 : index
    %c0_169 = arith.constant 0 : index
    %c0_170 = arith.constant 0 : index
    %339 = vector.load %arg1[%c0_167, %c5_168, %c0_169, %c0_170] : memref<1x10x10x8xf32, #tpu.memory_space<vmem>>, vector<1x1x8x8xf32>
    %340 = vector.shape_cast %339 : vector<1x1x8x8xf32> to vector<8x8xf32>
    %341 = vector.extract_strided_slice %0 {offsets = [3, 0], sizes = [1, 8], strides = [1, 1]} : vector<9x8xf32> to vector<1x8xf32>
    %342 = vector.shape_cast %341 : vector<1x8xf32> to vector<8xf32>
    %343 = vector.shape_cast %342 : vector<8xf32> to vector<1x8xf32>
    %344 = vector.broadcast %343 : vector<1x8xf32> to vector<8x8xf32>
    %345 = arith.mulf %340, %344 : vector<8x8xf32>
    %346 = arith.addf %338, %345 : vector<8x8xf32>
    %c0_171 = arith.constant 0 : index
    %c5_172 = arith.constant 5 : index
    %c1_173 = arith.constant 1 : index
    %c0_174 = arith.constant 0 : index
    %347 = vector.load %arg1[%c0_171, %c5_172, %c1_173, %c0_174] : memref<1x10x10x8xf32, #tpu.memory_space<vmem>>, vector<1x1x8x8xf32>
    %348 = vector.shape_cast %347 : vector<1x1x8x8xf32> to vector<8x8xf32>
    %349 = vector.extract_strided_slice %0 {offsets = [4, 0], sizes = [1, 8], strides = [1, 1]} : vector<9x8xf32> to vector<1x8xf32>
    %350 = vector.shape_cast %349 : vector<1x8xf32> to vector<8xf32>
    %351 = vector.shape_cast %350 : vector<8xf32> to vector<1x8xf32>
    %352 = vector.broadcast %351 : vector<1x8xf32> to vector<8x8xf32>
    %353 = arith.mulf %348, %352 : vector<8x8xf32>
    %354 = arith.addf %346, %353 : vector<8x8xf32>
    %c0_175 = arith.constant 0 : index
    %c5_176 = arith.constant 5 : index
    %c2_177 = arith.constant 2 : index
    %c0_178 = arith.constant 0 : index
    %355 = vector.load %arg1[%c0_175, %c5_176, %c2_177, %c0_178] : memref<1x10x10x8xf32, #tpu.memory_space<vmem>>, vector<1x1x8x8xf32>
    %356 = vector.shape_cast %355 : vector<1x1x8x8xf32> to vector<8x8xf32>
    %357 = vector.extract_strided_slice %0 {offsets = [5, 0], sizes = [1, 8], strides = [1, 1]} : vector<9x8xf32> to vector<1x8xf32>
    %358 = vector.shape_cast %357 : vector<1x8xf32> to vector<8xf32>
    %359 = vector.shape_cast %358 : vector<8xf32> to vector<1x8xf32>
    %360 = vector.broadcast %359 : vector<1x8xf32> to vector<8x8xf32>
    %361 = arith.mulf %356, %360 : vector<8x8xf32>
    %362 = arith.addf %354, %361 : vector<8x8xf32>
    %c0_179 = arith.constant 0 : index
    %c6 = arith.constant 6 : index
    %c0_180 = arith.constant 0 : index
    %c0_181 = arith.constant 0 : index
    %363 = vector.load %arg1[%c0_179, %c6, %c0_180, %c0_181] : memref<1x10x10x8xf32, #tpu.memory_space<vmem>>, vector<1x1x8x8xf32>
    %364 = vector.shape_cast %363 : vector<1x1x8x8xf32> to vector<8x8xf32>
    %365 = vector.extract_strided_slice %0 {offsets = [6, 0], sizes = [1, 8], strides = [1, 1]} : vector<9x8xf32> to vector<1x8xf32>
    %366 = vector.shape_cast %365 : vector<1x8xf32> to vector<8xf32>
    %367 = vector.shape_cast %366 : vector<8xf32> to vector<1x8xf32>
    %368 = vector.broadcast %367 : vector<1x8xf32> to vector<8x8xf32>
    %369 = arith.mulf %364, %368 : vector<8x8xf32>
    %370 = arith.addf %362, %369 : vector<8x8xf32>
    %c0_182 = arith.constant 0 : index
    %c6_183 = arith.constant 6 : index
    %c1_184 = arith.constant 1 : index
    %c0_185 = arith.constant 0 : index
    %371 = vector.load %arg1[%c0_182, %c6_183, %c1_184, %c0_185] : memref<1x10x10x8xf32, #tpu.memory_space<vmem>>, vector<1x1x8x8xf32>
    %372 = vector.shape_cast %371 : vector<1x1x8x8xf32> to vector<8x8xf32>
    %373 = vector.extract_strided_slice %0 {offsets = [7, 0], sizes = [1, 8], strides = [1, 1]} : vector<9x8xf32> to vector<1x8xf32>
    %374 = vector.shape_cast %373 : vector<1x8xf32> to vector<8xf32>
    %375 = vector.shape_cast %374 : vector<8xf32> to vector<1x8xf32>
    %376 = vector.broadcast %375 : vector<1x8xf32> to vector<8x8xf32>
    %377 = arith.mulf %372, %376 : vector<8x8xf32>
    %378 = arith.addf %370, %377 : vector<8x8xf32>
    %c0_186 = arith.constant 0 : index
    %c6_187 = arith.constant 6 : index
    %c2_188 = arith.constant 2 : index
    %c0_189 = arith.constant 0 : index
    %379 = vector.load %arg1[%c0_186, %c6_187, %c2_188, %c0_189] : memref<1x10x10x8xf32, #tpu.memory_space<vmem>>, vector<1x1x8x8xf32>
    %380 = vector.shape_cast %379 : vector<1x1x8x8xf32> to vector<8x8xf32>
    %381 = vector.extract_strided_slice %0 {offsets = [8, 0], sizes = [1, 8], strides = [1, 1]} : vector<9x8xf32> to vector<1x8xf32>
    %382 = vector.shape_cast %381 : vector<1x8xf32> to vector<8xf32>
    %383 = vector.shape_cast %382 : vector<8xf32> to vector<1x8xf32>
    %384 = vector.broadcast %383 : vector<1x8xf32> to vector<8x8xf32>
    %385 = arith.mulf %380, %384 : vector<8x8xf32>
    %386 = arith.addf %378, %385 : vector<8x8xf32>
    %387 = vector.broadcast %1 : vector<1x8xf32> to vector<8x8xf32>
    %388 = arith.addf %386, %387 : vector<8x8xf32>
    %cst_190 = arith.constant 0.000000e+00 : f32
    %389 = vector.broadcast %cst_190 : f32 to vector<8x8xf32>
    %390 = arith.maximumf %388, %389 : vector<8x8xf32>
    %c32 = arith.constant 32 : index
    %c0_191 = arith.constant 0 : index
    %391 = vector.load %arg7[%c32, %c0_191] : memref<64x8xf32, #tpu.memory_space<vmem>>, vector<8x8xf32>
    tpu.vector_store %arg7[%c32, %c0_191], %390 {strides = array<i32>} : memref<64x8xf32, #tpu.memory_space<vmem>>, vector<8x8xf32>,
    %cst_192 = arith.constant 0.000000e+00 : f32
    %392 = vector.broadcast %cst_192 : f32 to vector<8x8xf32>
    %c0_193 = arith.constant 0 : index
    %c5_194 = arith.constant 5 : index
    %c0_195 = arith.constant 0 : index
    %c0_196 = arith.constant 0 : index
    %393 = vector.load %arg1[%c0_193, %c5_194, %c0_195, %c0_196] : memref<1x10x10x8xf32, #tpu.memory_space<vmem>>, vector<1x1x8x8xf32>
    %394 = vector.shape_cast %393 : vector<1x1x8x8xf32> to vector<8x8xf32>
    %395 = vector.extract_strided_slice %0 {offsets = [0, 0], sizes = [1, 8], strides = [1, 1]} : vector<9x8xf32> to vector<1x8xf32>
    %396 = vector.shape_cast %395 : vector<1x8xf32> to vector<8xf32>
    %397 = vector.shape_cast %396 : vector<8xf32> to vector<1x8xf32>
    %398 = vector.broadcast %397 : vector<1x8xf32> to vector<8x8xf32>
    %399 = arith.mulf %394, %398 : vector<8x8xf32>
    %400 = arith.addf %392, %399 : vector<8x8xf32>
    %c0_197 = arith.constant 0 : index
    %c5_198 = arith.constant 5 : index
    %c1_199 = arith.constant 1 : index
    %c0_200 = arith.constant 0 : index
    %401 = vector.load %arg1[%c0_197, %c5_198, %c1_199, %c0_200] : memref<1x10x10x8xf32, #tpu.memory_space<vmem>>, vector<1x1x8x8xf32>
    %402 = vector.shape_cast %401 : vector<1x1x8x8xf32> to vector<8x8xf32>
    %403 = vector.extract_strided_slice %0 {offsets = [1, 0], sizes = [1, 8], strides = [1, 1]} : vector<9x8xf32> to vector<1x8xf32>
    %404 = vector.shape_cast %403 : vector<1x8xf32> to vector<8xf32>
    %405 = vector.shape_cast %404 : vector<8xf32> to vector<1x8xf32>
    %406 = vector.broadcast %405 : vector<1x8xf32> to vector<8x8xf32>
    %407 = arith.mulf %402, %406 : vector<8x8xf32>
    %408 = arith.addf %400, %407 : vector<8x8xf32>
    %c0_201 = arith.constant 0 : index
    %c5_202 = arith.constant 5 : index
    %c2_203 = arith.constant 2 : index
    %c0_204 = arith.constant 0 : index
    %409 = vector.load %arg1[%c0_201, %c5_202, %c2_203, %c0_204] : memref<1x10x10x8xf32, #tpu.memory_space<vmem>>, vector<1x1x8x8xf32>
    %410 = vector.shape_cast %409 : vector<1x1x8x8xf32> to vector<8x8xf32>
    %411 = vector.extract_strided_slice %0 {offsets = [2, 0], sizes = [1, 8], strides = [1, 1]} : vector<9x8xf32> to vector<1x8xf32>
    %412 = vector.shape_cast %411 : vector<1x8xf32> to vector<8xf32>
    %413 = vector.shape_cast %412 : vector<8xf32> to vector<1x8xf32>
    %414 = vector.broadcast %413 : vector<1x8xf32> to vector<8x8xf32>
    %415 = arith.mulf %410, %414 : vector<8x8xf32>
    %416 = arith.addf %408, %415 : vector<8x8xf32>
    %c0_205 = arith.constant 0 : index
    %c6_206 = arith.constant 6 : index
    %c0_207 = arith.constant 0 : index
    %c0_208 = arith.constant 0 : index
    %417 = vector.load %arg1[%c0_205, %c6_206, %c0_207, %c0_208] : memref<1x10x10x8xf32, #tpu.memory_space<vmem>>, vector<1x1x8x8xf32>
    %418 = vector.shape_cast %417 : vector<1x1x8x8xf32> to vector<8x8xf32>
    %419 = vector.extract_strided_slice %0 {offsets = [3, 0], sizes = [1, 8], strides = [1, 1]} : vector<9x8xf32> to vector<1x8xf32>
    %420 = vector.shape_cast %419 : vector<1x8xf32> to vector<8xf32>
    %421 = vector.shape_cast %420 : vector<8xf32> to vector<1x8xf32>
    %422 = vector.broadcast %421 : vector<1x8xf32> to vector<8x8xf32>
    %423 = arith.mulf %418, %422 : vector<8x8xf32>
    %424 = arith.addf %416, %423 : vector<8x8xf32>
    %c0_209 = arith.constant 0 : index
    %c6_210 = arith.constant 6 : index
    %c1_211 = arith.constant 1 : index
    %c0_212 = arith.constant 0 : index
    %425 = vector.load %arg1[%c0_209, %c6_210, %c1_211, %c0_212] : memref<1x10x10x8xf32, #tpu.memory_space<vmem>>, vector<1x1x8x8xf32>
    %426 = vector.shape_cast %425 : vector<1x1x8x8xf32> to vector<8x8xf32>
    %427 = vector.extract_strided_slice %0 {offsets = [4, 0], sizes = [1, 8], strides = [1, 1]} : vector<9x8xf32> to vector<1x8xf32>
    %428 = vector.shape_cast %427 : vector<1x8xf32> to vector<8xf32>
    %429 = vector.shape_cast %428 : vector<8xf32> to vector<1x8xf32>
    %430 = vector.broadcast %429 : vector<1x8xf32> to vector<8x8xf32>
    %431 = arith.mulf %426, %430 : vector<8x8xf32>
    %432 = arith.addf %424, %431 : vector<8x8xf32>
    %c0_213 = arith.constant 0 : index
    %c6_214 = arith.constant 6 : index
    %c2_215 = arith.constant 2 : index
    %c0_216 = arith.constant 0 : index
    %433 = vector.load %arg1[%c0_213, %c6_214, %c2_215, %c0_216] : memref<1x10x10x8xf32, #tpu.memory_space<vmem>>, vector<1x1x8x8xf32>
    %434 = vector.shape_cast %433 : vector<1x1x8x8xf32> to vector<8x8xf32>
    %435 = vector.extract_strided_slice %0 {offsets = [5, 0], sizes = [1, 8], strides = [1, 1]} : vector<9x8xf32> to vector<1x8xf32>
    %436 = vector.shape_cast %435 : vector<1x8xf32> to vector<8xf32>
    %437 = vector.shape_cast %436 : vector<8xf32> to vector<1x8xf32>
    %438 = vector.broadcast %437 : vector<1x8xf32> to vector<8x8xf32>
    %439 = arith.mulf %434, %438 : vector<8x8xf32>
    %440 = arith.addf %432, %439 : vector<8x8xf32>
    %c0_217 = arith.constant 0 : index
    %c7 = arith.constant 7 : index
    %c0_218 = arith.constant 0 : index
    %c0_219 = arith.constant 0 : index
    %441 = vector.load %arg1[%c0_217, %c7, %c0_218, %c0_219] : memref<1x10x10x8xf32, #tpu.memory_space<vmem>>, vector<1x1x8x8xf32>
    %442 = vector.shape_cast %441 : vector<1x1x8x8xf32> to vector<8x8xf32>
    %443 = vector.extract_strided_slice %0 {offsets = [6, 0], sizes = [1, 8], strides = [1, 1]} : vector<9x8xf32> to vector<1x8xf32>
    %444 = vector.shape_cast %443 : vector<1x8xf32> to vector<8xf32>
    %445 = vector.shape_cast %444 : vector<8xf32> to vector<1x8xf32>
    %446 = vector.broadcast %445 : vector<1x8xf32> to vector<8x8xf32>
    %447 = arith.mulf %442, %446 : vector<8x8xf32>
    %448 = arith.addf %440, %447 : vector<8x8xf32>
    %c0_220 = arith.constant 0 : index
    %c7_221 = arith.constant 7 : index
    %c1_222 = arith.constant 1 : index
    %c0_223 = arith.constant 0 : index
    %449 = vector.load %arg1[%c0_220, %c7_221, %c1_222, %c0_223] : memref<1x10x10x8xf32, #tpu.memory_space<vmem>>, vector<1x1x8x8xf32>
    %450 = vector.shape_cast %449 : vector<1x1x8x8xf32> to vector<8x8xf32>
    %451 = vector.extract_strided_slice %0 {offsets = [7, 0], sizes = [1, 8], strides = [1, 1]} : vector<9x8xf32> to vector<1x8xf32>
    %452 = vector.shape_cast %451 : vector<1x8xf32> to vector<8xf32>
    %453 = vector.shape_cast %452 : vector<8xf32> to vector<1x8xf32>
    %454 = vector.broadcast %453 : vector<1x8xf32> to vector<8x8xf32>
    %455 = arith.mulf %450, %454 : vector<8x8xf32>
    %456 = arith.addf %448, %455 : vector<8x8xf32>
    %c0_224 = arith.constant 0 : index
    %c7_225 = arith.constant 7 : index
    %c2_226 = arith.constant 2 : index
    %c0_227 = arith.constant 0 : index
    %457 = vector.load %arg1[%c0_224, %c7_225, %c2_226, %c0_227] : memref<1x10x10x8xf32, #tpu.memory_space<vmem>>, vector<1x1x8x8xf32>
    %458 = vector.shape_cast %457 : vector<1x1x8x8xf32> to vector<8x8xf32>
    %459 = vector.extract_strided_slice %0 {offsets = [8, 0], sizes = [1, 8], strides = [1, 1]} : vector<9x8xf32> to vector<1x8xf32>
    %460 = vector.shape_cast %459 : vector<1x8xf32> to vector<8xf32>
    %461 = vector.shape_cast %460 : vector<8xf32> to vector<1x8xf32>
    %462 = vector.broadcast %461 : vector<1x8xf32> to vector<8x8xf32>
    %463 = arith.mulf %458, %462 : vector<8x8xf32>
    %464 = arith.addf %456, %463 : vector<8x8xf32>
    %465 = vector.broadcast %1 : vector<1x8xf32> to vector<8x8xf32>
    %466 = arith.addf %464, %465 : vector<8x8xf32>
    %cst_228 = arith.constant 0.000000e+00 : f32
    %467 = vector.broadcast %cst_228 : f32 to vector<8x8xf32>
    %468 = arith.maximumf %466, %467 : vector<8x8xf32>
    %c40 = arith.constant 40 : index
    %c0_229 = arith.constant 0 : index
    %469 = vector.load %arg7[%c40, %c0_229] : memref<64x8xf32, #tpu.memory_space<vmem>>, vector<8x8xf32>
    tpu.vector_store %arg7[%c40, %c0_229], %468 {strides = array<i32>} : memref<64x8xf32, #tpu.memory_space<vmem>>, vector<8x8xf32>,
    %cst_230 = arith.constant 0.000000e+00 : f32
    %470 = vector.broadcast %cst_230 : f32 to vector<8x8xf32>
    %c0_231 = arith.constant 0 : index
    %c6_232 = arith.constant 6 : index
    %c0_233 = arith.constant 0 : index
    %c0_234 = arith.constant 0 : index
    %471 = vector.load %arg1[%c0_231, %c6_232, %c0_233, %c0_234] : memref<1x10x10x8xf32, #tpu.memory_space<vmem>>, vector<1x1x8x8xf32>
    %472 = vector.shape_cast %471 : vector<1x1x8x8xf32> to vector<8x8xf32>
    %473 = vector.extract_strided_slice %0 {offsets = [0, 0], sizes = [1, 8], strides = [1, 1]} : vector<9x8xf32> to vector<1x8xf32>
    %474 = vector.shape_cast %473 : vector<1x8xf32> to vector<8xf32>
    %475 = vector.shape_cast %474 : vector<8xf32> to vector<1x8xf32>
    %476 = vector.broadcast %475 : vector<1x8xf32> to vector<8x8xf32>
    %477 = arith.mulf %472, %476 : vector<8x8xf32>
    %478 = arith.addf %470, %477 : vector<8x8xf32>
    %c0_235 = arith.constant 0 : index
    %c6_236 = arith.constant 6 : index
    %c1_237 = arith.constant 1 : index
    %c0_238 = arith.constant 0 : index
    %479 = vector.load %arg1[%c0_235, %c6_236, %c1_237, %c0_238] : memref<1x10x10x8xf32, #tpu.memory_space<vmem>>, vector<1x1x8x8xf32>
    %480 = vector.shape_cast %479 : vector<1x1x8x8xf32> to vector<8x8xf32>
    %481 = vector.extract_strided_slice %0 {offsets = [1, 0], sizes = [1, 8], strides = [1, 1]} : vector<9x8xf32> to vector<1x8xf32>
    %482 = vector.shape_cast %481 : vector<1x8xf32> to vector<8xf32>
    %483 = vector.shape_cast %482 : vector<8xf32> to vector<1x8xf32>
    %484 = vector.broadcast %483 : vector<1x8xf32> to vector<8x8xf32>
    %485 = arith.mulf %480, %484 : vector<8x8xf32>
    %486 = arith.addf %478, %485 : vector<8x8xf32>
    %c0_239 = arith.constant 0 : index
    %c6_240 = arith.constant 6 : index
    %c2_241 = arith.constant 2 : index
    %c0_242 = arith.constant 0 : index
    %487 = vector.load %arg1[%c0_239, %c6_240, %c2_241, %c0_242] : memref<1x10x10x8xf32, #tpu.memory_space<vmem>>, vector<1x1x8x8xf32>
    %488 = vector.shape_cast %487 : vector<1x1x8x8xf32> to vector<8x8xf32>
    %489 = vector.extract_strided_slice %0 {offsets = [2, 0], sizes = [1, 8], strides = [1, 1]} : vector<9x8xf32> to vector<1x8xf32>
    %490 = vector.shape_cast %489 : vector<1x8xf32> to vector<8xf32>
    %491 = vector.shape_cast %490 : vector<8xf32> to vector<1x8xf32>
    %492 = vector.broadcast %491 : vector<1x8xf32> to vector<8x8xf32>
    %493 = arith.mulf %488, %492 : vector<8x8xf32>
    %494 = arith.addf %486, %493 : vector<8x8xf32>
    %c0_243 = arith.constant 0 : index
    %c7_244 = arith.constant 7 : index
    %c0_245 = arith.constant 0 : index
    %c0_246 = arith.constant 0 : index
    %495 = vector.load %arg1[%c0_243, %c7_244, %c0_245, %c0_246] : memref<1x10x10x8xf32, #tpu.memory_space<vmem>>, vector<1x1x8x8xf32>
    %496 = vector.shape_cast %495 : vector<1x1x8x8xf32> to vector<8x8xf32>
    %497 = vector.extract_strided_slice %0 {offsets = [3, 0], sizes = [1, 8], strides = [1, 1]} : vector<9x8xf32> to vector<1x8xf32>
    %498 = vector.shape_cast %497 : vector<1x8xf32> to vector<8xf32>
    %499 = vector.shape_cast %498 : vector<8xf32> to vector<1x8xf32>
    %500 = vector.broadcast %499 : vector<1x8xf32> to vector<8x8xf32>
    %501 = arith.mulf %496, %500 : vector<8x8xf32>
    %502 = arith.addf %494, %501 : vector<8x8xf32>
    %c0_247 = arith.constant 0 : index
    %c7_248 = arith.constant 7 : index
    %c1_249 = arith.constant 1 : index
    %c0_250 = arith.constant 0 : index
    %503 = vector.load %arg1[%c0_247, %c7_248, %c1_249, %c0_250] : memref<1x10x10x8xf32, #tpu.memory_space<vmem>>, vector<1x1x8x8xf32>
    %504 = vector.shape_cast %503 : vector<1x1x8x8xf32> to vector<8x8xf32>
    %505 = vector.extract_strided_slice %0 {offsets = [4, 0], sizes = [1, 8], strides = [1, 1]} : vector<9x8xf32> to vector<1x8xf32>
    %506 = vector.shape_cast %505 : vector<1x8xf32> to vector<8xf32>
    %507 = vector.shape_cast %506 : vector<8xf32> to vector<1x8xf32>
    %508 = vector.broadcast %507 : vector<1x8xf32> to vector<8x8xf32>
    %509 = arith.mulf %504, %508 : vector<8x8xf32>
    %510 = arith.addf %502, %509 : vector<8x8xf32>
    %c0_251 = arith.constant 0 : index
    %c7_252 = arith.constant 7 : index
    %c2_253 = arith.constant 2 : index
    %c0_254 = arith.constant 0 : index
    %511 = vector.load %arg1[%c0_251, %c7_252, %c2_253, %c0_254] : memref<1x10x10x8xf32, #tpu.memory_space<vmem>>, vector<1x1x8x8xf32>
    %512 = vector.shape_cast %511 : vector<1x1x8x8xf32> to vector<8x8xf32>
    %513 = vector.extract_strided_slice %0 {offsets = [5, 0], sizes = [1, 8], strides = [1, 1]} : vector<9x8xf32> to vector<1x8xf32>
    %514 = vector.shape_cast %513 : vector<1x8xf32> to vector<8xf32>
    %515 = vector.shape_cast %514 : vector<8xf32> to vector<1x8xf32>
    %516 = vector.broadcast %515 : vector<1x8xf32> to vector<8x8xf32>
    %517 = arith.mulf %512, %516 : vector<8x8xf32>
    %518 = arith.addf %510, %517 : vector<8x8xf32>
    %c0_255 = arith.constant 0 : index
    %c8_256 = arith.constant 8 : index
    %c0_257 = arith.constant 0 : index
    %c0_258 = arith.constant 0 : index
    %519 = vector.load %arg1[%c0_255, %c8_256, %c0_257, %c0_258] : memref<1x10x10x8xf32, #tpu.memory_space<vmem>>, vector<1x1x8x8xf32>
    %520 = vector.shape_cast %519 : vector<1x1x8x8xf32> to vector<8x8xf32>
    %521 = vector.extract_strided_slice %0 {offsets = [6, 0], sizes = [1, 8], strides = [1, 1]} : vector<9x8xf32> to vector<1x8xf32>
    %522 = vector.shape_cast %521 : vector<1x8xf32> to vector<8xf32>
    %523 = vector.shape_cast %522 : vector<8xf32> to vector<1x8xf32>
    %524 = vector.broadcast %523 : vector<1x8xf32> to vector<8x8xf32>
    %525 = arith.mulf %520, %524 : vector<8x8xf32>
    %526 = arith.addf %518, %525 : vector<8x8xf32>
    %c0_259 = arith.constant 0 : index
    %c8_260 = arith.constant 8 : index
    %c1_261 = arith.constant 1 : index
    %c0_262 = arith.constant 0 : index
    %527 = vector.load %arg1[%c0_259, %c8_260, %c1_261, %c0_262] : memref<1x10x10x8xf32, #tpu.memory_space<vmem>>, vector<1x1x8x8xf32>
    %528 = vector.shape_cast %527 : vector<1x1x8x8xf32> to vector<8x8xf32>
    %529 = vector.extract_strided_slice %0 {offsets = [7, 0], sizes = [1, 8], strides = [1, 1]} : vector<9x8xf32> to vector<1x8xf32>
    %530 = vector.shape_cast %529 : vector<1x8xf32> to vector<8xf32>
    %531 = vector.shape_cast %530 : vector<8xf32> to vector<1x8xf32>
    %532 = vector.broadcast %531 : vector<1x8xf32> to vector<8x8xf32>
    %533 = arith.mulf %528, %532 : vector<8x8xf32>
    %534 = arith.addf %526, %533 : vector<8x8xf32>
    %c0_263 = arith.constant 0 : index
    %c8_264 = arith.constant 8 : index
    %c2_265 = arith.constant 2 : index
    %c0_266 = arith.constant 0 : index
    %535 = vector.load %arg1[%c0_263, %c8_264, %c2_265, %c0_266] : memref<1x10x10x8xf32, #tpu.memory_space<vmem>>, vector<1x1x8x8xf32>
    %536 = vector.shape_cast %535 : vector<1x1x8x8xf32> to vector<8x8xf32>
    %537 = vector.extract_strided_slice %0 {offsets = [8, 0], sizes = [1, 8], strides = [1, 1]} : vector<9x8xf32> to vector<1x8xf32>
    %538 = vector.shape_cast %537 : vector<1x8xf32> to vector<8xf32>
    %539 = vector.shape_cast %538 : vector<8xf32> to vector<1x8xf32>
    %540 = vector.broadcast %539 : vector<1x8xf32> to vector<8x8xf32>
    %541 = arith.mulf %536, %540 : vector<8x8xf32>
    %542 = arith.addf %534, %541 : vector<8x8xf32>
    %543 = vector.broadcast %1 : vector<1x8xf32> to vector<8x8xf32>
    %544 = arith.addf %542, %543 : vector<8x8xf32>
    %cst_267 = arith.constant 0.000000e+00 : f32
    %545 = vector.broadcast %cst_267 : f32 to vector<8x8xf32>
    %546 = arith.maximumf %544, %545 : vector<8x8xf32>
    %c48 = arith.constant 48 : index
    %c0_268 = arith.constant 0 : index
    %547 = vector.load %arg7[%c48, %c0_268] : memref<64x8xf32, #tpu.memory_space<vmem>>, vector<8x8xf32>
    tpu.vector_store %arg7[%c48, %c0_268], %546 {strides = array<i32>} : memref<64x8xf32, #tpu.memory_space<vmem>>, vector<8x8xf32>,
    %cst_269 = arith.constant 0.000000e+00 : f32
    %548 = vector.broadcast %cst_269 : f32 to vector<8x8xf32>
    %c0_270 = arith.constant 0 : index
    %c7_271 = arith.constant 7 : index
    %c0_272 = arith.constant 0 : index
    %c0_273 = arith.constant 0 : index
    %549 = vector.load %arg1[%c0_270, %c7_271, %c0_272, %c0_273] : memref<1x10x10x8xf32, #tpu.memory_space<vmem>>, vector<1x1x8x8xf32>
    %550 = vector.shape_cast %549 : vector<1x1x8x8xf32> to vector<8x8xf32>
    %551 = vector.extract_strided_slice %0 {offsets = [0, 0], sizes = [1, 8], strides = [1, 1]} : vector<9x8xf32> to vector<1x8xf32>
    %552 = vector.shape_cast %551 : vector<1x8xf32> to vector<8xf32>
    %553 = vector.shape_cast %552 : vector<8xf32> to vector<1x8xf32>
    %554 = vector.broadcast %553 : vector<1x8xf32> to vector<8x8xf32>
    %555 = arith.mulf %550, %554 : vector<8x8xf32>
    %556 = arith.addf %548, %555 : vector<8x8xf32>
    %c0_274 = arith.constant 0 : index
    %c7_275 = arith.constant 7 : index
    %c1_276 = arith.constant 1 : index
    %c0_277 = arith.constant 0 : index
    %557 = vector.load %arg1[%c0_274, %c7_275, %c1_276, %c0_277] : memref<1x10x10x8xf32, #tpu.memory_space<vmem>>, vector<1x1x8x8xf32>
    %558 = vector.shape_cast %557 : vector<1x1x8x8xf32> to vector<8x8xf32>
    %559 = vector.extract_strided_slice %0 {offsets = [1, 0], sizes = [1, 8], strides = [1, 1]} : vector<9x8xf32> to vector<1x8xf32>
    %560 = vector.shape_cast %559 : vector<1x8xf32> to vector<8xf32>
    %561 = vector.shape_cast %560 : vector<8xf32> to vector<1x8xf32>
    %562 = vector.broadcast %561 : vector<1x8xf32> to vector<8x8xf32>
    %563 = arith.mulf %558, %562 : vector<8x8xf32>
    %564 = arith.addf %556, %563 : vector<8x8xf32>
    %c0_278 = arith.constant 0 : index
    %c7_279 = arith.constant 7 : index
    %c2_280 = arith.constant 2 : index
    %c0_281 = arith.constant 0 : index
    %565 = vector.load %arg1[%c0_278, %c7_279, %c2_280, %c0_281] : memref<1x10x10x8xf32, #tpu.memory_space<vmem>>, vector<1x1x8x8xf32>
    %566 = vector.shape_cast %565 : vector<1x1x8x8xf32> to vector<8x8xf32>
    %567 = vector.extract_strided_slice %0 {offsets = [2, 0], sizes = [1, 8], strides = [1, 1]} : vector<9x8xf32> to vector<1x8xf32>
    %568 = vector.shape_cast %567 : vector<1x8xf32> to vector<8xf32>
    %569 = vector.shape_cast %568 : vector<8xf32> to vector<1x8xf32>
    %570 = vector.broadcast %569 : vector<1x8xf32> to vector<8x8xf32>
    %571 = arith.mulf %566, %570 : vector<8x8xf32>
    %572 = arith.addf %564, %571 : vector<8x8xf32>
    %c0_282 = arith.constant 0 : index
    %c8_283 = arith.constant 8 : index
    %c0_284 = arith.constant 0 : index
    %c0_285 = arith.constant 0 : index
    %573 = vector.load %arg1[%c0_282, %c8_283, %c0_284, %c0_285] : memref<1x10x10x8xf32, #tpu.memory_space<vmem>>, vector<1x1x8x8xf32>
    %574 = vector.shape_cast %573 : vector<1x1x8x8xf32> to vector<8x8xf32>
    %575 = vector.extract_strided_slice %0 {offsets = [3, 0], sizes = [1, 8], strides = [1, 1]} : vector<9x8xf32> to vector<1x8xf32>
    %576 = vector.shape_cast %575 : vector<1x8xf32> to vector<8xf32>
    %577 = vector.shape_cast %576 : vector<8xf32> to vector<1x8xf32>
    %578 = vector.broadcast %577 : vector<1x8xf32> to vector<8x8xf32>
    %579 = arith.mulf %574, %578 : vector<8x8xf32>
    %580 = arith.addf %572, %579 : vector<8x8xf32>
    %c0_286 = arith.constant 0 : index
    %c8_287 = arith.constant 8 : index
    %c1_288 = arith.constant 1 : index
    %c0_289 = arith.constant 0 : index
    %581 = vector.load %arg1[%c0_286, %c8_287, %c1_288, %c0_289] : memref<1x10x10x8xf32, #tpu.memory_space<vmem>>, vector<1x1x8x8xf32>
    %582 = vector.shape_cast %581 : vector<1x1x8x8xf32> to vector<8x8xf32>
    %583 = vector.extract_strided_slice %0 {offsets = [4, 0], sizes = [1, 8], strides = [1, 1]} : vector<9x8xf32> to vector<1x8xf32>
    %584 = vector.shape_cast %583 : vector<1x8xf32> to vector<8xf32>
    %585 = vector.shape_cast %584 : vector<8xf32> to vector<1x8xf32>
    %586 = vector.broadcast %585 : vector<1x8xf32> to vector<8x8xf32>
    %587 = arith.mulf %582, %586 : vector<8x8xf32>
    %588 = arith.addf %580, %587 : vector<8x8xf32>
    %c0_290 = arith.constant 0 : index
    %c8_291 = arith.constant 8 : index
    %c2_292 = arith.constant 2 : index
    %c0_293 = arith.constant 0 : index
    %589 = vector.load %arg1[%c0_290, %c8_291, %c2_292, %c0_293] : memref<1x10x10x8xf32, #tpu.memory_space<vmem>>, vector<1x1x8x8xf32>
    %590 = vector.shape_cast %589 : vector<1x1x8x8xf32> to vector<8x8xf32>
    %591 = vector.extract_strided_slice %0 {offsets = [5, 0], sizes = [1, 8], strides = [1, 1]} : vector<9x8xf32> to vector<1x8xf32>
    %592 = vector.shape_cast %591 : vector<1x8xf32> to vector<8xf32>
    %593 = vector.shape_cast %592 : vector<8xf32> to vector<1x8xf32>
    %594 = vector.broadcast %593 : vector<1x8xf32> to vector<8x8xf32>
    %595 = arith.mulf %590, %594 : vector<8x8xf32>
    %596 = arith.addf %588, %595 : vector<8x8xf32>
    %c0_294 = arith.constant 0 : index
    %c9 = arith.constant 9 : index
    %c0_295 = arith.constant 0 : index
    %c0_296 = arith.constant 0 : index
    %597 = vector.load %arg1[%c0_294, %c9, %c0_295, %c0_296] : memref<1x10x10x8xf32, #tpu.memory_space<vmem>>, vector<1x1x8x8xf32>
    %598 = vector.shape_cast %597 : vector<1x1x8x8xf32> to vector<8x8xf32>
    %599 = vector.extract_strided_slice %0 {offsets = [6, 0], sizes = [1, 8], strides = [1, 1]} : vector<9x8xf32> to vector<1x8xf32>
    %600 = vector.shape_cast %599 : vector<1x8xf32> to vector<8xf32>
    %601 = vector.shape_cast %600 : vector<8xf32> to vector<1x8xf32>
    %602 = vector.broadcast %601 : vector<1x8xf32> to vector<8x8xf32>
    %603 = arith.mulf %598, %602 : vector<8x8xf32>
    %604 = arith.addf %596, %603 : vector<8x8xf32>
    %c0_297 = arith.constant 0 : index
    %c9_298 = arith.constant 9 : index
    %c1_299 = arith.constant 1 : index
    %c0_300 = arith.constant 0 : index
    %605 = vector.load %arg1[%c0_297, %c9_298, %c1_299, %c0_300] : memref<1x10x10x8xf32, #tpu.memory_space<vmem>>, vector<1x1x8x8xf32>
    %606 = vector.shape_cast %605 : vector<1x1x8x8xf32> to vector<8x8xf32>
    %607 = vector.extract_strided_slice %0 {offsets = [7, 0], sizes = [1, 8], strides = [1, 1]} : vector<9x8xf32> to vector<1x8xf32>
    %608 = vector.shape_cast %607 : vector<1x8xf32> to vector<8xf32>
    %609 = vector.shape_cast %608 : vector<8xf32> to vector<1x8xf32>
    %610 = vector.broadcast %609 : vector<1x8xf32> to vector<8x8xf32>
    %611 = arith.mulf %606, %610 : vector<8x8xf32>
    %612 = arith.addf %604, %611 : vector<8x8xf32>
    %c0_301 = arith.constant 0 : index
    %c9_302 = arith.constant 9 : index
    %c2_303 = arith.constant 2 : index
    %c0_304 = arith.constant 0 : index
    %613 = vector.load %arg1[%c0_301, %c9_302, %c2_303, %c0_304] : memref<1x10x10x8xf32, #tpu.memory_space<vmem>>, vector<1x1x8x8xf32>
    %614 = vector.shape_cast %613 : vector<1x1x8x8xf32> to vector<8x8xf32>
    %615 = vector.extract_strided_slice %0 {offsets = [8, 0], sizes = [1, 8], strides = [1, 1]} : vector<9x8xf32> to vector<1x8xf32>
    %616 = vector.shape_cast %615 : vector<1x8xf32> to vector<8xf32>
    %617 = vector.shape_cast %616 : vector<8xf32> to vector<1x8xf32>
    %618 = vector.broadcast %617 : vector<1x8xf32> to vector<8x8xf32>
    %619 = arith.mulf %614, %618 : vector<8x8xf32>
    %620 = arith.addf %612, %619 : vector<8x8xf32>
    %621 = vector.broadcast %1 : vector<1x8xf32> to vector<8x8xf32>
    %622 = arith.addf %620, %621 : vector<8x8xf32>
    %cst_305 = arith.constant 0.000000e+00 : f32
    %623 = vector.broadcast %cst_305 : f32 to vector<8x8xf32>
    %624 = arith.maximumf %622, %623 : vector<8x8xf32>
    %c56 = arith.constant 56 : index
    %c0_306 = arith.constant 0 : index
    %625 = vector.load %arg7[%c56, %c0_306] : memref<64x8xf32, #tpu.memory_space<vmem>>, vector<8x8xf32>
    tpu.vector_store %arg7[%c56, %c0_306], %624 {strides = array<i32>} : memref<64x8xf32, #tpu.memory_space<vmem>>, vector<8x8xf32>,
    %c0_307 = arith.constant 0 : index
    %c0_308 = arith.constant 0 : index
    %626 = vector.load %arg7[%c0_307, %c0_308] : memref<64x8xf32, #tpu.memory_space<vmem>>, vector<64x8xf32>
    %627 = arith.truncf %626 : vector<64x8xf32> to vector<64x8xbf16>
    %c0_309 = arith.constant 0 : index
    %c0_310 = arith.constant 0 : index
    %628 = vector.load %arg4[%c0_309, %c0_310] : memref<8x8xbf16, #tpu.memory_space<vmem>>, vector<8x8xbf16>
    %cst_311 = arith.constant dense<0.000000e+00> : vector<64x8xf32>
    %629 = tpu.matmul %627, %628, %cst_311 {dimension_numbers = #tpu.dot_dimension_numbers<[1], [0], [0], [1], [0, 0, 1, 1], [], []>} : vector<64x8xbf16>, vector<8x8xbf16>, vector<64x8xf32> -> vector<64x8xf32>
    %c0_312 = arith.constant 0 : index
    %c0_313 = arith.constant 0 : index
    %630 = vector.load %arg5[%c0_312, %c0_313] : memref<1x8xf32, #tpu.memory_space<vmem>>, vector<1x8xf32>
    %631 = vector.broadcast %630 : vector<1x8xf32> to vector<64x8xf32>
    %632 = arith.addf %629, %631 : vector<64x8xf32>
    %cst_314 = arith.constant 0.000000e+00 : f32
    %633 = vector.broadcast %cst_314 : f32 to vector<64x8xf32>
    %634 = arith.maximumf %632, %633 : vector<64x8xf32>
    %c0_315 = arith.constant 0 : index
    %c0_316 = arith.constant 0 : index
    %c0_317 = arith.constant 0 : index
    %635 = vector.load %arg6[%c0_315, %c0_316, %c0_317] : memref<1x64x8xf32, #tpu.memory_space<vmem>>, vector<1x64x8xf32>
    %636 = vector.shape_cast %635 : vector<1x64x8xf32> to vector<64x8xf32>
    %637 = vector.shape_cast %634 : vector<64x8xf32> to vector<1x64x8xf32>
    tpu.vector_store %arg6[%c0_315, %c0_316, %c0_317], %637 {strides = array<i32>} : memref<1x64x8xf32, #tpu.memory_space<vmem>>, vector<1x64x8xf32>,
    return
  }
  func.func @transform_0(%arg0: i32) -> (i32, i32, i32, i32) {
    %c0_i32 = arith.constant 0 : i32
    %c0_i32_0 = arith.constant 0 : i32
    %c0_i32_1 = arith.constant 0 : i32
    %c0_i32_2 = arith.constant 0 : i32
    return %arg0, %c0_i32, %c0_i32_0, %c0_i32_1 : i32, i32, i32, i32
  }
  func.func @transform_1(%arg0: i32) -> (i32, i32) {
    %c0_i32 = arith.constant 0 : i32
    %c0_i32_0 = arith.constant 0 : i32
    %c0_i32_1 = arith.constant 0 : i32
    return %c0_i32, %c0_i32_0 : i32, i32
  }
  func.func @transform_2(%arg0: i32) -> (i32, i32) {
    %c0_i32 = arith.constant 0 : i32
    %c0_i32_0 = arith.constant 0 : i32
    %c0_i32_1 = arith.constant 0 : i32
    return %c0_i32, %c0_i32_0 : i32, i32
  }
  func.func @transform_3(%arg0: i32) -> (i32, i32) {
    %c0_i32 = arith.constant 0 : i32
    %c0_i32_0 = arith.constant 0 : i32
    %c0_i32_1 = arith.constant 0 : i32
    return %c0_i32, %c0_i32_0 : i32, i32
  }
  func.func @transform_4(%arg0: i32) -> (i32, i32) {
    %c0_i32 = arith.constant 0 : i32
    %c0_i32_0 = arith.constant 0 : i32
    %c0_i32_1 = arith.constant 0 : i32
    return %c0_i32, %c0_i32_0 : i32, i32
  }
  func.func @transform_5(%arg0: i32) -> (i32, i32, i32) {
    %c0_i32 = arith.constant 0 : i32
    %c0_i32_0 = arith.constant 0 : i32
    %c0_i32_1 = arith.constant 0 : i32
    return %arg0, %c0_i32, %c0_i32_0 : i32, i32, i32
  }
}

module attributes {stable_mosaic.version = 11 : i64} {
  func.func @_block_kernel(%arg0: i32, %arg1: memref<1x30x4x8xf32, #tpu.memory_space<vmem>>, %arg2: memref<9x8xf32, #tpu.memory_space<vmem>>, %arg3: memref<1x8xf32, #tpu.memory_space<vmem>>, %arg4: memref<8x16xbf16, #tpu.memory_space<vmem>>, %arg5: memref<1x16xf32, #tpu.memory_space<vmem>>, %arg6: memref<1x16x16xf32, #tpu.memory_space<vmem>>, %arg7: memref<16x8xf32, #tpu.memory_space<vmem>>) attributes {dimension_semantics = [#tpu.dimension_semantics<parallel>], iteration_bounds = array<i64: 2>, scalar_prefetch = 0 : i64, scratch_operands = 1 : i64, tpu.core_type = #tpu.core_type<tc>, window_params = [{transform_indices = @transform_0, window_bounds = array<i64: 1, 30, 4, 8>}, {pipeline_mode = #tpu.pipeline_mode<synchronous>, transform_indices = @transform_1, window_bounds = array<i64: 9, 8>}, {pipeline_mode = #tpu.pipeline_mode<synchronous>, transform_indices = @transform_2, window_bounds = array<i64: 1, 8>}, {pipeline_mode = #tpu.pipeline_mode<synchronous>, transform_indices = @transform_3, window_bounds = array<i64: 8, 16>}, {pipeline_mode = #tpu.pipeline_mode<synchronous>, transform_indices = @transform_4, window_bounds = array<i64: 1, 16>}, {transform_indices = @transform_5, window_bounds = array<i64: 1, 16, 16>}]} {
    %c0 = arith.constant 0 : index
    %c0_0 = arith.constant 0 : index
    %0 = vector.load %arg2[%c0, %c0_0] : memref<9x8xf32, #tpu.memory_space<vmem>>, vector<9x8xf32>
    %c0_1 = arith.constant 0 : index
    %c0_2 = arith.constant 0 : index
    %1 = vector.load %arg3[%c0_1, %c0_2] : memref<1x8xf32, #tpu.memory_space<vmem>>, vector<1x8xf32>
    %cst = arith.constant 0.000000e+00 : f32
    %2 = vector.broadcast %cst : f32 to vector<4x8xf32>
    %c0_3 = arith.constant 0 : index
    %c0_4 = arith.constant 0 : index
    %c0_5 = arith.constant 0 : index
    %c0_6 = arith.constant 0 : index
    %3 = vector.load %arg1[%c0_3, %c0_4, %c0_5, %c0_6] : memref<1x30x4x8xf32, #tpu.memory_space<vmem>>, vector<1x1x4x8xf32>
    %4 = vector.shape_cast %3 : vector<1x1x4x8xf32> to vector<4x8xf32>
    %5 = vector.extract_strided_slice %0 {offsets = [0, 0], sizes = [1, 8], strides = [1, 1]} : vector<9x8xf32> to vector<1x8xf32>
    %6 = vector.shape_cast %5 : vector<1x8xf32> to vector<8xf32>
    %7 = vector.shape_cast %6 : vector<8xf32> to vector<1x8xf32>
    %8 = vector.broadcast %7 : vector<1x8xf32> to vector<4x8xf32>
    %9 = arith.mulf %4, %8 : vector<4x8xf32>
    %10 = arith.addf %2, %9 : vector<4x8xf32>
    %c0_7 = arith.constant 0 : index
    %c10 = arith.constant 10 : index
    %c0_8 = arith.constant 0 : index
    %c0_9 = arith.constant 0 : index
    %11 = vector.load %arg1[%c0_7, %c10, %c0_8, %c0_9] : memref<1x30x4x8xf32, #tpu.memory_space<vmem>>, vector<1x1x4x8xf32>
    %12 = vector.shape_cast %11 : vector<1x1x4x8xf32> to vector<4x8xf32>
    %13 = vector.extract_strided_slice %0 {offsets = [1, 0], sizes = [1, 8], strides = [1, 1]} : vector<9x8xf32> to vector<1x8xf32>
    %14 = vector.shape_cast %13 : vector<1x8xf32> to vector<8xf32>
    %15 = vector.shape_cast %14 : vector<8xf32> to vector<1x8xf32>
    %16 = vector.broadcast %15 : vector<1x8xf32> to vector<4x8xf32>
    %17 = arith.mulf %12, %16 : vector<4x8xf32>
    %18 = arith.addf %10, %17 : vector<4x8xf32>
    %c0_10 = arith.constant 0 : index
    %c20 = arith.constant 20 : index
    %c0_11 = arith.constant 0 : index
    %c0_12 = arith.constant 0 : index
    %19 = vector.load %arg1[%c0_10, %c20, %c0_11, %c0_12] : memref<1x30x4x8xf32, #tpu.memory_space<vmem>>, vector<1x1x4x8xf32>
    %20 = vector.shape_cast %19 : vector<1x1x4x8xf32> to vector<4x8xf32>
    %21 = vector.extract_strided_slice %0 {offsets = [2, 0], sizes = [1, 8], strides = [1, 1]} : vector<9x8xf32> to vector<1x8xf32>
    %22 = vector.shape_cast %21 : vector<1x8xf32> to vector<8xf32>
    %23 = vector.shape_cast %22 : vector<8xf32> to vector<1x8xf32>
    %24 = vector.broadcast %23 : vector<1x8xf32> to vector<4x8xf32>
    %25 = arith.mulf %20, %24 : vector<4x8xf32>
    %26 = arith.addf %18, %25 : vector<4x8xf32>
    %c0_13 = arith.constant 0 : index
    %c1 = arith.constant 1 : index
    %c0_14 = arith.constant 0 : index
    %c0_15 = arith.constant 0 : index
    %27 = vector.load %arg1[%c0_13, %c1, %c0_14, %c0_15] : memref<1x30x4x8xf32, #tpu.memory_space<vmem>>, vector<1x1x4x8xf32>
    %28 = vector.shape_cast %27 : vector<1x1x4x8xf32> to vector<4x8xf32>
    %29 = vector.extract_strided_slice %0 {offsets = [3, 0], sizes = [1, 8], strides = [1, 1]} : vector<9x8xf32> to vector<1x8xf32>
    %30 = vector.shape_cast %29 : vector<1x8xf32> to vector<8xf32>
    %31 = vector.shape_cast %30 : vector<8xf32> to vector<1x8xf32>
    %32 = vector.broadcast %31 : vector<1x8xf32> to vector<4x8xf32>
    %33 = arith.mulf %28, %32 : vector<4x8xf32>
    %34 = arith.addf %26, %33 : vector<4x8xf32>
    %c0_16 = arith.constant 0 : index
    %c11 = arith.constant 11 : index
    %c0_17 = arith.constant 0 : index
    %c0_18 = arith.constant 0 : index
    %35 = vector.load %arg1[%c0_16, %c11, %c0_17, %c0_18] : memref<1x30x4x8xf32, #tpu.memory_space<vmem>>, vector<1x1x4x8xf32>
    %36 = vector.shape_cast %35 : vector<1x1x4x8xf32> to vector<4x8xf32>
    %37 = vector.extract_strided_slice %0 {offsets = [4, 0], sizes = [1, 8], strides = [1, 1]} : vector<9x8xf32> to vector<1x8xf32>
    %38 = vector.shape_cast %37 : vector<1x8xf32> to vector<8xf32>
    %39 = vector.shape_cast %38 : vector<8xf32> to vector<1x8xf32>
    %40 = vector.broadcast %39 : vector<1x8xf32> to vector<4x8xf32>
    %41 = arith.mulf %36, %40 : vector<4x8xf32>
    %42 = arith.addf %34, %41 : vector<4x8xf32>
    %c0_19 = arith.constant 0 : index
    %c21 = arith.constant 21 : index
    %c0_20 = arith.constant 0 : index
    %c0_21 = arith.constant 0 : index
    %43 = vector.load %arg1[%c0_19, %c21, %c0_20, %c0_21] : memref<1x30x4x8xf32, #tpu.memory_space<vmem>>, vector<1x1x4x8xf32>
    %44 = vector.shape_cast %43 : vector<1x1x4x8xf32> to vector<4x8xf32>
    %45 = vector.extract_strided_slice %0 {offsets = [5, 0], sizes = [1, 8], strides = [1, 1]} : vector<9x8xf32> to vector<1x8xf32>
    %46 = vector.shape_cast %45 : vector<1x8xf32> to vector<8xf32>
    %47 = vector.shape_cast %46 : vector<8xf32> to vector<1x8xf32>
    %48 = vector.broadcast %47 : vector<1x8xf32> to vector<4x8xf32>
    %49 = arith.mulf %44, %48 : vector<4x8xf32>
    %50 = arith.addf %42, %49 : vector<4x8xf32>
    %c0_22 = arith.constant 0 : index
    %c2 = arith.constant 2 : index
    %c0_23 = arith.constant 0 : index
    %c0_24 = arith.constant 0 : index
    %51 = vector.load %arg1[%c0_22, %c2, %c0_23, %c0_24] : memref<1x30x4x8xf32, #tpu.memory_space<vmem>>, vector<1x1x4x8xf32>
    %52 = vector.shape_cast %51 : vector<1x1x4x8xf32> to vector<4x8xf32>
    %53 = vector.extract_strided_slice %0 {offsets = [6, 0], sizes = [1, 8], strides = [1, 1]} : vector<9x8xf32> to vector<1x8xf32>
    %54 = vector.shape_cast %53 : vector<1x8xf32> to vector<8xf32>
    %55 = vector.shape_cast %54 : vector<8xf32> to vector<1x8xf32>
    %56 = vector.broadcast %55 : vector<1x8xf32> to vector<4x8xf32>
    %57 = arith.mulf %52, %56 : vector<4x8xf32>
    %58 = arith.addf %50, %57 : vector<4x8xf32>
    %c0_25 = arith.constant 0 : index
    %c12 = arith.constant 12 : index
    %c0_26 = arith.constant 0 : index
    %c0_27 = arith.constant 0 : index
    %59 = vector.load %arg1[%c0_25, %c12, %c0_26, %c0_27] : memref<1x30x4x8xf32, #tpu.memory_space<vmem>>, vector<1x1x4x8xf32>
    %60 = vector.shape_cast %59 : vector<1x1x4x8xf32> to vector<4x8xf32>
    %61 = vector.extract_strided_slice %0 {offsets = [7, 0], sizes = [1, 8], strides = [1, 1]} : vector<9x8xf32> to vector<1x8xf32>
    %62 = vector.shape_cast %61 : vector<1x8xf32> to vector<8xf32>
    %63 = vector.shape_cast %62 : vector<8xf32> to vector<1x8xf32>
    %64 = vector.broadcast %63 : vector<1x8xf32> to vector<4x8xf32>
    %65 = arith.mulf %60, %64 : vector<4x8xf32>
    %66 = arith.addf %58, %65 : vector<4x8xf32>
    %c0_28 = arith.constant 0 : index
    %c22 = arith.constant 22 : index
    %c0_29 = arith.constant 0 : index
    %c0_30 = arith.constant 0 : index
    %67 = vector.load %arg1[%c0_28, %c22, %c0_29, %c0_30] : memref<1x30x4x8xf32, #tpu.memory_space<vmem>>, vector<1x1x4x8xf32>
    %68 = vector.shape_cast %67 : vector<1x1x4x8xf32> to vector<4x8xf32>
    %69 = vector.extract_strided_slice %0 {offsets = [8, 0], sizes = [1, 8], strides = [1, 1]} : vector<9x8xf32> to vector<1x8xf32>
    %70 = vector.shape_cast %69 : vector<1x8xf32> to vector<8xf32>
    %71 = vector.shape_cast %70 : vector<8xf32> to vector<1x8xf32>
    %72 = vector.broadcast %71 : vector<1x8xf32> to vector<4x8xf32>
    %73 = arith.mulf %68, %72 : vector<4x8xf32>
    %74 = arith.addf %66, %73 : vector<4x8xf32>
    %75 = vector.broadcast %1 : vector<1x8xf32> to vector<4x8xf32>
    %76 = arith.addf %74, %75 : vector<4x8xf32>
    %cst_31 = arith.constant 0.000000e+00 : f32
    %77 = vector.broadcast %cst_31 : f32 to vector<4x8xf32>
    %78 = arith.maximumf %76, %77 : vector<4x8xf32>
    %c0_32 = arith.constant 0 : index
    %c0_33 = arith.constant 0 : index
    %79 = vector.load %arg7[%c0_32, %c0_33] : memref<16x8xf32, #tpu.memory_space<vmem>>, vector<4x8xf32>
    tpu.vector_store %arg7[%c0_32, %c0_33], %78 {strides = array<i32>} : memref<16x8xf32, #tpu.memory_space<vmem>>, vector<4x8xf32>,
    %cst_34 = arith.constant 0.000000e+00 : f32
    %80 = vector.broadcast %cst_34 : f32 to vector<4x8xf32>
    %c0_35 = arith.constant 0 : index
    %c2_36 = arith.constant 2 : index
    %c0_37 = arith.constant 0 : index
    %c0_38 = arith.constant 0 : index
    %81 = vector.load %arg1[%c0_35, %c2_36, %c0_37, %c0_38] : memref<1x30x4x8xf32, #tpu.memory_space<vmem>>, vector<1x1x4x8xf32>
    %82 = vector.shape_cast %81 : vector<1x1x4x8xf32> to vector<4x8xf32>
    %83 = vector.extract_strided_slice %0 {offsets = [0, 0], sizes = [1, 8], strides = [1, 1]} : vector<9x8xf32> to vector<1x8xf32>
    %84 = vector.shape_cast %83 : vector<1x8xf32> to vector<8xf32>
    %85 = vector.shape_cast %84 : vector<8xf32> to vector<1x8xf32>
    %86 = vector.broadcast %85 : vector<1x8xf32> to vector<4x8xf32>
    %87 = arith.mulf %82, %86 : vector<4x8xf32>
    %88 = arith.addf %80, %87 : vector<4x8xf32>
    %c0_39 = arith.constant 0 : index
    %c12_40 = arith.constant 12 : index
    %c0_41 = arith.constant 0 : index
    %c0_42 = arith.constant 0 : index
    %89 = vector.load %arg1[%c0_39, %c12_40, %c0_41, %c0_42] : memref<1x30x4x8xf32, #tpu.memory_space<vmem>>, vector<1x1x4x8xf32>
    %90 = vector.shape_cast %89 : vector<1x1x4x8xf32> to vector<4x8xf32>
    %91 = vector.extract_strided_slice %0 {offsets = [1, 0], sizes = [1, 8], strides = [1, 1]} : vector<9x8xf32> to vector<1x8xf32>
    %92 = vector.shape_cast %91 : vector<1x8xf32> to vector<8xf32>
    %93 = vector.shape_cast %92 : vector<8xf32> to vector<1x8xf32>
    %94 = vector.broadcast %93 : vector<1x8xf32> to vector<4x8xf32>
    %95 = arith.mulf %90, %94 : vector<4x8xf32>
    %96 = arith.addf %88, %95 : vector<4x8xf32>
    %c0_43 = arith.constant 0 : index
    %c22_44 = arith.constant 22 : index
    %c0_45 = arith.constant 0 : index
    %c0_46 = arith.constant 0 : index
    %97 = vector.load %arg1[%c0_43, %c22_44, %c0_45, %c0_46] : memref<1x30x4x8xf32, #tpu.memory_space<vmem>>, vector<1x1x4x8xf32>
    %98 = vector.shape_cast %97 : vector<1x1x4x8xf32> to vector<4x8xf32>
    %99 = vector.extract_strided_slice %0 {offsets = [2, 0], sizes = [1, 8], strides = [1, 1]} : vector<9x8xf32> to vector<1x8xf32>
    %100 = vector.shape_cast %99 : vector<1x8xf32> to vector<8xf32>
    %101 = vector.shape_cast %100 : vector<8xf32> to vector<1x8xf32>
    %102 = vector.broadcast %101 : vector<1x8xf32> to vector<4x8xf32>
    %103 = arith.mulf %98, %102 : vector<4x8xf32>
    %104 = arith.addf %96, %103 : vector<4x8xf32>
    %c0_47 = arith.constant 0 : index
    %c3 = arith.constant 3 : index
    %c0_48 = arith.constant 0 : index
    %c0_49 = arith.constant 0 : index
    %105 = vector.load %arg1[%c0_47, %c3, %c0_48, %c0_49] : memref<1x30x4x8xf32, #tpu.memory_space<vmem>>, vector<1x1x4x8xf32>
    %106 = vector.shape_cast %105 : vector<1x1x4x8xf32> to vector<4x8xf32>
    %107 = vector.extract_strided_slice %0 {offsets = [3, 0], sizes = [1, 8], strides = [1, 1]} : vector<9x8xf32> to vector<1x8xf32>
    %108 = vector.shape_cast %107 : vector<1x8xf32> to vector<8xf32>
    %109 = vector.shape_cast %108 : vector<8xf32> to vector<1x8xf32>
    %110 = vector.broadcast %109 : vector<1x8xf32> to vector<4x8xf32>
    %111 = arith.mulf %106, %110 : vector<4x8xf32>
    %112 = arith.addf %104, %111 : vector<4x8xf32>
    %c0_50 = arith.constant 0 : index
    %c13 = arith.constant 13 : index
    %c0_51 = arith.constant 0 : index
    %c0_52 = arith.constant 0 : index
    %113 = vector.load %arg1[%c0_50, %c13, %c0_51, %c0_52] : memref<1x30x4x8xf32, #tpu.memory_space<vmem>>, vector<1x1x4x8xf32>
    %114 = vector.shape_cast %113 : vector<1x1x4x8xf32> to vector<4x8xf32>
    %115 = vector.extract_strided_slice %0 {offsets = [4, 0], sizes = [1, 8], strides = [1, 1]} : vector<9x8xf32> to vector<1x8xf32>
    %116 = vector.shape_cast %115 : vector<1x8xf32> to vector<8xf32>
    %117 = vector.shape_cast %116 : vector<8xf32> to vector<1x8xf32>
    %118 = vector.broadcast %117 : vector<1x8xf32> to vector<4x8xf32>
    %119 = arith.mulf %114, %118 : vector<4x8xf32>
    %120 = arith.addf %112, %119 : vector<4x8xf32>
    %c0_53 = arith.constant 0 : index
    %c23 = arith.constant 23 : index
    %c0_54 = arith.constant 0 : index
    %c0_55 = arith.constant 0 : index
    %121 = vector.load %arg1[%c0_53, %c23, %c0_54, %c0_55] : memref<1x30x4x8xf32, #tpu.memory_space<vmem>>, vector<1x1x4x8xf32>
    %122 = vector.shape_cast %121 : vector<1x1x4x8xf32> to vector<4x8xf32>
    %123 = vector.extract_strided_slice %0 {offsets = [5, 0], sizes = [1, 8], strides = [1, 1]} : vector<9x8xf32> to vector<1x8xf32>
    %124 = vector.shape_cast %123 : vector<1x8xf32> to vector<8xf32>
    %125 = vector.shape_cast %124 : vector<8xf32> to vector<1x8xf32>
    %126 = vector.broadcast %125 : vector<1x8xf32> to vector<4x8xf32>
    %127 = arith.mulf %122, %126 : vector<4x8xf32>
    %128 = arith.addf %120, %127 : vector<4x8xf32>
    %c0_56 = arith.constant 0 : index
    %c4 = arith.constant 4 : index
    %c0_57 = arith.constant 0 : index
    %c0_58 = arith.constant 0 : index
    %129 = vector.load %arg1[%c0_56, %c4, %c0_57, %c0_58] : memref<1x30x4x8xf32, #tpu.memory_space<vmem>>, vector<1x1x4x8xf32>
    %130 = vector.shape_cast %129 : vector<1x1x4x8xf32> to vector<4x8xf32>
    %131 = vector.extract_strided_slice %0 {offsets = [6, 0], sizes = [1, 8], strides = [1, 1]} : vector<9x8xf32> to vector<1x8xf32>
    %132 = vector.shape_cast %131 : vector<1x8xf32> to vector<8xf32>
    %133 = vector.shape_cast %132 : vector<8xf32> to vector<1x8xf32>
    %134 = vector.broadcast %133 : vector<1x8xf32> to vector<4x8xf32>
    %135 = arith.mulf %130, %134 : vector<4x8xf32>
    %136 = arith.addf %128, %135 : vector<4x8xf32>
    %c0_59 = arith.constant 0 : index
    %c14 = arith.constant 14 : index
    %c0_60 = arith.constant 0 : index
    %c0_61 = arith.constant 0 : index
    %137 = vector.load %arg1[%c0_59, %c14, %c0_60, %c0_61] : memref<1x30x4x8xf32, #tpu.memory_space<vmem>>, vector<1x1x4x8xf32>
    %138 = vector.shape_cast %137 : vector<1x1x4x8xf32> to vector<4x8xf32>
    %139 = vector.extract_strided_slice %0 {offsets = [7, 0], sizes = [1, 8], strides = [1, 1]} : vector<9x8xf32> to vector<1x8xf32>
    %140 = vector.shape_cast %139 : vector<1x8xf32> to vector<8xf32>
    %141 = vector.shape_cast %140 : vector<8xf32> to vector<1x8xf32>
    %142 = vector.broadcast %141 : vector<1x8xf32> to vector<4x8xf32>
    %143 = arith.mulf %138, %142 : vector<4x8xf32>
    %144 = arith.addf %136, %143 : vector<4x8xf32>
    %c0_62 = arith.constant 0 : index
    %c24 = arith.constant 24 : index
    %c0_63 = arith.constant 0 : index
    %c0_64 = arith.constant 0 : index
    %145 = vector.load %arg1[%c0_62, %c24, %c0_63, %c0_64] : memref<1x30x4x8xf32, #tpu.memory_space<vmem>>, vector<1x1x4x8xf32>
    %146 = vector.shape_cast %145 : vector<1x1x4x8xf32> to vector<4x8xf32>
    %147 = vector.extract_strided_slice %0 {offsets = [8, 0], sizes = [1, 8], strides = [1, 1]} : vector<9x8xf32> to vector<1x8xf32>
    %148 = vector.shape_cast %147 : vector<1x8xf32> to vector<8xf32>
    %149 = vector.shape_cast %148 : vector<8xf32> to vector<1x8xf32>
    %150 = vector.broadcast %149 : vector<1x8xf32> to vector<4x8xf32>
    %151 = arith.mulf %146, %150 : vector<4x8xf32>
    %152 = arith.addf %144, %151 : vector<4x8xf32>
    %153 = vector.broadcast %1 : vector<1x8xf32> to vector<4x8xf32>
    %154 = arith.addf %152, %153 : vector<4x8xf32>
    %cst_65 = arith.constant 0.000000e+00 : f32
    %155 = vector.broadcast %cst_65 : f32 to vector<4x8xf32>
    %156 = arith.maximumf %154, %155 : vector<4x8xf32>
    %c4_66 = arith.constant 4 : index
    %c0_67 = arith.constant 0 : index
    %157 = vector.load %arg7[%c4_66, %c0_67] : memref<16x8xf32, #tpu.memory_space<vmem>>, vector<4x8xf32>
    tpu.vector_store %arg7[%c4_66, %c0_67], %156 {strides = array<i32>} : memref<16x8xf32, #tpu.memory_space<vmem>>, vector<4x8xf32>,
    %cst_68 = arith.constant 0.000000e+00 : f32
    %158 = vector.broadcast %cst_68 : f32 to vector<4x8xf32>
    %c0_69 = arith.constant 0 : index
    %c4_70 = arith.constant 4 : index
    %c0_71 = arith.constant 0 : index
    %c0_72 = arith.constant 0 : index
    %159 = vector.load %arg1[%c0_69, %c4_70, %c0_71, %c0_72] : memref<1x30x4x8xf32, #tpu.memory_space<vmem>>, vector<1x1x4x8xf32>
    %160 = vector.shape_cast %159 : vector<1x1x4x8xf32> to vector<4x8xf32>
    %161 = vector.extract_strided_slice %0 {offsets = [0, 0], sizes = [1, 8], strides = [1, 1]} : vector<9x8xf32> to vector<1x8xf32>
    %162 = vector.shape_cast %161 : vector<1x8xf32> to vector<8xf32>
    %163 = vector.shape_cast %162 : vector<8xf32> to vector<1x8xf32>
    %164 = vector.broadcast %163 : vector<1x8xf32> to vector<4x8xf32>
    %165 = arith.mulf %160, %164 : vector<4x8xf32>
    %166 = arith.addf %158, %165 : vector<4x8xf32>
    %c0_73 = arith.constant 0 : index
    %c14_74 = arith.constant 14 : index
    %c0_75 = arith.constant 0 : index
    %c0_76 = arith.constant 0 : index
    %167 = vector.load %arg1[%c0_73, %c14_74, %c0_75, %c0_76] : memref<1x30x4x8xf32, #tpu.memory_space<vmem>>, vector<1x1x4x8xf32>
    %168 = vector.shape_cast %167 : vector<1x1x4x8xf32> to vector<4x8xf32>
    %169 = vector.extract_strided_slice %0 {offsets = [1, 0], sizes = [1, 8], strides = [1, 1]} : vector<9x8xf32> to vector<1x8xf32>
    %170 = vector.shape_cast %169 : vector<1x8xf32> to vector<8xf32>
    %171 = vector.shape_cast %170 : vector<8xf32> to vector<1x8xf32>
    %172 = vector.broadcast %171 : vector<1x8xf32> to vector<4x8xf32>
    %173 = arith.mulf %168, %172 : vector<4x8xf32>
    %174 = arith.addf %166, %173 : vector<4x8xf32>
    %c0_77 = arith.constant 0 : index
    %c24_78 = arith.constant 24 : index
    %c0_79 = arith.constant 0 : index
    %c0_80 = arith.constant 0 : index
    %175 = vector.load %arg1[%c0_77, %c24_78, %c0_79, %c0_80] : memref<1x30x4x8xf32, #tpu.memory_space<vmem>>, vector<1x1x4x8xf32>
    %176 = vector.shape_cast %175 : vector<1x1x4x8xf32> to vector<4x8xf32>
    %177 = vector.extract_strided_slice %0 {offsets = [2, 0], sizes = [1, 8], strides = [1, 1]} : vector<9x8xf32> to vector<1x8xf32>
    %178 = vector.shape_cast %177 : vector<1x8xf32> to vector<8xf32>
    %179 = vector.shape_cast %178 : vector<8xf32> to vector<1x8xf32>
    %180 = vector.broadcast %179 : vector<1x8xf32> to vector<4x8xf32>
    %181 = arith.mulf %176, %180 : vector<4x8xf32>
    %182 = arith.addf %174, %181 : vector<4x8xf32>
    %c0_81 = arith.constant 0 : index
    %c5 = arith.constant 5 : index
    %c0_82 = arith.constant 0 : index
    %c0_83 = arith.constant 0 : index
    %183 = vector.load %arg1[%c0_81, %c5, %c0_82, %c0_83] : memref<1x30x4x8xf32, #tpu.memory_space<vmem>>, vector<1x1x4x8xf32>
    %184 = vector.shape_cast %183 : vector<1x1x4x8xf32> to vector<4x8xf32>
    %185 = vector.extract_strided_slice %0 {offsets = [3, 0], sizes = [1, 8], strides = [1, 1]} : vector<9x8xf32> to vector<1x8xf32>
    %186 = vector.shape_cast %185 : vector<1x8xf32> to vector<8xf32>
    %187 = vector.shape_cast %186 : vector<8xf32> to vector<1x8xf32>
    %188 = vector.broadcast %187 : vector<1x8xf32> to vector<4x8xf32>
    %189 = arith.mulf %184, %188 : vector<4x8xf32>
    %190 = arith.addf %182, %189 : vector<4x8xf32>
    %c0_84 = arith.constant 0 : index
    %c15 = arith.constant 15 : index
    %c0_85 = arith.constant 0 : index
    %c0_86 = arith.constant 0 : index
    %191 = vector.load %arg1[%c0_84, %c15, %c0_85, %c0_86] : memref<1x30x4x8xf32, #tpu.memory_space<vmem>>, vector<1x1x4x8xf32>
    %192 = vector.shape_cast %191 : vector<1x1x4x8xf32> to vector<4x8xf32>
    %193 = vector.extract_strided_slice %0 {offsets = [4, 0], sizes = [1, 8], strides = [1, 1]} : vector<9x8xf32> to vector<1x8xf32>
    %194 = vector.shape_cast %193 : vector<1x8xf32> to vector<8xf32>
    %195 = vector.shape_cast %194 : vector<8xf32> to vector<1x8xf32>
    %196 = vector.broadcast %195 : vector<1x8xf32> to vector<4x8xf32>
    %197 = arith.mulf %192, %196 : vector<4x8xf32>
    %198 = arith.addf %190, %197 : vector<4x8xf32>
    %c0_87 = arith.constant 0 : index
    %c25 = arith.constant 25 : index
    %c0_88 = arith.constant 0 : index
    %c0_89 = arith.constant 0 : index
    %199 = vector.load %arg1[%c0_87, %c25, %c0_88, %c0_89] : memref<1x30x4x8xf32, #tpu.memory_space<vmem>>, vector<1x1x4x8xf32>
    %200 = vector.shape_cast %199 : vector<1x1x4x8xf32> to vector<4x8xf32>
    %201 = vector.extract_strided_slice %0 {offsets = [5, 0], sizes = [1, 8], strides = [1, 1]} : vector<9x8xf32> to vector<1x8xf32>
    %202 = vector.shape_cast %201 : vector<1x8xf32> to vector<8xf32>
    %203 = vector.shape_cast %202 : vector<8xf32> to vector<1x8xf32>
    %204 = vector.broadcast %203 : vector<1x8xf32> to vector<4x8xf32>
    %205 = arith.mulf %200, %204 : vector<4x8xf32>
    %206 = arith.addf %198, %205 : vector<4x8xf32>
    %c0_90 = arith.constant 0 : index
    %c6 = arith.constant 6 : index
    %c0_91 = arith.constant 0 : index
    %c0_92 = arith.constant 0 : index
    %207 = vector.load %arg1[%c0_90, %c6, %c0_91, %c0_92] : memref<1x30x4x8xf32, #tpu.memory_space<vmem>>, vector<1x1x4x8xf32>
    %208 = vector.shape_cast %207 : vector<1x1x4x8xf32> to vector<4x8xf32>
    %209 = vector.extract_strided_slice %0 {offsets = [6, 0], sizes = [1, 8], strides = [1, 1]} : vector<9x8xf32> to vector<1x8xf32>
    %210 = vector.shape_cast %209 : vector<1x8xf32> to vector<8xf32>
    %211 = vector.shape_cast %210 : vector<8xf32> to vector<1x8xf32>
    %212 = vector.broadcast %211 : vector<1x8xf32> to vector<4x8xf32>
    %213 = arith.mulf %208, %212 : vector<4x8xf32>
    %214 = arith.addf %206, %213 : vector<4x8xf32>
    %c0_93 = arith.constant 0 : index
    %c16 = arith.constant 16 : index
    %c0_94 = arith.constant 0 : index
    %c0_95 = arith.constant 0 : index
    %215 = vector.load %arg1[%c0_93, %c16, %c0_94, %c0_95] : memref<1x30x4x8xf32, #tpu.memory_space<vmem>>, vector<1x1x4x8xf32>
    %216 = vector.shape_cast %215 : vector<1x1x4x8xf32> to vector<4x8xf32>
    %217 = vector.extract_strided_slice %0 {offsets = [7, 0], sizes = [1, 8], strides = [1, 1]} : vector<9x8xf32> to vector<1x8xf32>
    %218 = vector.shape_cast %217 : vector<1x8xf32> to vector<8xf32>
    %219 = vector.shape_cast %218 : vector<8xf32> to vector<1x8xf32>
    %220 = vector.broadcast %219 : vector<1x8xf32> to vector<4x8xf32>
    %221 = arith.mulf %216, %220 : vector<4x8xf32>
    %222 = arith.addf %214, %221 : vector<4x8xf32>
    %c0_96 = arith.constant 0 : index
    %c26 = arith.constant 26 : index
    %c0_97 = arith.constant 0 : index
    %c0_98 = arith.constant 0 : index
    %223 = vector.load %arg1[%c0_96, %c26, %c0_97, %c0_98] : memref<1x30x4x8xf32, #tpu.memory_space<vmem>>, vector<1x1x4x8xf32>
    %224 = vector.shape_cast %223 : vector<1x1x4x8xf32> to vector<4x8xf32>
    %225 = vector.extract_strided_slice %0 {offsets = [8, 0], sizes = [1, 8], strides = [1, 1]} : vector<9x8xf32> to vector<1x8xf32>
    %226 = vector.shape_cast %225 : vector<1x8xf32> to vector<8xf32>
    %227 = vector.shape_cast %226 : vector<8xf32> to vector<1x8xf32>
    %228 = vector.broadcast %227 : vector<1x8xf32> to vector<4x8xf32>
    %229 = arith.mulf %224, %228 : vector<4x8xf32>
    %230 = arith.addf %222, %229 : vector<4x8xf32>
    %231 = vector.broadcast %1 : vector<1x8xf32> to vector<4x8xf32>
    %232 = arith.addf %230, %231 : vector<4x8xf32>
    %cst_99 = arith.constant 0.000000e+00 : f32
    %233 = vector.broadcast %cst_99 : f32 to vector<4x8xf32>
    %234 = arith.maximumf %232, %233 : vector<4x8xf32>
    %c8 = arith.constant 8 : index
    %c0_100 = arith.constant 0 : index
    %235 = vector.load %arg7[%c8, %c0_100] : memref<16x8xf32, #tpu.memory_space<vmem>>, vector<4x8xf32>
    tpu.vector_store %arg7[%c8, %c0_100], %234 {strides = array<i32>} : memref<16x8xf32, #tpu.memory_space<vmem>>, vector<4x8xf32>,
    %cst_101 = arith.constant 0.000000e+00 : f32
    %236 = vector.broadcast %cst_101 : f32 to vector<4x8xf32>
    %c0_102 = arith.constant 0 : index
    %c6_103 = arith.constant 6 : index
    %c0_104 = arith.constant 0 : index
    %c0_105 = arith.constant 0 : index
    %237 = vector.load %arg1[%c0_102, %c6_103, %c0_104, %c0_105] : memref<1x30x4x8xf32, #tpu.memory_space<vmem>>, vector<1x1x4x8xf32>
    %238 = vector.shape_cast %237 : vector<1x1x4x8xf32> to vector<4x8xf32>
    %239 = vector.extract_strided_slice %0 {offsets = [0, 0], sizes = [1, 8], strides = [1, 1]} : vector<9x8xf32> to vector<1x8xf32>
    %240 = vector.shape_cast %239 : vector<1x8xf32> to vector<8xf32>
    %241 = vector.shape_cast %240 : vector<8xf32> to vector<1x8xf32>
    %242 = vector.broadcast %241 : vector<1x8xf32> to vector<4x8xf32>
    %243 = arith.mulf %238, %242 : vector<4x8xf32>
    %244 = arith.addf %236, %243 : vector<4x8xf32>
    %c0_106 = arith.constant 0 : index
    %c16_107 = arith.constant 16 : index
    %c0_108 = arith.constant 0 : index
    %c0_109 = arith.constant 0 : index
    %245 = vector.load %arg1[%c0_106, %c16_107, %c0_108, %c0_109] : memref<1x30x4x8xf32, #tpu.memory_space<vmem>>, vector<1x1x4x8xf32>
    %246 = vector.shape_cast %245 : vector<1x1x4x8xf32> to vector<4x8xf32>
    %247 = vector.extract_strided_slice %0 {offsets = [1, 0], sizes = [1, 8], strides = [1, 1]} : vector<9x8xf32> to vector<1x8xf32>
    %248 = vector.shape_cast %247 : vector<1x8xf32> to vector<8xf32>
    %249 = vector.shape_cast %248 : vector<8xf32> to vector<1x8xf32>
    %250 = vector.broadcast %249 : vector<1x8xf32> to vector<4x8xf32>
    %251 = arith.mulf %246, %250 : vector<4x8xf32>
    %252 = arith.addf %244, %251 : vector<4x8xf32>
    %c0_110 = arith.constant 0 : index
    %c26_111 = arith.constant 26 : index
    %c0_112 = arith.constant 0 : index
    %c0_113 = arith.constant 0 : index
    %253 = vector.load %arg1[%c0_110, %c26_111, %c0_112, %c0_113] : memref<1x30x4x8xf32, #tpu.memory_space<vmem>>, vector<1x1x4x8xf32>
    %254 = vector.shape_cast %253 : vector<1x1x4x8xf32> to vector<4x8xf32>
    %255 = vector.extract_strided_slice %0 {offsets = [2, 0], sizes = [1, 8], strides = [1, 1]} : vector<9x8xf32> to vector<1x8xf32>
    %256 = vector.shape_cast %255 : vector<1x8xf32> to vector<8xf32>
    %257 = vector.shape_cast %256 : vector<8xf32> to vector<1x8xf32>
    %258 = vector.broadcast %257 : vector<1x8xf32> to vector<4x8xf32>
    %259 = arith.mulf %254, %258 : vector<4x8xf32>
    %260 = arith.addf %252, %259 : vector<4x8xf32>
    %c0_114 = arith.constant 0 : index
    %c7 = arith.constant 7 : index
    %c0_115 = arith.constant 0 : index
    %c0_116 = arith.constant 0 : index
    %261 = vector.load %arg1[%c0_114, %c7, %c0_115, %c0_116] : memref<1x30x4x8xf32, #tpu.memory_space<vmem>>, vector<1x1x4x8xf32>
    %262 = vector.shape_cast %261 : vector<1x1x4x8xf32> to vector<4x8xf32>
    %263 = vector.extract_strided_slice %0 {offsets = [3, 0], sizes = [1, 8], strides = [1, 1]} : vector<9x8xf32> to vector<1x8xf32>
    %264 = vector.shape_cast %263 : vector<1x8xf32> to vector<8xf32>
    %265 = vector.shape_cast %264 : vector<8xf32> to vector<1x8xf32>
    %266 = vector.broadcast %265 : vector<1x8xf32> to vector<4x8xf32>
    %267 = arith.mulf %262, %266 : vector<4x8xf32>
    %268 = arith.addf %260, %267 : vector<4x8xf32>
    %c0_117 = arith.constant 0 : index
    %c17 = arith.constant 17 : index
    %c0_118 = arith.constant 0 : index
    %c0_119 = arith.constant 0 : index
    %269 = vector.load %arg1[%c0_117, %c17, %c0_118, %c0_119] : memref<1x30x4x8xf32, #tpu.memory_space<vmem>>, vector<1x1x4x8xf32>
    %270 = vector.shape_cast %269 : vector<1x1x4x8xf32> to vector<4x8xf32>
    %271 = vector.extract_strided_slice %0 {offsets = [4, 0], sizes = [1, 8], strides = [1, 1]} : vector<9x8xf32> to vector<1x8xf32>
    %272 = vector.shape_cast %271 : vector<1x8xf32> to vector<8xf32>
    %273 = vector.shape_cast %272 : vector<8xf32> to vector<1x8xf32>
    %274 = vector.broadcast %273 : vector<1x8xf32> to vector<4x8xf32>
    %275 = arith.mulf %270, %274 : vector<4x8xf32>
    %276 = arith.addf %268, %275 : vector<4x8xf32>
    %c0_120 = arith.constant 0 : index
    %c27 = arith.constant 27 : index
    %c0_121 = arith.constant 0 : index
    %c0_122 = arith.constant 0 : index
    %277 = vector.load %arg1[%c0_120, %c27, %c0_121, %c0_122] : memref<1x30x4x8xf32, #tpu.memory_space<vmem>>, vector<1x1x4x8xf32>
    %278 = vector.shape_cast %277 : vector<1x1x4x8xf32> to vector<4x8xf32>
    %279 = vector.extract_strided_slice %0 {offsets = [5, 0], sizes = [1, 8], strides = [1, 1]} : vector<9x8xf32> to vector<1x8xf32>
    %280 = vector.shape_cast %279 : vector<1x8xf32> to vector<8xf32>
    %281 = vector.shape_cast %280 : vector<8xf32> to vector<1x8xf32>
    %282 = vector.broadcast %281 : vector<1x8xf32> to vector<4x8xf32>
    %283 = arith.mulf %278, %282 : vector<4x8xf32>
    %284 = arith.addf %276, %283 : vector<4x8xf32>
    %c0_123 = arith.constant 0 : index
    %c8_124 = arith.constant 8 : index
    %c0_125 = arith.constant 0 : index
    %c0_126 = arith.constant 0 : index
    %285 = vector.load %arg1[%c0_123, %c8_124, %c0_125, %c0_126] : memref<1x30x4x8xf32, #tpu.memory_space<vmem>>, vector<1x1x4x8xf32>
    %286 = vector.shape_cast %285 : vector<1x1x4x8xf32> to vector<4x8xf32>
    %287 = vector.extract_strided_slice %0 {offsets = [6, 0], sizes = [1, 8], strides = [1, 1]} : vector<9x8xf32> to vector<1x8xf32>
    %288 = vector.shape_cast %287 : vector<1x8xf32> to vector<8xf32>
    %289 = vector.shape_cast %288 : vector<8xf32> to vector<1x8xf32>
    %290 = vector.broadcast %289 : vector<1x8xf32> to vector<4x8xf32>
    %291 = arith.mulf %286, %290 : vector<4x8xf32>
    %292 = arith.addf %284, %291 : vector<4x8xf32>
    %c0_127 = arith.constant 0 : index
    %c18 = arith.constant 18 : index
    %c0_128 = arith.constant 0 : index
    %c0_129 = arith.constant 0 : index
    %293 = vector.load %arg1[%c0_127, %c18, %c0_128, %c0_129] : memref<1x30x4x8xf32, #tpu.memory_space<vmem>>, vector<1x1x4x8xf32>
    %294 = vector.shape_cast %293 : vector<1x1x4x8xf32> to vector<4x8xf32>
    %295 = vector.extract_strided_slice %0 {offsets = [7, 0], sizes = [1, 8], strides = [1, 1]} : vector<9x8xf32> to vector<1x8xf32>
    %296 = vector.shape_cast %295 : vector<1x8xf32> to vector<8xf32>
    %297 = vector.shape_cast %296 : vector<8xf32> to vector<1x8xf32>
    %298 = vector.broadcast %297 : vector<1x8xf32> to vector<4x8xf32>
    %299 = arith.mulf %294, %298 : vector<4x8xf32>
    %300 = arith.addf %292, %299 : vector<4x8xf32>
    %c0_130 = arith.constant 0 : index
    %c28 = arith.constant 28 : index
    %c0_131 = arith.constant 0 : index
    %c0_132 = arith.constant 0 : index
    %301 = vector.load %arg1[%c0_130, %c28, %c0_131, %c0_132] : memref<1x30x4x8xf32, #tpu.memory_space<vmem>>, vector<1x1x4x8xf32>
    %302 = vector.shape_cast %301 : vector<1x1x4x8xf32> to vector<4x8xf32>
    %303 = vector.extract_strided_slice %0 {offsets = [8, 0], sizes = [1, 8], strides = [1, 1]} : vector<9x8xf32> to vector<1x8xf32>
    %304 = vector.shape_cast %303 : vector<1x8xf32> to vector<8xf32>
    %305 = vector.shape_cast %304 : vector<8xf32> to vector<1x8xf32>
    %306 = vector.broadcast %305 : vector<1x8xf32> to vector<4x8xf32>
    %307 = arith.mulf %302, %306 : vector<4x8xf32>
    %308 = arith.addf %300, %307 : vector<4x8xf32>
    %309 = vector.broadcast %1 : vector<1x8xf32> to vector<4x8xf32>
    %310 = arith.addf %308, %309 : vector<4x8xf32>
    %cst_133 = arith.constant 0.000000e+00 : f32
    %311 = vector.broadcast %cst_133 : f32 to vector<4x8xf32>
    %312 = arith.maximumf %310, %311 : vector<4x8xf32>
    %c12_134 = arith.constant 12 : index
    %c0_135 = arith.constant 0 : index
    %313 = vector.load %arg7[%c12_134, %c0_135] : memref<16x8xf32, #tpu.memory_space<vmem>>, vector<4x8xf32>
    tpu.vector_store %arg7[%c12_134, %c0_135], %312 {strides = array<i32>} : memref<16x8xf32, #tpu.memory_space<vmem>>, vector<4x8xf32>,
    %c0_136 = arith.constant 0 : index
    %c0_137 = arith.constant 0 : index
    %314 = vector.load %arg7[%c0_136, %c0_137] : memref<16x8xf32, #tpu.memory_space<vmem>>, vector<16x8xf32>
    %315 = arith.truncf %314 : vector<16x8xf32> to vector<16x8xbf16>
    %c0_138 = arith.constant 0 : index
    %c0_139 = arith.constant 0 : index
    %316 = vector.load %arg4[%c0_138, %c0_139] : memref<8x16xbf16, #tpu.memory_space<vmem>>, vector<8x16xbf16>
    %cst_140 = arith.constant dense<0.000000e+00> : vector<16x16xf32>
    %317 = tpu.matmul %315, %316, %cst_140 {dimension_numbers = #tpu.dot_dimension_numbers<[1], [0], [0], [1], [0, 0, 1, 1], [], []>} : vector<16x8xbf16>, vector<8x16xbf16>, vector<16x16xf32> -> vector<16x16xf32>
    %c0_141 = arith.constant 0 : index
    %c0_142 = arith.constant 0 : index
    %318 = vector.load %arg5[%c0_141, %c0_142] : memref<1x16xf32, #tpu.memory_space<vmem>>, vector<1x16xf32>
    %319 = vector.broadcast %318 : vector<1x16xf32> to vector<16x16xf32>
    %320 = arith.addf %317, %319 : vector<16x16xf32>
    %cst_143 = arith.constant 0.000000e+00 : f32
    %321 = vector.broadcast %cst_143 : f32 to vector<16x16xf32>
    %322 = arith.maximumf %320, %321 : vector<16x16xf32>
    %c0_144 = arith.constant 0 : index
    %c0_145 = arith.constant 0 : index
    %c0_146 = arith.constant 0 : index
    %323 = vector.load %arg6[%c0_144, %c0_145, %c0_146] : memref<1x16x16xf32, #tpu.memory_space<vmem>>, vector<1x16x16xf32>
    %324 = vector.shape_cast %323 : vector<1x16x16xf32> to vector<16x16xf32>
    %325 = vector.shape_cast %322 : vector<16x16xf32> to vector<1x16x16xf32>
    tpu.vector_store %arg6[%c0_144, %c0_145, %c0_146], %325 {strides = array<i32>} : memref<1x16x16xf32, #tpu.memory_space<vmem>>, vector<1x16x16xf32>,
    return
  }
  func.func @transform_0(%arg0: i32) -> (i32, i32, i32, i32) {
    %c0_i32 = arith.constant 0 : i32
    %c0_i32_0 = arith.constant 0 : i32
    %c0_i32_1 = arith.constant 0 : i32
    %c0_i32_2 = arith.constant 0 : i32
    return %arg0, %c0_i32, %c0_i32_0, %c0_i32_1 : i32, i32, i32, i32
  }
  func.func @transform_1(%arg0: i32) -> (i32, i32) {
    %c0_i32 = arith.constant 0 : i32
    %c0_i32_0 = arith.constant 0 : i32
    %c0_i32_1 = arith.constant 0 : i32
    return %c0_i32, %c0_i32_0 : i32, i32
  }
  func.func @transform_2(%arg0: i32) -> (i32, i32) {
    %c0_i32 = arith.constant 0 : i32
    %c0_i32_0 = arith.constant 0 : i32
    %c0_i32_1 = arith.constant 0 : i32
    return %c0_i32, %c0_i32_0 : i32, i32
  }
  func.func @transform_3(%arg0: i32) -> (i32, i32) {
    %c0_i32 = arith.constant 0 : i32
    %c0_i32_0 = arith.constant 0 : i32
    %c0_i32_1 = arith.constant 0 : i32
    return %c0_i32, %c0_i32_0 : i32, i32
  }
  func.func @transform_4(%arg0: i32) -> (i32, i32) {
    %c0_i32 = arith.constant 0 : i32
    %c0_i32_0 = arith.constant 0 : i32
    %c0_i32_1 = arith.constant 0 : i32
    return %c0_i32, %c0_i32_0 : i32, i32
  }
  func.func @transform_5(%arg0: i32) -> (i32, i32, i32) {
    %c0_i32 = arith.constant 0 : i32
    %c0_i32_0 = arith.constant 0 : i32
    %c0_i32_1 = arith.constant 0 : i32
    return %arg0, %c0_i32, %c0_i32_0 : i32, i32, i32
  }
}

module attributes {stable_mosaic.version = 11 : i64} {
  func.func @_block_kernel(%arg0: i32, %arg1: memref<1x6x6x16xf32, #tpu.memory_space<vmem>>, %arg2: memref<9x16xf32, #tpu.memory_space<vmem>>, %arg3: memref<1x16xf32, #tpu.memory_space<vmem>>, %arg4: memref<16x16xbf16, #tpu.memory_space<vmem>>, %arg5: memref<1x16xf32, #tpu.memory_space<vmem>>, %arg6: memref<1x16x16xf32, #tpu.memory_space<vmem>>, %arg7: memref<16x16xf32, #tpu.memory_space<vmem>>) attributes {dimension_semantics = [#tpu.dimension_semantics<parallel>], iteration_bounds = array<i64: 2>, scalar_prefetch = 0 : i64, scratch_operands = 1 : i64, tpu.core_type = #tpu.core_type<tc>, window_params = [{transform_indices = @transform_0, window_bounds = array<i64: 1, 6, 6, 16>}, {pipeline_mode = #tpu.pipeline_mode<synchronous>, transform_indices = @transform_1, window_bounds = array<i64: 9, 16>}, {pipeline_mode = #tpu.pipeline_mode<synchronous>, transform_indices = @transform_2, window_bounds = array<i64: 1, 16>}, {pipeline_mode = #tpu.pipeline_mode<synchronous>, transform_indices = @transform_3, window_bounds = array<i64: 16, 16>}, {pipeline_mode = #tpu.pipeline_mode<synchronous>, transform_indices = @transform_4, window_bounds = array<i64: 1, 16>}, {transform_indices = @transform_5, window_bounds = array<i64: 1, 16, 16>}]} {
    %c0 = arith.constant 0 : index
    %c0_0 = arith.constant 0 : index
    %0 = vector.load %arg2[%c0, %c0_0] : memref<9x16xf32, #tpu.memory_space<vmem>>, vector<9x16xf32>
    %c0_1 = arith.constant 0 : index
    %c0_2 = arith.constant 0 : index
    %1 = vector.load %arg3[%c0_1, %c0_2] : memref<1x16xf32, #tpu.memory_space<vmem>>, vector<1x16xf32>
    %cst = arith.constant 0.000000e+00 : f32
    %2 = vector.broadcast %cst : f32 to vector<4x16xf32>
    %c0_3 = arith.constant 0 : index
    %c0_4 = arith.constant 0 : index
    %c0_5 = arith.constant 0 : index
    %c0_6 = arith.constant 0 : index
    %3 = vector.load %arg1[%c0_3, %c0_4, %c0_5, %c0_6] : memref<1x6x6x16xf32, #tpu.memory_space<vmem>>, vector<1x1x4x16xf32>
    %4 = vector.shape_cast %3 : vector<1x1x4x16xf32> to vector<4x16xf32>
    %5 = vector.extract_strided_slice %0 {offsets = [0, 0], sizes = [1, 16], strides = [1, 1]} : vector<9x16xf32> to vector<1x16xf32>
    %6 = vector.shape_cast %5 : vector<1x16xf32> to vector<16xf32>
    %7 = vector.shape_cast %6 : vector<16xf32> to vector<1x16xf32>
    %8 = vector.broadcast %7 : vector<1x16xf32> to vector<4x16xf32>
    %9 = arith.mulf %4, %8 : vector<4x16xf32>
    %10 = arith.addf %2, %9 : vector<4x16xf32>
    %c0_7 = arith.constant 0 : index
    %c0_8 = arith.constant 0 : index
    %c1 = arith.constant 1 : index
    %c0_9 = arith.constant 0 : index
    %11 = vector.load %arg1[%c0_7, %c0_8, %c1, %c0_9] : memref<1x6x6x16xf32, #tpu.memory_space<vmem>>, vector<1x1x4x16xf32>
    %12 = vector.shape_cast %11 : vector<1x1x4x16xf32> to vector<4x16xf32>
    %13 = vector.extract_strided_slice %0 {offsets = [1, 0], sizes = [1, 16], strides = [1, 1]} : vector<9x16xf32> to vector<1x16xf32>
    %14 = vector.shape_cast %13 : vector<1x16xf32> to vector<16xf32>
    %15 = vector.shape_cast %14 : vector<16xf32> to vector<1x16xf32>
    %16 = vector.broadcast %15 : vector<1x16xf32> to vector<4x16xf32>
    %17 = arith.mulf %12, %16 : vector<4x16xf32>
    %18 = arith.addf %10, %17 : vector<4x16xf32>
    %c0_10 = arith.constant 0 : index
    %c0_11 = arith.constant 0 : index
    %c2 = arith.constant 2 : index
    %c0_12 = arith.constant 0 : index
    %19 = vector.load %arg1[%c0_10, %c0_11, %c2, %c0_12] : memref<1x6x6x16xf32, #tpu.memory_space<vmem>>, vector<1x1x4x16xf32>
    %20 = vector.shape_cast %19 : vector<1x1x4x16xf32> to vector<4x16xf32>
    %21 = vector.extract_strided_slice %0 {offsets = [2, 0], sizes = [1, 16], strides = [1, 1]} : vector<9x16xf32> to vector<1x16xf32>
    %22 = vector.shape_cast %21 : vector<1x16xf32> to vector<16xf32>
    %23 = vector.shape_cast %22 : vector<16xf32> to vector<1x16xf32>
    %24 = vector.broadcast %23 : vector<1x16xf32> to vector<4x16xf32>
    %25 = arith.mulf %20, %24 : vector<4x16xf32>
    %26 = arith.addf %18, %25 : vector<4x16xf32>
    %c0_13 = arith.constant 0 : index
    %c1_14 = arith.constant 1 : index
    %c0_15 = arith.constant 0 : index
    %c0_16 = arith.constant 0 : index
    %27 = vector.load %arg1[%c0_13, %c1_14, %c0_15, %c0_16] : memref<1x6x6x16xf32, #tpu.memory_space<vmem>>, vector<1x1x4x16xf32>
    %28 = vector.shape_cast %27 : vector<1x1x4x16xf32> to vector<4x16xf32>
    %29 = vector.extract_strided_slice %0 {offsets = [3, 0], sizes = [1, 16], strides = [1, 1]} : vector<9x16xf32> to vector<1x16xf32>
    %30 = vector.shape_cast %29 : vector<1x16xf32> to vector<16xf32>
    %31 = vector.shape_cast %30 : vector<16xf32> to vector<1x16xf32>
    %32 = vector.broadcast %31 : vector<1x16xf32> to vector<4x16xf32>
    %33 = arith.mulf %28, %32 : vector<4x16xf32>
    %34 = arith.addf %26, %33 : vector<4x16xf32>
    %c0_17 = arith.constant 0 : index
    %c1_18 = arith.constant 1 : index
    %c1_19 = arith.constant 1 : index
    %c0_20 = arith.constant 0 : index
    %35 = vector.load %arg1[%c0_17, %c1_18, %c1_19, %c0_20] : memref<1x6x6x16xf32, #tpu.memory_space<vmem>>, vector<1x1x4x16xf32>
    %36 = vector.shape_cast %35 : vector<1x1x4x16xf32> to vector<4x16xf32>
    %37 = vector.extract_strided_slice %0 {offsets = [4, 0], sizes = [1, 16], strides = [1, 1]} : vector<9x16xf32> to vector<1x16xf32>
    %38 = vector.shape_cast %37 : vector<1x16xf32> to vector<16xf32>
    %39 = vector.shape_cast %38 : vector<16xf32> to vector<1x16xf32>
    %40 = vector.broadcast %39 : vector<1x16xf32> to vector<4x16xf32>
    %41 = arith.mulf %36, %40 : vector<4x16xf32>
    %42 = arith.addf %34, %41 : vector<4x16xf32>
    %c0_21 = arith.constant 0 : index
    %c1_22 = arith.constant 1 : index
    %c2_23 = arith.constant 2 : index
    %c0_24 = arith.constant 0 : index
    %43 = vector.load %arg1[%c0_21, %c1_22, %c2_23, %c0_24] : memref<1x6x6x16xf32, #tpu.memory_space<vmem>>, vector<1x1x4x16xf32>
    %44 = vector.shape_cast %43 : vector<1x1x4x16xf32> to vector<4x16xf32>
    %45 = vector.extract_strided_slice %0 {offsets = [5, 0], sizes = [1, 16], strides = [1, 1]} : vector<9x16xf32> to vector<1x16xf32>
    %46 = vector.shape_cast %45 : vector<1x16xf32> to vector<16xf32>
    %47 = vector.shape_cast %46 : vector<16xf32> to vector<1x16xf32>
    %48 = vector.broadcast %47 : vector<1x16xf32> to vector<4x16xf32>
    %49 = arith.mulf %44, %48 : vector<4x16xf32>
    %50 = arith.addf %42, %49 : vector<4x16xf32>
    %c0_25 = arith.constant 0 : index
    %c2_26 = arith.constant 2 : index
    %c0_27 = arith.constant 0 : index
    %c0_28 = arith.constant 0 : index
    %51 = vector.load %arg1[%c0_25, %c2_26, %c0_27, %c0_28] : memref<1x6x6x16xf32, #tpu.memory_space<vmem>>, vector<1x1x4x16xf32>
    %52 = vector.shape_cast %51 : vector<1x1x4x16xf32> to vector<4x16xf32>
    %53 = vector.extract_strided_slice %0 {offsets = [6, 0], sizes = [1, 16], strides = [1, 1]} : vector<9x16xf32> to vector<1x16xf32>
    %54 = vector.shape_cast %53 : vector<1x16xf32> to vector<16xf32>
    %55 = vector.shape_cast %54 : vector<16xf32> to vector<1x16xf32>
    %56 = vector.broadcast %55 : vector<1x16xf32> to vector<4x16xf32>
    %57 = arith.mulf %52, %56 : vector<4x16xf32>
    %58 = arith.addf %50, %57 : vector<4x16xf32>
    %c0_29 = arith.constant 0 : index
    %c2_30 = arith.constant 2 : index
    %c1_31 = arith.constant 1 : index
    %c0_32 = arith.constant 0 : index
    %59 = vector.load %arg1[%c0_29, %c2_30, %c1_31, %c0_32] : memref<1x6x6x16xf32, #tpu.memory_space<vmem>>, vector<1x1x4x16xf32>
    %60 = vector.shape_cast %59 : vector<1x1x4x16xf32> to vector<4x16xf32>
    %61 = vector.extract_strided_slice %0 {offsets = [7, 0], sizes = [1, 16], strides = [1, 1]} : vector<9x16xf32> to vector<1x16xf32>
    %62 = vector.shape_cast %61 : vector<1x16xf32> to vector<16xf32>
    %63 = vector.shape_cast %62 : vector<16xf32> to vector<1x16xf32>
    %64 = vector.broadcast %63 : vector<1x16xf32> to vector<4x16xf32>
    %65 = arith.mulf %60, %64 : vector<4x16xf32>
    %66 = arith.addf %58, %65 : vector<4x16xf32>
    %c0_33 = arith.constant 0 : index
    %c2_34 = arith.constant 2 : index
    %c2_35 = arith.constant 2 : index
    %c0_36 = arith.constant 0 : index
    %67 = vector.load %arg1[%c0_33, %c2_34, %c2_35, %c0_36] : memref<1x6x6x16xf32, #tpu.memory_space<vmem>>, vector<1x1x4x16xf32>
    %68 = vector.shape_cast %67 : vector<1x1x4x16xf32> to vector<4x16xf32>
    %69 = vector.extract_strided_slice %0 {offsets = [8, 0], sizes = [1, 16], strides = [1, 1]} : vector<9x16xf32> to vector<1x16xf32>
    %70 = vector.shape_cast %69 : vector<1x16xf32> to vector<16xf32>
    %71 = vector.shape_cast %70 : vector<16xf32> to vector<1x16xf32>
    %72 = vector.broadcast %71 : vector<1x16xf32> to vector<4x16xf32>
    %73 = arith.mulf %68, %72 : vector<4x16xf32>
    %74 = arith.addf %66, %73 : vector<4x16xf32>
    %75 = vector.broadcast %1 : vector<1x16xf32> to vector<4x16xf32>
    %76 = arith.addf %74, %75 : vector<4x16xf32>
    %cst_37 = arith.constant 0.000000e+00 : f32
    %77 = vector.broadcast %cst_37 : f32 to vector<4x16xf32>
    %78 = arith.maximumf %76, %77 : vector<4x16xf32>
    %c0_38 = arith.constant 0 : index
    %c0_39 = arith.constant 0 : index
    %79 = vector.load %arg7[%c0_38, %c0_39] : memref<16x16xf32, #tpu.memory_space<vmem>>, vector<4x16xf32>
    tpu.vector_store %arg7[%c0_38, %c0_39], %78 {strides = array<i32>} : memref<16x16xf32, #tpu.memory_space<vmem>>, vector<4x16xf32>,
    %cst_40 = arith.constant 0.000000e+00 : f32
    %80 = vector.broadcast %cst_40 : f32 to vector<4x16xf32>
    %c0_41 = arith.constant 0 : index
    %c1_42 = arith.constant 1 : index
    %c0_43 = arith.constant 0 : index
    %c0_44 = arith.constant 0 : index
    %81 = vector.load %arg1[%c0_41, %c1_42, %c0_43, %c0_44] : memref<1x6x6x16xf32, #tpu.memory_space<vmem>>, vector<1x1x4x16xf32>
    %82 = vector.shape_cast %81 : vector<1x1x4x16xf32> to vector<4x16xf32>
    %83 = vector.extract_strided_slice %0 {offsets = [0, 0], sizes = [1, 16], strides = [1, 1]} : vector<9x16xf32> to vector<1x16xf32>
    %84 = vector.shape_cast %83 : vector<1x16xf32> to vector<16xf32>
    %85 = vector.shape_cast %84 : vector<16xf32> to vector<1x16xf32>
    %86 = vector.broadcast %85 : vector<1x16xf32> to vector<4x16xf32>
    %87 = arith.mulf %82, %86 : vector<4x16xf32>
    %88 = arith.addf %80, %87 : vector<4x16xf32>
    %c0_45 = arith.constant 0 : index
    %c1_46 = arith.constant 1 : index
    %c1_47 = arith.constant 1 : index
    %c0_48 = arith.constant 0 : index
    %89 = vector.load %arg1[%c0_45, %c1_46, %c1_47, %c0_48] : memref<1x6x6x16xf32, #tpu.memory_space<vmem>>, vector<1x1x4x16xf32>
    %90 = vector.shape_cast %89 : vector<1x1x4x16xf32> to vector<4x16xf32>
    %91 = vector.extract_strided_slice %0 {offsets = [1, 0], sizes = [1, 16], strides = [1, 1]} : vector<9x16xf32> to vector<1x16xf32>
    %92 = vector.shape_cast %91 : vector<1x16xf32> to vector<16xf32>
    %93 = vector.shape_cast %92 : vector<16xf32> to vector<1x16xf32>
    %94 = vector.broadcast %93 : vector<1x16xf32> to vector<4x16xf32>
    %95 = arith.mulf %90, %94 : vector<4x16xf32>
    %96 = arith.addf %88, %95 : vector<4x16xf32>
    %c0_49 = arith.constant 0 : index
    %c1_50 = arith.constant 1 : index
    %c2_51 = arith.constant 2 : index
    %c0_52 = arith.constant 0 : index
    %97 = vector.load %arg1[%c0_49, %c1_50, %c2_51, %c0_52] : memref<1x6x6x16xf32, #tpu.memory_space<vmem>>, vector<1x1x4x16xf32>
    %98 = vector.shape_cast %97 : vector<1x1x4x16xf32> to vector<4x16xf32>
    %99 = vector.extract_strided_slice %0 {offsets = [2, 0], sizes = [1, 16], strides = [1, 1]} : vector<9x16xf32> to vector<1x16xf32>
    %100 = vector.shape_cast %99 : vector<1x16xf32> to vector<16xf32>
    %101 = vector.shape_cast %100 : vector<16xf32> to vector<1x16xf32>
    %102 = vector.broadcast %101 : vector<1x16xf32> to vector<4x16xf32>
    %103 = arith.mulf %98, %102 : vector<4x16xf32>
    %104 = arith.addf %96, %103 : vector<4x16xf32>
    %c0_53 = arith.constant 0 : index
    %c2_54 = arith.constant 2 : index
    %c0_55 = arith.constant 0 : index
    %c0_56 = arith.constant 0 : index
    %105 = vector.load %arg1[%c0_53, %c2_54, %c0_55, %c0_56] : memref<1x6x6x16xf32, #tpu.memory_space<vmem>>, vector<1x1x4x16xf32>
    %106 = vector.shape_cast %105 : vector<1x1x4x16xf32> to vector<4x16xf32>
    %107 = vector.extract_strided_slice %0 {offsets = [3, 0], sizes = [1, 16], strides = [1, 1]} : vector<9x16xf32> to vector<1x16xf32>
    %108 = vector.shape_cast %107 : vector<1x16xf32> to vector<16xf32>
    %109 = vector.shape_cast %108 : vector<16xf32> to vector<1x16xf32>
    %110 = vector.broadcast %109 : vector<1x16xf32> to vector<4x16xf32>
    %111 = arith.mulf %106, %110 : vector<4x16xf32>
    %112 = arith.addf %104, %111 : vector<4x16xf32>
    %c0_57 = arith.constant 0 : index
    %c2_58 = arith.constant 2 : index
    %c1_59 = arith.constant 1 : index
    %c0_60 = arith.constant 0 : index
    %113 = vector.load %arg1[%c0_57, %c2_58, %c1_59, %c0_60] : memref<1x6x6x16xf32, #tpu.memory_space<vmem>>, vector<1x1x4x16xf32>
    %114 = vector.shape_cast %113 : vector<1x1x4x16xf32> to vector<4x16xf32>
    %115 = vector.extract_strided_slice %0 {offsets = [4, 0], sizes = [1, 16], strides = [1, 1]} : vector<9x16xf32> to vector<1x16xf32>
    %116 = vector.shape_cast %115 : vector<1x16xf32> to vector<16xf32>
    %117 = vector.shape_cast %116 : vector<16xf32> to vector<1x16xf32>
    %118 = vector.broadcast %117 : vector<1x16xf32> to vector<4x16xf32>
    %119 = arith.mulf %114, %118 : vector<4x16xf32>
    %120 = arith.addf %112, %119 : vector<4x16xf32>
    %c0_61 = arith.constant 0 : index
    %c2_62 = arith.constant 2 : index
    %c2_63 = arith.constant 2 : index
    %c0_64 = arith.constant 0 : index
    %121 = vector.load %arg1[%c0_61, %c2_62, %c2_63, %c0_64] : memref<1x6x6x16xf32, #tpu.memory_space<vmem>>, vector<1x1x4x16xf32>
    %122 = vector.shape_cast %121 : vector<1x1x4x16xf32> to vector<4x16xf32>
    %123 = vector.extract_strided_slice %0 {offsets = [5, 0], sizes = [1, 16], strides = [1, 1]} : vector<9x16xf32> to vector<1x16xf32>
    %124 = vector.shape_cast %123 : vector<1x16xf32> to vector<16xf32>
    %125 = vector.shape_cast %124 : vector<16xf32> to vector<1x16xf32>
    %126 = vector.broadcast %125 : vector<1x16xf32> to vector<4x16xf32>
    %127 = arith.mulf %122, %126 : vector<4x16xf32>
    %128 = arith.addf %120, %127 : vector<4x16xf32>
    %c0_65 = arith.constant 0 : index
    %c3 = arith.constant 3 : index
    %c0_66 = arith.constant 0 : index
    %c0_67 = arith.constant 0 : index
    %129 = vector.load %arg1[%c0_65, %c3, %c0_66, %c0_67] : memref<1x6x6x16xf32, #tpu.memory_space<vmem>>, vector<1x1x4x16xf32>
    %130 = vector.shape_cast %129 : vector<1x1x4x16xf32> to vector<4x16xf32>
    %131 = vector.extract_strided_slice %0 {offsets = [6, 0], sizes = [1, 16], strides = [1, 1]} : vector<9x16xf32> to vector<1x16xf32>
    %132 = vector.shape_cast %131 : vector<1x16xf32> to vector<16xf32>
    %133 = vector.shape_cast %132 : vector<16xf32> to vector<1x16xf32>
    %134 = vector.broadcast %133 : vector<1x16xf32> to vector<4x16xf32>
    %135 = arith.mulf %130, %134 : vector<4x16xf32>
    %136 = arith.addf %128, %135 : vector<4x16xf32>
    %c0_68 = arith.constant 0 : index
    %c3_69 = arith.constant 3 : index
    %c1_70 = arith.constant 1 : index
    %c0_71 = arith.constant 0 : index
    %137 = vector.load %arg1[%c0_68, %c3_69, %c1_70, %c0_71] : memref<1x6x6x16xf32, #tpu.memory_space<vmem>>, vector<1x1x4x16xf32>
    %138 = vector.shape_cast %137 : vector<1x1x4x16xf32> to vector<4x16xf32>
    %139 = vector.extract_strided_slice %0 {offsets = [7, 0], sizes = [1, 16], strides = [1, 1]} : vector<9x16xf32> to vector<1x16xf32>
    %140 = vector.shape_cast %139 : vector<1x16xf32> to vector<16xf32>
    %141 = vector.shape_cast %140 : vector<16xf32> to vector<1x16xf32>
    %142 = vector.broadcast %141 : vector<1x16xf32> to vector<4x16xf32>
    %143 = arith.mulf %138, %142 : vector<4x16xf32>
    %144 = arith.addf %136, %143 : vector<4x16xf32>
    %c0_72 = arith.constant 0 : index
    %c3_73 = arith.constant 3 : index
    %c2_74 = arith.constant 2 : index
    %c0_75 = arith.constant 0 : index
    %145 = vector.load %arg1[%c0_72, %c3_73, %c2_74, %c0_75] : memref<1x6x6x16xf32, #tpu.memory_space<vmem>>, vector<1x1x4x16xf32>
    %146 = vector.shape_cast %145 : vector<1x1x4x16xf32> to vector<4x16xf32>
    %147 = vector.extract_strided_slice %0 {offsets = [8, 0], sizes = [1, 16], strides = [1, 1]} : vector<9x16xf32> to vector<1x16xf32>
    %148 = vector.shape_cast %147 : vector<1x16xf32> to vector<16xf32>
    %149 = vector.shape_cast %148 : vector<16xf32> to vector<1x16xf32>
    %150 = vector.broadcast %149 : vector<1x16xf32> to vector<4x16xf32>
    %151 = arith.mulf %146, %150 : vector<4x16xf32>
    %152 = arith.addf %144, %151 : vector<4x16xf32>
    %153 = vector.broadcast %1 : vector<1x16xf32> to vector<4x16xf32>
    %154 = arith.addf %152, %153 : vector<4x16xf32>
    %cst_76 = arith.constant 0.000000e+00 : f32
    %155 = vector.broadcast %cst_76 : f32 to vector<4x16xf32>
    %156 = arith.maximumf %154, %155 : vector<4x16xf32>
    %c4 = arith.constant 4 : index
    %c0_77 = arith.constant 0 : index
    %157 = vector.load %arg7[%c4, %c0_77] : memref<16x16xf32, #tpu.memory_space<vmem>>, vector<4x16xf32>
    tpu.vector_store %arg7[%c4, %c0_77], %156 {strides = array<i32>} : memref<16x16xf32, #tpu.memory_space<vmem>>, vector<4x16xf32>,
    %cst_78 = arith.constant 0.000000e+00 : f32
    %158 = vector.broadcast %cst_78 : f32 to vector<4x16xf32>
    %c0_79 = arith.constant 0 : index
    %c2_80 = arith.constant 2 : index
    %c0_81 = arith.constant 0 : index
    %c0_82 = arith.constant 0 : index
    %159 = vector.load %arg1[%c0_79, %c2_80, %c0_81, %c0_82] : memref<1x6x6x16xf32, #tpu.memory_space<vmem>>, vector<1x1x4x16xf32>
    %160 = vector.shape_cast %159 : vector<1x1x4x16xf32> to vector<4x16xf32>
    %161 = vector.extract_strided_slice %0 {offsets = [0, 0], sizes = [1, 16], strides = [1, 1]} : vector<9x16xf32> to vector<1x16xf32>
    %162 = vector.shape_cast %161 : vector<1x16xf32> to vector<16xf32>
    %163 = vector.shape_cast %162 : vector<16xf32> to vector<1x16xf32>
    %164 = vector.broadcast %163 : vector<1x16xf32> to vector<4x16xf32>
    %165 = arith.mulf %160, %164 : vector<4x16xf32>
    %166 = arith.addf %158, %165 : vector<4x16xf32>
    %c0_83 = arith.constant 0 : index
    %c2_84 = arith.constant 2 : index
    %c1_85 = arith.constant 1 : index
    %c0_86 = arith.constant 0 : index
    %167 = vector.load %arg1[%c0_83, %c2_84, %c1_85, %c0_86] : memref<1x6x6x16xf32, #tpu.memory_space<vmem>>, vector<1x1x4x16xf32>
    %168 = vector.shape_cast %167 : vector<1x1x4x16xf32> to vector<4x16xf32>
    %169 = vector.extract_strided_slice %0 {offsets = [1, 0], sizes = [1, 16], strides = [1, 1]} : vector<9x16xf32> to vector<1x16xf32>
    %170 = vector.shape_cast %169 : vector<1x16xf32> to vector<16xf32>
    %171 = vector.shape_cast %170 : vector<16xf32> to vector<1x16xf32>
    %172 = vector.broadcast %171 : vector<1x16xf32> to vector<4x16xf32>
    %173 = arith.mulf %168, %172 : vector<4x16xf32>
    %174 = arith.addf %166, %173 : vector<4x16xf32>
    %c0_87 = arith.constant 0 : index
    %c2_88 = arith.constant 2 : index
    %c2_89 = arith.constant 2 : index
    %c0_90 = arith.constant 0 : index
    %175 = vector.load %arg1[%c0_87, %c2_88, %c2_89, %c0_90] : memref<1x6x6x16xf32, #tpu.memory_space<vmem>>, vector<1x1x4x16xf32>
    %176 = vector.shape_cast %175 : vector<1x1x4x16xf32> to vector<4x16xf32>
    %177 = vector.extract_strided_slice %0 {offsets = [2, 0], sizes = [1, 16], strides = [1, 1]} : vector<9x16xf32> to vector<1x16xf32>
    %178 = vector.shape_cast %177 : vector<1x16xf32> to vector<16xf32>
    %179 = vector.shape_cast %178 : vector<16xf32> to vector<1x16xf32>
    %180 = vector.broadcast %179 : vector<1x16xf32> to vector<4x16xf32>
    %181 = arith.mulf %176, %180 : vector<4x16xf32>
    %182 = arith.addf %174, %181 : vector<4x16xf32>
    %c0_91 = arith.constant 0 : index
    %c3_92 = arith.constant 3 : index
    %c0_93 = arith.constant 0 : index
    %c0_94 = arith.constant 0 : index
    %183 = vector.load %arg1[%c0_91, %c3_92, %c0_93, %c0_94] : memref<1x6x6x16xf32, #tpu.memory_space<vmem>>, vector<1x1x4x16xf32>
    %184 = vector.shape_cast %183 : vector<1x1x4x16xf32> to vector<4x16xf32>
    %185 = vector.extract_strided_slice %0 {offsets = [3, 0], sizes = [1, 16], strides = [1, 1]} : vector<9x16xf32> to vector<1x16xf32>
    %186 = vector.shape_cast %185 : vector<1x16xf32> to vector<16xf32>
    %187 = vector.shape_cast %186 : vector<16xf32> to vector<1x16xf32>
    %188 = vector.broadcast %187 : vector<1x16xf32> to vector<4x16xf32>
    %189 = arith.mulf %184, %188 : vector<4x16xf32>
    %190 = arith.addf %182, %189 : vector<4x16xf32>
    %c0_95 = arith.constant 0 : index
    %c3_96 = arith.constant 3 : index
    %c1_97 = arith.constant 1 : index
    %c0_98 = arith.constant 0 : index
    %191 = vector.load %arg1[%c0_95, %c3_96, %c1_97, %c0_98] : memref<1x6x6x16xf32, #tpu.memory_space<vmem>>, vector<1x1x4x16xf32>
    %192 = vector.shape_cast %191 : vector<1x1x4x16xf32> to vector<4x16xf32>
    %193 = vector.extract_strided_slice %0 {offsets = [4, 0], sizes = [1, 16], strides = [1, 1]} : vector<9x16xf32> to vector<1x16xf32>
    %194 = vector.shape_cast %193 : vector<1x16xf32> to vector<16xf32>
    %195 = vector.shape_cast %194 : vector<16xf32> to vector<1x16xf32>
    %196 = vector.broadcast %195 : vector<1x16xf32> to vector<4x16xf32>
    %197 = arith.mulf %192, %196 : vector<4x16xf32>
    %198 = arith.addf %190, %197 : vector<4x16xf32>
    %c0_99 = arith.constant 0 : index
    %c3_100 = arith.constant 3 : index
    %c2_101 = arith.constant 2 : index
    %c0_102 = arith.constant 0 : index
    %199 = vector.load %arg1[%c0_99, %c3_100, %c2_101, %c0_102] : memref<1x6x6x16xf32, #tpu.memory_space<vmem>>, vector<1x1x4x16xf32>
    %200 = vector.shape_cast %199 : vector<1x1x4x16xf32> to vector<4x16xf32>
    %201 = vector.extract_strided_slice %0 {offsets = [5, 0], sizes = [1, 16], strides = [1, 1]} : vector<9x16xf32> to vector<1x16xf32>
    %202 = vector.shape_cast %201 : vector<1x16xf32> to vector<16xf32>
    %203 = vector.shape_cast %202 : vector<16xf32> to vector<1x16xf32>
    %204 = vector.broadcast %203 : vector<1x16xf32> to vector<4x16xf32>
    %205 = arith.mulf %200, %204 : vector<4x16xf32>
    %206 = arith.addf %198, %205 : vector<4x16xf32>
    %c0_103 = arith.constant 0 : index
    %c4_104 = arith.constant 4 : index
    %c0_105 = arith.constant 0 : index
    %c0_106 = arith.constant 0 : index
    %207 = vector.load %arg1[%c0_103, %c4_104, %c0_105, %c0_106] : memref<1x6x6x16xf32, #tpu.memory_space<vmem>>, vector<1x1x4x16xf32>
    %208 = vector.shape_cast %207 : vector<1x1x4x16xf32> to vector<4x16xf32>
    %209 = vector.extract_strided_slice %0 {offsets = [6, 0], sizes = [1, 16], strides = [1, 1]} : vector<9x16xf32> to vector<1x16xf32>
    %210 = vector.shape_cast %209 : vector<1x16xf32> to vector<16xf32>
    %211 = vector.shape_cast %210 : vector<16xf32> to vector<1x16xf32>
    %212 = vector.broadcast %211 : vector<1x16xf32> to vector<4x16xf32>
    %213 = arith.mulf %208, %212 : vector<4x16xf32>
    %214 = arith.addf %206, %213 : vector<4x16xf32>
    %c0_107 = arith.constant 0 : index
    %c4_108 = arith.constant 4 : index
    %c1_109 = arith.constant 1 : index
    %c0_110 = arith.constant 0 : index
    %215 = vector.load %arg1[%c0_107, %c4_108, %c1_109, %c0_110] : memref<1x6x6x16xf32, #tpu.memory_space<vmem>>, vector<1x1x4x16xf32>
    %216 = vector.shape_cast %215 : vector<1x1x4x16xf32> to vector<4x16xf32>
    %217 = vector.extract_strided_slice %0 {offsets = [7, 0], sizes = [1, 16], strides = [1, 1]} : vector<9x16xf32> to vector<1x16xf32>
    %218 = vector.shape_cast %217 : vector<1x16xf32> to vector<16xf32>
    %219 = vector.shape_cast %218 : vector<16xf32> to vector<1x16xf32>
    %220 = vector.broadcast %219 : vector<1x16xf32> to vector<4x16xf32>
    %221 = arith.mulf %216, %220 : vector<4x16xf32>
    %222 = arith.addf %214, %221 : vector<4x16xf32>
    %c0_111 = arith.constant 0 : index
    %c4_112 = arith.constant 4 : index
    %c2_113 = arith.constant 2 : index
    %c0_114 = arith.constant 0 : index
    %223 = vector.load %arg1[%c0_111, %c4_112, %c2_113, %c0_114] : memref<1x6x6x16xf32, #tpu.memory_space<vmem>>, vector<1x1x4x16xf32>
    %224 = vector.shape_cast %223 : vector<1x1x4x16xf32> to vector<4x16xf32>
    %225 = vector.extract_strided_slice %0 {offsets = [8, 0], sizes = [1, 16], strides = [1, 1]} : vector<9x16xf32> to vector<1x16xf32>
    %226 = vector.shape_cast %225 : vector<1x16xf32> to vector<16xf32>
    %227 = vector.shape_cast %226 : vector<16xf32> to vector<1x16xf32>
    %228 = vector.broadcast %227 : vector<1x16xf32> to vector<4x16xf32>
    %229 = arith.mulf %224, %228 : vector<4x16xf32>
    %230 = arith.addf %222, %229 : vector<4x16xf32>
    %231 = vector.broadcast %1 : vector<1x16xf32> to vector<4x16xf32>
    %232 = arith.addf %230, %231 : vector<4x16xf32>
    %cst_115 = arith.constant 0.000000e+00 : f32
    %233 = vector.broadcast %cst_115 : f32 to vector<4x16xf32>
    %234 = arith.maximumf %232, %233 : vector<4x16xf32>
    %c8 = arith.constant 8 : index
    %c0_116 = arith.constant 0 : index
    %235 = vector.load %arg7[%c8, %c0_116] : memref<16x16xf32, #tpu.memory_space<vmem>>, vector<4x16xf32>
    tpu.vector_store %arg7[%c8, %c0_116], %234 {strides = array<i32>} : memref<16x16xf32, #tpu.memory_space<vmem>>, vector<4x16xf32>,
    %cst_117 = arith.constant 0.000000e+00 : f32
    %236 = vector.broadcast %cst_117 : f32 to vector<4x16xf32>
    %c0_118 = arith.constant 0 : index
    %c3_119 = arith.constant 3 : index
    %c0_120 = arith.constant 0 : index
    %c0_121 = arith.constant 0 : index
    %237 = vector.load %arg1[%c0_118, %c3_119, %c0_120, %c0_121] : memref<1x6x6x16xf32, #tpu.memory_space<vmem>>, vector<1x1x4x16xf32>
    %238 = vector.shape_cast %237 : vector<1x1x4x16xf32> to vector<4x16xf32>
    %239 = vector.extract_strided_slice %0 {offsets = [0, 0], sizes = [1, 16], strides = [1, 1]} : vector<9x16xf32> to vector<1x16xf32>
    %240 = vector.shape_cast %239 : vector<1x16xf32> to vector<16xf32>
    %241 = vector.shape_cast %240 : vector<16xf32> to vector<1x16xf32>
    %242 = vector.broadcast %241 : vector<1x16xf32> to vector<4x16xf32>
    %243 = arith.mulf %238, %242 : vector<4x16xf32>
    %244 = arith.addf %236, %243 : vector<4x16xf32>
    %c0_122 = arith.constant 0 : index
    %c3_123 = arith.constant 3 : index
    %c1_124 = arith.constant 1 : index
    %c0_125 = arith.constant 0 : index
    %245 = vector.load %arg1[%c0_122, %c3_123, %c1_124, %c0_125] : memref<1x6x6x16xf32, #tpu.memory_space<vmem>>, vector<1x1x4x16xf32>
    %246 = vector.shape_cast %245 : vector<1x1x4x16xf32> to vector<4x16xf32>
    %247 = vector.extract_strided_slice %0 {offsets = [1, 0], sizes = [1, 16], strides = [1, 1]} : vector<9x16xf32> to vector<1x16xf32>
    %248 = vector.shape_cast %247 : vector<1x16xf32> to vector<16xf32>
    %249 = vector.shape_cast %248 : vector<16xf32> to vector<1x16xf32>
    %250 = vector.broadcast %249 : vector<1x16xf32> to vector<4x16xf32>
    %251 = arith.mulf %246, %250 : vector<4x16xf32>
    %252 = arith.addf %244, %251 : vector<4x16xf32>
    %c0_126 = arith.constant 0 : index
    %c3_127 = arith.constant 3 : index
    %c2_128 = arith.constant 2 : index
    %c0_129 = arith.constant 0 : index
    %253 = vector.load %arg1[%c0_126, %c3_127, %c2_128, %c0_129] : memref<1x6x6x16xf32, #tpu.memory_space<vmem>>, vector<1x1x4x16xf32>
    %254 = vector.shape_cast %253 : vector<1x1x4x16xf32> to vector<4x16xf32>
    %255 = vector.extract_strided_slice %0 {offsets = [2, 0], sizes = [1, 16], strides = [1, 1]} : vector<9x16xf32> to vector<1x16xf32>
    %256 = vector.shape_cast %255 : vector<1x16xf32> to vector<16xf32>
    %257 = vector.shape_cast %256 : vector<16xf32> to vector<1x16xf32>
    %258 = vector.broadcast %257 : vector<1x16xf32> to vector<4x16xf32>
    %259 = arith.mulf %254, %258 : vector<4x16xf32>
    %260 = arith.addf %252, %259 : vector<4x16xf32>
    %c0_130 = arith.constant 0 : index
    %c4_131 = arith.constant 4 : index
    %c0_132 = arith.constant 0 : index
    %c0_133 = arith.constant 0 : index
    %261 = vector.load %arg1[%c0_130, %c4_131, %c0_132, %c0_133] : memref<1x6x6x16xf32, #tpu.memory_space<vmem>>, vector<1x1x4x16xf32>
    %262 = vector.shape_cast %261 : vector<1x1x4x16xf32> to vector<4x16xf32>
    %263 = vector.extract_strided_slice %0 {offsets = [3, 0], sizes = [1, 16], strides = [1, 1]} : vector<9x16xf32> to vector<1x16xf32>
    %264 = vector.shape_cast %263 : vector<1x16xf32> to vector<16xf32>
    %265 = vector.shape_cast %264 : vector<16xf32> to vector<1x16xf32>
    %266 = vector.broadcast %265 : vector<1x16xf32> to vector<4x16xf32>
    %267 = arith.mulf %262, %266 : vector<4x16xf32>
    %268 = arith.addf %260, %267 : vector<4x16xf32>
    %c0_134 = arith.constant 0 : index
    %c4_135 = arith.constant 4 : index
    %c1_136 = arith.constant 1 : index
    %c0_137 = arith.constant 0 : index
    %269 = vector.load %arg1[%c0_134, %c4_135, %c1_136, %c0_137] : memref<1x6x6x16xf32, #tpu.memory_space<vmem>>, vector<1x1x4x16xf32>
    %270 = vector.shape_cast %269 : vector<1x1x4x16xf32> to vector<4x16xf32>
    %271 = vector.extract_strided_slice %0 {offsets = [4, 0], sizes = [1, 16], strides = [1, 1]} : vector<9x16xf32> to vector<1x16xf32>
    %272 = vector.shape_cast %271 : vector<1x16xf32> to vector<16xf32>
    %273 = vector.shape_cast %272 : vector<16xf32> to vector<1x16xf32>
    %274 = vector.broadcast %273 : vector<1x16xf32> to vector<4x16xf32>
    %275 = arith.mulf %270, %274 : vector<4x16xf32>
    %276 = arith.addf %268, %275 : vector<4x16xf32>
    %c0_138 = arith.constant 0 : index
    %c4_139 = arith.constant 4 : index
    %c2_140 = arith.constant 2 : index
    %c0_141 = arith.constant 0 : index
    %277 = vector.load %arg1[%c0_138, %c4_139, %c2_140, %c0_141] : memref<1x6x6x16xf32, #tpu.memory_space<vmem>>, vector<1x1x4x16xf32>
    %278 = vector.shape_cast %277 : vector<1x1x4x16xf32> to vector<4x16xf32>
    %279 = vector.extract_strided_slice %0 {offsets = [5, 0], sizes = [1, 16], strides = [1, 1]} : vector<9x16xf32> to vector<1x16xf32>
    %280 = vector.shape_cast %279 : vector<1x16xf32> to vector<16xf32>
    %281 = vector.shape_cast %280 : vector<16xf32> to vector<1x16xf32>
    %282 = vector.broadcast %281 : vector<1x16xf32> to vector<4x16xf32>
    %283 = arith.mulf %278, %282 : vector<4x16xf32>
    %284 = arith.addf %276, %283 : vector<4x16xf32>
    %c0_142 = arith.constant 0 : index
    %c5 = arith.constant 5 : index
    %c0_143 = arith.constant 0 : index
    %c0_144 = arith.constant 0 : index
    %285 = vector.load %arg1[%c0_142, %c5, %c0_143, %c0_144] : memref<1x6x6x16xf32, #tpu.memory_space<vmem>>, vector<1x1x4x16xf32>
    %286 = vector.shape_cast %285 : vector<1x1x4x16xf32> to vector<4x16xf32>
    %287 = vector.extract_strided_slice %0 {offsets = [6, 0], sizes = [1, 16], strides = [1, 1]} : vector<9x16xf32> to vector<1x16xf32>
    %288 = vector.shape_cast %287 : vector<1x16xf32> to vector<16xf32>
    %289 = vector.shape_cast %288 : vector<16xf32> to vector<1x16xf32>
    %290 = vector.broadcast %289 : vector<1x16xf32> to vector<4x16xf32>
    %291 = arith.mulf %286, %290 : vector<4x16xf32>
    %292 = arith.addf %284, %291 : vector<4x16xf32>
    %c0_145 = arith.constant 0 : index
    %c5_146 = arith.constant 5 : index
    %c1_147 = arith.constant 1 : index
    %c0_148 = arith.constant 0 : index
    %293 = vector.load %arg1[%c0_145, %c5_146, %c1_147, %c0_148] : memref<1x6x6x16xf32, #tpu.memory_space<vmem>>, vector<1x1x4x16xf32>
    %294 = vector.shape_cast %293 : vector<1x1x4x16xf32> to vector<4x16xf32>
    %295 = vector.extract_strided_slice %0 {offsets = [7, 0], sizes = [1, 16], strides = [1, 1]} : vector<9x16xf32> to vector<1x16xf32>
    %296 = vector.shape_cast %295 : vector<1x16xf32> to vector<16xf32>
    %297 = vector.shape_cast %296 : vector<16xf32> to vector<1x16xf32>
    %298 = vector.broadcast %297 : vector<1x16xf32> to vector<4x16xf32>
    %299 = arith.mulf %294, %298 : vector<4x16xf32>
    %300 = arith.addf %292, %299 : vector<4x16xf32>
    %c0_149 = arith.constant 0 : index
    %c5_150 = arith.constant 5 : index
    %c2_151 = arith.constant 2 : index
    %c0_152 = arith.constant 0 : index
    %301 = vector.load %arg1[%c0_149, %c5_150, %c2_151, %c0_152] : memref<1x6x6x16xf32, #tpu.memory_space<vmem>>, vector<1x1x4x16xf32>
    %302 = vector.shape_cast %301 : vector<1x1x4x16xf32> to vector<4x16xf32>
    %303 = vector.extract_strided_slice %0 {offsets = [8, 0], sizes = [1, 16], strides = [1, 1]} : vector<9x16xf32> to vector<1x16xf32>
    %304 = vector.shape_cast %303 : vector<1x16xf32> to vector<16xf32>
    %305 = vector.shape_cast %304 : vector<16xf32> to vector<1x16xf32>
    %306 = vector.broadcast %305 : vector<1x16xf32> to vector<4x16xf32>
    %307 = arith.mulf %302, %306 : vector<4x16xf32>
    %308 = arith.addf %300, %307 : vector<4x16xf32>
    %309 = vector.broadcast %1 : vector<1x16xf32> to vector<4x16xf32>
    %310 = arith.addf %308, %309 : vector<4x16xf32>
    %cst_153 = arith.constant 0.000000e+00 : f32
    %311 = vector.broadcast %cst_153 : f32 to vector<4x16xf32>
    %312 = arith.maximumf %310, %311 : vector<4x16xf32>
    %c12 = arith.constant 12 : index
    %c0_154 = arith.constant 0 : index
    %313 = vector.load %arg7[%c12, %c0_154] : memref<16x16xf32, #tpu.memory_space<vmem>>, vector<4x16xf32>
    tpu.vector_store %arg7[%c12, %c0_154], %312 {strides = array<i32>} : memref<16x16xf32, #tpu.memory_space<vmem>>, vector<4x16xf32>,
    %c0_155 = arith.constant 0 : index
    %c0_156 = arith.constant 0 : index
    %314 = vector.load %arg7[%c0_155, %c0_156] : memref<16x16xf32, #tpu.memory_space<vmem>>, vector<16x16xf32>
    %315 = arith.truncf %314 : vector<16x16xf32> to vector<16x16xbf16>
    %c0_157 = arith.constant 0 : index
    %c0_158 = arith.constant 0 : index
    %316 = vector.load %arg4[%c0_157, %c0_158] : memref<16x16xbf16, #tpu.memory_space<vmem>>, vector<16x16xbf16>
    %cst_159 = arith.constant dense<0.000000e+00> : vector<16x16xf32>
    %317 = tpu.matmul %315, %316, %cst_159 {dimension_numbers = #tpu.dot_dimension_numbers<[1], [0], [0], [1], [0, 0, 1, 1], [], []>} : vector<16x16xbf16>, vector<16x16xbf16>, vector<16x16xf32> -> vector<16x16xf32>
    %c0_160 = arith.constant 0 : index
    %c0_161 = arith.constant 0 : index
    %318 = vector.load %arg5[%c0_160, %c0_161] : memref<1x16xf32, #tpu.memory_space<vmem>>, vector<1x16xf32>
    %319 = vector.broadcast %318 : vector<1x16xf32> to vector<16x16xf32>
    %320 = arith.addf %317, %319 : vector<16x16xf32>
    %cst_162 = arith.constant 0.000000e+00 : f32
    %321 = vector.broadcast %cst_162 : f32 to vector<16x16xf32>
    %322 = arith.maximumf %320, %321 : vector<16x16xf32>
    %c0_163 = arith.constant 0 : index
    %c0_164 = arith.constant 0 : index
    %c0_165 = arith.constant 0 : index
    %323 = vector.load %arg6[%c0_163, %c0_164, %c0_165] : memref<1x16x16xf32, #tpu.memory_space<vmem>>, vector<1x16x16xf32>
    %324 = vector.shape_cast %323 : vector<1x16x16xf32> to vector<16x16xf32>
    %325 = vector.shape_cast %322 : vector<16x16xf32> to vector<1x16x16xf32>
    tpu.vector_store %arg6[%c0_163, %c0_164, %c0_165], %325 {strides = array<i32>} : memref<1x16x16xf32, #tpu.memory_space<vmem>>, vector<1x16x16xf32>,
    return
  }
  func.func @transform_0(%arg0: i32) -> (i32, i32, i32, i32) {
    %c0_i32 = arith.constant 0 : i32
    %c0_i32_0 = arith.constant 0 : i32
    %c0_i32_1 = arith.constant 0 : i32
    %c0_i32_2 = arith.constant 0 : i32
    return %arg0, %c0_i32, %c0_i32_0, %c0_i32_1 : i32, i32, i32, i32
  }
  func.func @transform_1(%arg0: i32) -> (i32, i32) {
    %c0_i32 = arith.constant 0 : i32
    %c0_i32_0 = arith.constant 0 : i32
    %c0_i32_1 = arith.constant 0 : i32
    return %c0_i32, %c0_i32_0 : i32, i32
  }
  func.func @transform_2(%arg0: i32) -> (i32, i32) {
    %c0_i32 = arith.constant 0 : i32
    %c0_i32_0 = arith.constant 0 : i32
    %c0_i32_1 = arith.constant 0 : i32
    return %c0_i32, %c0_i32_0 : i32, i32
  }
  func.func @transform_3(%arg0: i32) -> (i32, i32) {
    %c0_i32 = arith.constant 0 : i32
    %c0_i32_0 = arith.constant 0 : i32
    %c0_i32_1 = arith.constant 0 : i32
    return %c0_i32, %c0_i32_0 : i32, i32
  }
  func.func @transform_4(%arg0: i32) -> (i32, i32) {
    %c0_i32 = arith.constant 0 : i32
    %c0_i32_0 = arith.constant 0 : i32
    %c0_i32_1 = arith.constant 0 : i32
    return %c0_i32, %c0_i32_0 : i32, i32
  }
  func.func @transform_5(%arg0: i32) -> (i32, i32, i32) {
    %c0_i32 = arith.constant 0 : i32
    %c0_i32_0 = arith.constant 0 : i32
    %c0_i32_1 = arith.constant 0 : i32
    return %arg0, %c0_i32, %c0_i32_0 : i32, i32, i32
  }
}

module attributes {stable_mosaic.version = 11 : i64} {
  func.func @_head_kernel(%arg0: memref<2x256xf32, #tpu.memory_space<vmem>>, %arg1: memref<256x128xf32, #tpu.memory_space<vmem>>, %arg2: memref<1x128xf32, #tpu.memory_space<vmem>>, %arg3: memref<2x128xf32, #tpu.memory_space<vmem>>) attributes {dimension_semantics = [], scalar_prefetch = 0 : i64, scratch_operands = 0 : i64, tpu.core_type = #tpu.core_type<tc>} {
    %c0 = arith.constant 0 : index
    %c0_0 = arith.constant 0 : index
    %0 = vector.load %arg0[%c0, %c0_0] : memref<2x256xf32, #tpu.memory_space<vmem>>, vector<2x256xf32>
    %c0_1 = arith.constant 0 : index
    %c0_2 = arith.constant 0 : index
    %1 = vector.load %arg1[%c0_1, %c0_2] : memref<256x128xf32, #tpu.memory_space<vmem>>, vector<256x128xf32>
    %cst = arith.constant dense<0.000000e+00> : vector<2x128xf32>
    %2 = tpu.matmul %0, %1, %cst {dimension_numbers = #tpu.dot_dimension_numbers<[1], [0], [0], [1], [0, 0, 1, 1], [], []>} : vector<2x256xf32>, vector<256x128xf32>, vector<2x128xf32> -> vector<2x128xf32>
    %c0_3 = arith.constant 0 : index
    %c0_4 = arith.constant 0 : index
    %3 = vector.load %arg2[%c0_3, %c0_4] : memref<1x128xf32, #tpu.memory_space<vmem>>, vector<1x128xf32>
    %4 = vector.broadcast %3 : vector<1x128xf32> to vector<2x128xf32>
    %5 = arith.addf %2, %4 : vector<2x128xf32>
    %c0_5 = arith.constant 0 : index
    %c0_6 = arith.constant 0 : index
    %6 = vector.load %arg3[%c0_5, %c0_6] : memref<2x128xf32, #tpu.memory_space<vmem>>, vector<2x128xf32>
    tpu.vector_store %arg3[%c0_5, %c0_6], %5 {strides = array<i32>} : memref<2x128xf32, #tpu.memory_space<vmem>>, vector<2x128xf32>,
    return
  }
}

</mosaic_0001>

<bundles_post_ra>
// kernel: _lambda_.9
= control target key start
LH: loop header
LB: loop body
LE: loop exit
PB: predicated region body
PF: predicated region fallthrough
CT: control target
= control target key end

     0   :  { %s380_s0 = inlined_call_operand.vmem [shape: f32[2,256], index: 0, kind: input, shape index: {}]   ;;  %s381_s1 = inlined_call_operand.vmem [shape: f32[256,128], index: 1, kind: input, shape index: {}]   ;;  %s382_s2 = inlined_call_operand.vmem [shape: f32[1,128], index: 2, kind: input, shape index: {}]   ;;  %s383_s3 = inlined_call_operand.hbm [shape: f32[2,128], index: 3, kind: output, shape index: {}]  }
   0x1   :  { %v32_v0 = vld [vmem:[%s381_s1 + $0x80] sm:$0xff]  ;;  %v33_v1 = vld [vmem:[%s381_s1 + $0x88] sm:$0xff]  ;;  %v34_v5 = vld [vmem:[%s381_s1 + $0x90] sm:$0xff] }
   0x2   :  { %v16_v2 = vld [vmem:[%s381_s1] sm:$0xff]  ;;  %v188_v3 = vpack.c.bf16 %v33_v1, %v32_v0  ;;  %v17_v4 = vld [vmem:[%s381_s1 + $0x8] sm:$0xff]  ;;  %v35_v6 = vld [vmem:[%s381_s1 + $0x98] sm:$0xff] }
   0x3   :  { %v190_v7 = vpack.c.bf16 %v17_v4, %v16_v2  ;;  %v192_v8 = vpack.c.bf16 %v35_v6, %v34_v5  ;;  %v18_v9 = vld [vmem:[%s381_s1 + $0x10] sm:$0xff]  ;;  %v19_v10 = vld [vmem:[%s381_s1 + $0x18] sm:$0xff]  ;;  %v36_v11 = vld [vmem:[%s381_s1 + $0xa0] sm:$0xff] }
   0x4   :  { %189 = vmatprep.subr.bf16.mxu0 %v188_v3  ;;  %v37_v12 = vld [vmem:[%s381_s1 + $0xa8] sm:$0xff]  ;;  %v194_v13 = vpack.c.bf16 %v19_v10, %v18_v9  ;;  %v20_v15 = vld [vmem:[%s381_s1 + $0x20] sm:$0xff]  ;;  %v38_v17 = vld [vmem:[%s381_s1 + $0xb0] sm:$0xff] }
   0x5   :  { %191 = vmatpush3.bf16.msra.mxu0 %v190_v7  ;;  %v196_v14 = vpack.c.bf16 %v37_v12, %v36_v11  ;;  %v21_v16 = vld [vmem:[%s381_s1 + $0x28] sm:$0xff]  ;;  %v39_v18 = vld [vmem:[%s381_s1 + $0xb8] sm:$0xff]  ;;  %v22_v21 = vld [vmem:[%s381_s1 + $0x30] sm:$0xff] }
   0x6   :  { %193 = vmatprep.subr.bf16.mxu0 %v192_v8  ;;  %v198_v19 = vpack.c.bf16 %v21_v16, %v20_v15  ;;  %v200_v20 = vpack.c.bf16 %v39_v18, %v38_v17  ;;  %v23_v22 = vld [vmem:[%s381_s1 + $0x38] sm:$0xff]  ;;  %v40_v23 = vld [vmem:[%s381_s1 + $0xc0] sm:$0xff]  ;;  %v41_v24 = vld [vmem:[%s381_s1 + $0xc8] sm:$0xff] }
   0x7   :  { %v152_v25 = vld.sshfl [vmem:[%s380_s0] sm:$0x33 pattern:$0x76325410] }
   0x8   :  { %v63_v26 = vcombine.high %v152_v25, %v152_v25 }
   0x9   :  { %195 = vmatpush3.bf16.msra.mxu0 %v194_v13 }
   0xa   :  { %197 = vmatprep.subr.bf16.mxu0 %v196_v14 }
   0xb   :  { %8 = vsyncpa [#allocation3], 0  ;;  %v202_v27 = vpack.c.bf16 %v23_v22, %v22_v21  ;;  %v204_v28 = vpack.c.bf16 %v41_v24, %v40_v23  ;;  %v24_v29 = vld [vmem:[%s381_s1 + $0x40] sm:$0xff]  ;;  %v25_v30 = vld [vmem:[%s381_s1 + $0x48] sm:$0xff]  ;;  %130 = vmatprep.mubr.f32.mxu0 %v63_v26  ;;  %s245_s25 = smov [#allocation2]  }
   0xc   :  { %v42_v31 = vld [vmem:[%s381_s1 + $0xd0] sm:$0xff]  ;;  %v43_v32 = vld [vmem:[%s381_s1 + $0xd8] sm:$0xff]  ;;  %v206_v33 = vpack.c.bf16 %v25_v30, %v24_v29  ;;  %v44_v37 = vld [vmem:[%s381_s1 + $0xe0] sm:$0xff]  ;;  %s143_s26 = sshll.u32 %s245_s25, 4  ;;  %s144_s26 = int_to_ptr.vmem [resolvable:$true] %s143_s26 }
   0xd   :  { %199 = vmatpush3.bf16.msra.mxu0 %v198_v19  ;;  %v208_v34 = vpack.c.bf16 %v43_v32, %v42_v31  ;;  %v26_v35 = vld [vmem:[%s381_s1 + $0x50] sm:$0xff]  ;;  %v27_v36 = vld [vmem:[%s381_s1 + $0x58] sm:$0xff]  ;;  %v45_v38 = vld [vmem:[%s381_s1 + $0xe8] sm:$0xff]  ;;  %s221_s27 = scalar_lea.vmem %s144_s26, 32  ;;  %p226_p1 = scmp.lt.s32.totalorder %s144_s26, %s144_s26 }
   0xe   :  { %201 = vmatprep.subr.bf16.mxu0 %v200_v20  ;;  %v210_v39 = vpack.c.bf16 %v27_v36, %v26_v35  ;;  %v212_v40 = vpack.c.bf16 %v45_v38, %v44_v37  ;;  %v28_v41 = vld [vmem:[%s381_s1 + $0x60] sm:$0xff]  ;;  %v29_v42 = vld [vmem:[%s381_s1 + $0x68] sm:$0xff]  ;;  %v46_v43 = vld [vmem:[%s381_s1 + $0xf0] sm:$0xff]  ;;  %p222_p0 = scmp.ne.s32.totalorder %s144_s26, %s221_s27  ;;  %p227_p2 = scmp.lt.s32.totalorder %s221_s27, %s221_s27 }
   0xf   :  { %v47_v44 = vld [vmem:[%s381_s1 + $0xf8] sm:$0xff]  ;;  %v214_v45 = vpack.c.bf16 %v29_v42, %v28_v41  ;;  %v30_v47 = vld [vmem:[%s381_s1 + $0x70] sm:$0xff]  ;;  %v151_v52 = vld [vmem:[%s382_s2] ss:$0 sm:$0xff] }
  0x10   :  { %v216_v46 = vpack.c.bf16 %v47_v44, %v46_v43  ;;  %v31_v48 = vld [vmem:[%s381_s1 + $0x78] sm:$0xff]  ;;  %p228_p3 = por %p227_p2, %p226_p1 }
  0x11   :  { %203 = vmatpush3.bf16.msra.mxu0 %v202_v27  ;;  %v218_v49 = vpack.c.bf16 %v31_v48, %v30_v47 }
  0x12   :  { %205 = vmatprep.subr.bf16.mxu0 %v204_v28  ;;  %p229_p4 = pnand %p228_p3, %p222_p0 }
  0x15   :  { %207 = vmatpush3.bf16.msra.mxu0 %v206_v33 }
  0x16   :  { %209 = vmatprep.subr.bf16.mxu0 %v208_v34 }
  0x19   :  { %211 = vmatpush3.bf16.msra.mxu0 %v210_v39 }
  0x1a   :  { %213 = vmatprep.subr.bf16.mxu0 %v212_v40 }
  0x1d   :  { %215 = vmatpush3.bf16.msra.mxu0 %v214_v45 }
  0x1e   :  { %217 = vmatprep.subr.bf16.mxu0 %v216_v46 }
  0x21   :  { %219 = vmatpush3.bf16.msra.mxu0 %v218_v49 }
  0x24   :  { %131 = vmatmul.mubr.f32.vlgmr.msra.gmra.mrb[0].mxu0 %v152_v25 }
  0xf7   :  { %v185_v50 = vpop.f32.mrb[0].mxu0 }
  0xf8   :  { %v186_v51 = vpop.f32.mrb[1].mxu0 }
  0xf9   :  { %v187_v53 = vadd.f32 %v186_v51, %v185_v50 }
  0xfb   :  { %v133_v54 = vadd.f32 %v187_v53, %v151_v52 }
  0xfd   :  { %136 = vst [vmem:[#allocation2] sm:$0x3] %v133_v54 }
  0xfe   :  { %232 = shalt.err (!%p229_p4)
}
  0xff   :  { %s233_s0 = scalar_lea.hbm %s383_s3, 32 }
 0x100   :  { %p234_p5 = scmp.ne.s32.totalorder %s383_s3, %s233_s0  ;;  %p237_p6 = scmp.lt.u32.totalorder %s233_s0, %s383_s3 }
 0x102   :  { %p239_p7 = pnand %p237_p6, %p234_p5 }
 0x104   :  { %242 = shalt.err (!%p239_p7)
}
 0x105   :  { %146 = dma.vmem_to_hbm [thread:$0]  %s144_s26, 32, %s383_s3, [#allocation3]  }
 0x106   :  { %243 = dma.done.wait [#allocation3], 32  }
 0x107   :  { %244 = vsyncadd [#allocation3], 4294967264 }
 0x108   :  { %150 = vsyncpa [#allocation3], 1 }

// kernel: _lambda_.5
= control target key start
LH: loop header
LB: loop body
LE: loop exit
PB: predicated region body
PF: predicated region fallthrough
CT: control target
= control target key end

     0   :  { %s846_s18 = smov 0   ;;  %s1112_s0 = inlined_call_operand.vmem [shape: f32[2,10,10,8], index: 0, kind: input, shape index: {}]   ;;  %s1113_s1 = inlined_call_operand.vmem [shape: f32[9,8], index: 1, kind: input, shape index: {}]   ;;  %s1114_s2 = inlined_call_operand.vmem [shape: f32[1,8], index: 2, kind: input, shape index: {}]   ;;  %s1115_s3 = inlined_call_operand.vmem [shape: bf16[8,8], index: 3, kind: input, shape index: {}]   ;;  %s1116_s4 = inlined_call_operand.vmem [shape: f32[1,8], index: 4, kind: input, shape index: {}]   ;;  %s1117_s5 = inlined_call_operand.vmem [shape: f32[2,64,8], index: 5, kind: output, shape index: {}]  }
   0x1 LB: > { %s693_s19 = sadd.s32 4294967295, %s814_s18   ;;  %p697_p0 = scmp.ge.s32.totalorder %s814_s18, 1  ;;  %s814_s18 = sphi %s846_s18, %s15_s18  }
   0x2   : > { %p187_p1 = scmp.lt.s32.totalorder %s814_s18, 3 }
   0x4   : > { %p188_p2 = pnand %p697_p0, %p187_p1 }
   0x5   : > { %v533_v0 = vld [vmem:[%s1115_s3] sm:$0xf] (!%p188_p2)  ;;  %vm553_vm0 = vcmask (!%p188_p2), 1043456   ;;  %p215_p3 = scmp.lt.s32.totalorder (!%p188_p2), %s693_s19, 1  ;;  %v230_v1 = vlaneseq (!%p188_p2)  ;;  %v871_v13 = vld [vmem:[%s1113_s1 + $0x8] ss:$0 sm:$0xff] (!%p188_p2) }
   0x6   : > { %191 = sbr.rel (%p188_p2) target bundleno = 299 (0x12b), region = 40  ;;  %797 = vmatprep.subr.msk.bf16.mxu0 (!%p188_p2), %vm553_vm0, %v533_v0  ;;  %798 = vmatprep.subr.msk.bf16.mxu1 (!%p188_p2), %vm553_vm0, %v533_v0  ;;  %v555_v2 = vsel (!%p188_p2), %vm553_vm0, %v533_v0, 0  ;;  %v226_v4 = vld [vmem:[%s1113_s1] sm:$0xff] (!%p188_p2)  ;;  %vm302_vm1 = vcmask (!%p188_p2), 64512  }
   0x7   : > { %786 = vmatpush3.bf16.msra.mxu0 (!%p188_p2), %v555_v2  ;;  %796 = vmatpush3.bf16.msra.mxu1 (!%p188_p2), %v555_v2  ;;  %v231_v3 = vshrl.u32 (!%p188_p2), %v230_v1, 7 }
   0x9   : > { %v232_v5 = vsub.s32 (!%p188_p2), 0, %v231_v3  ;;  %v239_v6 = vsub.s32 (!%p188_p2), 1, %v231_v3  ;;  %v246_v7 = vsub.s32 (!%p188_p2), 2, %v231_v3  ;;  %v254_v8 = vsub.s32 (!%p188_p2), 3, %v231_v3 }
   0xa   : > { %v261_v9 = vsub.s32 (!%p188_p2), 4, %v231_v3  ;;  %v268_v10 = vsub.s32 (!%p188_p2), 5, %v231_v3  ;;  %v276_v11 = vsub.s32 (!%p188_p2), 6, %v231_v3  ;;  %v283_v12 = vsub.s32 (!%p188_p2), 7, %v231_v3 }
   0xb   : > { %v873_v14 = vrot.slane (!%p188_p2), %v226_v4, %v232_v5  ;;  %v875_v15 = vrot.slane (!%p188_p2), %v226_v4, %v239_v6  ;;  %v877_v16 = vrot.slane (!%p188_p2), %v226_v4, %v246_v7  ;;  %v879_v17 = vrot.slane (!%p188_p2), %v226_v4, %v254_v8 }
   0xc   : > { %v884_v21 = vrot.slane (!%p188_p2), %v226_v4, %v261_v9  ;;  %v886_v22 = vrot.slane (!%p188_p2), %v226_v4, %v268_v10  ;;  %v888_v23 = vrot.slane (!%p188_p2), %v226_v4, %v276_v11  ;;  %v890_v24 = vrot.slane (!%p188_p2), %v226_v4, %v283_v12 }
   0xd   : > { %s1119_s19 = smov (!%p215_p3, %s693_s19), 1 }
   0xe   : > { %s799_s24 = smul.u32 160, %s1119_s19  ;;  %s779_s9 = sshll.u32 %s1119_s19, 6 }
   0xf   : > { %s224_s12 = scalar_lea.vmem %s1117_s5, %s779_s9 }
  0x10   : > { %s866_s27 = scalar_lea.vmem %s1112_s0, %s799_s24 }
  0x11   : > { %v229_v18 = vld [vmem:[%s866_s27] sm:$0xff]  ;;  %v701_v28 = vld [vmem:[%s866_s27 + $0x10] sm:$0xff] }
  0x12   : > { %v236_v19 = vld [vmem:[%s866_s27 + $0x1] sm:$0xff]  ;;  %v234_v25 = vmul.f32 %v873_v14, %v229_v18  ;;  %v702_v29 = vld [vmem:[%s866_s27 + $0x11] sm:$0xff]  ;;  %v256_v31 = vmul.f32 %v701_v28, %v879_v17  ;;  %v305_v33 = vmul.f32 %v701_v28, %v873_v14 }
  0x13   : > { %v243_v20 = vld [vmem:[%s866_s27 + $0x2] sm:$0xff]  ;;  %v241_v26 = vmul.f32 %v875_v15, %v236_v19  ;;  %v703_v30 = vld [vmem:[%s866_s27 + $0x12] sm:$0xff]  ;;  %v263_v35 = vmul.f32 %v702_v29, %v884_v21  ;;  %v308_v42 = vmul.f32 %v702_v29, %v875_v15 }
  0x14   : > { %v248_v27 = vmul.f32 %v877_v16, %v243_v20  ;;  %v704_v32 = vld [vmem:[%s866_s27 + $0x20] sm:$0xff]  ;;  %v270_v36 = vmul.f32 %v703_v30, %v886_v22  ;;  %v311_v43 = vmul.f32 %v703_v30, %v877_v16  ;;  %v925_v51 = vld [vmem:[%s866_s27 + $0x30] sm:$0xff] }
  0x15   : > { %v242_v34 = vadd.f32 %v241_v26, %v234_v25  ;;  %v278_v37 = vmul.f32 %v704_v32, %v888_v23  ;;  %v705_v38 = vld [vmem:[%s866_s27 + $0x21] sm:$0xff]  ;;  %v314_v48 = vmul.f32 %v704_v32, %v879_v17  ;;  %v309_v52 = vadd.f32 %v308_v42, %v305_v33  ;;  %v930_v54 = vld [vmem:[%s866_s27 + $0x31] sm:$0xff] }
  0x16   : > { %v706_v39 = vld [vmem:[%s866_s27 + $0x22] sm:$0xff]  ;;  %v285_v40 = vmul.f32 %v705_v38, %v890_v24  ;;  %v317_v49 = vmul.f32 %v705_v38, %v884_v21  ;;  %v324_v53 = vmul.f32 %v925_v51, %v888_v23  ;;  %v933_v55 = vld [vmem:[%s866_s27 + $0x32] sm:$0xff]  ;;  %v327_v60 = vmul.f32 %v930_v54, %v890_v24 }
  0x17   : > { %v908_v41 = vmul.f32 %v871_v13, %v706_v39  ;;  %v913_v44 = vld [vmem:[%s866_s27 + $0x40] sm:$0xff]  ;;  %v249_v47 = vadd.f32 %v248_v27, %v242_v34  ;;  %v320_v50 = vmul.f32 %v706_v39, %v886_v22  ;;  %v940_v58 = vld [vmem:[%s866_s27 + $0x50] sm:$0xff]  ;;  %v330_v61 = vmul.f32 %v933_v55, %v871_v13 }
  0x18   : > { %v916_v45 = vld [vmem:[%s866_s27 + $0x41] sm:$0xff]  ;;  %v398_v56 = vmul.f32 %v913_v44, %v873_v14  ;;  %v949_v63 = vld [vmem:[%s866_s27 + $0x51] sm:$0xff]  ;;  %v312_v1 = vadd.f32 %v311_v43, %v309_v52  ;;  %v407_v3 = vmul.f32 %v940_v58, %v879_v17  ;;  %v429_v9 = vmul.f32 %v940_v58, %v873_v14 }
  0x19   : > { %v919_v46 = vld [vmem:[%s866_s27 + $0x42] sm:$0xff]  ;;  %v401_v57 = vmul.f32 %v916_v45, %v875_v15  ;;  %v257_v59 = vadd.f32 %v256_v31, %v249_v47  ;;  %v952_v0 = vld [vmem:[%s866_s27 + $0x52] sm:$0xff]  ;;  %v410_v4 = vmul.f32 %v949_v63, %v884_v21  ;;  %v432_v19 = vmul.f32 %v949_v63, %v875_v15 }
  0x1a   : > { %v404_v62 = vmul.f32 %v919_v46, %v877_v16  ;;  %v959_v5 = vld [vmem:[%s866_s27 + $0x60] sm:$0xff]  ;;  %v413_v7 = vmul.f32 %v952_v0, %v886_v22  ;;  %v315_v10 = vadd.f32 %v314_v48, %v312_v1  ;;  %v435_v20 = vmul.f32 %v952_v0, %v877_v16  ;;  %v986_v34 = vld [vmem:[%s866_s27 + $0x70] sm:$0xff] }
  0x1b   : > { %v402_v2 = vadd.f32 %v401_v57, %v398_v56  ;;  %v264_v6 = vadd.f32 %v263_v35, %v257_v59  ;;  %v417_v8 = vmul.f32 %v959_v5, %v888_v23  ;;  %v968_v12 = vld [vmem:[%s866_s27 + $0x61] sm:$0xff]  ;;  %v438_v28 = vmul.f32 %v959_v5, %v879_v17  ;;  %v994_v52 = vld [vmem:[%s866_s27 + $0x71] sm:$0xff] }
  0x1c   : > { %v971_v18 = vld [vmem:[%s866_s27 + $0x62] sm:$0xff]  ;;  %v420_v26 = vmul.f32 %v968_v12, %v890_v24  ;;  %v318_v29 = vadd.f32 %v317_v49, %v315_v10  ;;  %v433_v31 = vadd.f32 %v432_v19, %v429_v9  ;;  %v441_v33 = vmul.f32 %v968_v12, %v884_v21 }
  0x1d   : > { %v405_v11 = vadd.f32 %v404_v62, %v402_v2  ;;  %v271_v25 = vadd.f32 %v270_v36, %v264_v6  ;;  %v423_v27 = vmul.f32 %v971_v18, %v871_v13  ;;  %v444_v36 = vmul.f32 %v971_v18, %v886_v22 }
  0x1e   : > { %v448_v42 = vmul.f32 %v986_v34, %v888_v23  ;;  %v336_v43 = vmul.f32 %v704_v32, %v873_v14  ;;  %v321_v47 = vadd.f32 %v320_v50, %v318_v29  ;;  %v436_v49 = vadd.f32 %v435_v20, %v433_v31  ;;  %v1005_v32 = vld [vmem:[%s1114_s2] ss:$0 sm:$0xff] }
  0x1f   : > { %v408_v30 = vadd.f32 %v407_v3, %v405_v11  ;;  %v279_v35 = vadd.f32 %v278_v37, %v271_v25  ;;  %v339_v56 = vmul.f32 %v705_v38, %v875_v15  ;;  %v451_v37 = vmul.f32 %v994_v52, %v890_v24  ;;  %v1008_v3 = vld [vmem:[%s866_s27 + $0x72] sm:$0xff] }
  0x20   : > { %v342_v59 = vmul.f32 %v706_v39, %v877_v16  ;;  %v345_v62 = vmul.f32 %v925_v51, %v879_v17  ;;  %v325_v50 = vadd.f32 %v324_v53, %v321_v47  ;;  %v439_v2 = vadd.f32 %v438_v28, %v436_v49 }
  0x21   : > { %v411_v48 = vadd.f32 %v410_v4, %v408_v30  ;;  %v286_v57 = vadd.f32 %v285_v40, %v279_v35  ;;  %v340_v38 = vadd.f32 %v339_v56, %v336_v43  ;;  %v454_v4 = vmul.f32 %v1008_v3, %v871_v13 }
  0x22   : > { %v348_v39 = vmul.f32 %v930_v54, %v884_v21  ;;  %v351_v6 = vmul.f32 %v933_v55, %v886_v22  ;;  %v328_v9 = vadd.f32 %v327_v60, %v325_v50  ;;  %v442_v11 = vadd.f32 %v441_v33, %v439_v2 }
  0x23   : > { %v414_v1 = vadd.f32 %v413_v7, %v411_v48  ;;  %v293_v40 = vadd.f32 %v908_v41, %v286_v57  ;;  %v343_v53 = vadd.f32 %v342_v59, %v340_v38  ;;  %v355_v19 = vmul.f32 %v913_v44, %v888_v23 }
  0x24   : > { %v367_v41 = vmul.f32 %v925_v51, %v873_v14  ;;  %v370_v20 = vmul.f32 %v930_v54, %v875_v15  ;;  %v331_v25 = vadd.f32 %v330_v61, %v328_v9  ;;  %v445_v29 = vadd.f32 %v444_v36, %v442_v11 }
  0x25   : > { %v418_v10 = vadd.f32 %v417_v8, %v414_v1  ;;  %v300_v7 = vadd.f32 %v1005_v32, %v293_v40  ;;  %v346_v30 = vadd.f32 %v345_v62, %v343_v53  ;;  %v373_v8 = vmul.f32 %v933_v55, %v877_v16 }
  0x26   : > { %v371_v60 = vadd.f32 %v370_v20, %v367_v41  ;;  %v376_v33 = vmul.f32 %v913_v44, %v879_v17  ;;  %v332_v35 = vadd.f32 %v1005_v32, %v331_v25  ;;  %v449_v47 = vadd.f32 %v448_v42, %v445_v29 }
  0x27   : > { %v421_v28 = vadd.f32 %v420_v26, %v418_v10  ;;  %v301_v31 = vmax.f32 %v300_v7, 0.0  ;;  %v349_v51 = vadd.f32 %v348_v39, %v346_v30  ;;  %v358_v54 = vmul.f32 %v916_v45, %v890_v24  ;;  %v762_v30 = vld [vmem:[%s866_s27 + $0x82] sm:$0xff] }
  0x28   : > { %v374_v61 = vadd.f32 %v373_v8, %v371_v60  ;;  %v379_v26 = vmul.f32 %v916_v45, %v884_v21  ;;  %v333_v36 = vmax.f32 %v332_v35, 0.0  ;;  %v452_v48 = vadd.f32 %v451_v37, %v449_v47 }
  0x29   : > { %v424_v43 = vadd.f32 %v423_v27, %v421_v28  ;;  %303 = vst.msk [vmem:[#allocation2] sm:$0xff] %vm302_vm1, %v301_v31  ;;  %v352_v49 = vadd.f32 %v351_v6, %v349_v51  ;;  %v361_v44 = vmul.f32 %v919_v46, %v871_v13  ;;  %v382_v42 = vmul.f32 %v919_v46, %v886_v22  ;;  %v760_v6 = vld [vmem:[%s866_s27 + $0x80] sm:$0xff] }
  0x2a   : > { %v377_v27 = vadd.f32 %v376_v33, %v374_v61  ;;  %v460_v56 = vmul.f32 %v959_v5, %v873_v14  ;;  %334 = vst.msk [vmem:[#allocation2 + $0x8] sm:$0xff] %vm302_vm1, %v333_v36  ;;  %v455_v59 = vadd.f32 %v454_v4, %v452_v48  ;;  %v463_v37 = vmul.f32 %v968_v12, %v875_v15 }
  0x2b   : > { %v425_v55 = vadd.f32 %v1005_v32, %v424_v43  ;;  %v356_v45 = vadd.f32 %v355_v19, %v352_v49  ;;  %v386_v50 = vmul.f32 %v940_v58, %v888_v23  ;;  %v466_v1 = vmul.f32 %v971_v18, %v877_v16 }
  0x2c   : > { %v380_v62 = vadd.f32 %v379_v26, %v377_v27  ;;  %v456_v46 = vadd.f32 %v1005_v32, %v455_v59  ;;  %v464_v2 = vadd.f32 %v463_v37, %v460_v56  ;;  %v469_v38 = vmul.f32 %v986_v34, %v879_v17  ;;  %v770_v26 = vld [vmem:[%s866_s27 + $0x91] sm:$0xff] }
  0x2d   : > { %v426_v57 = vmax.f32 %v425_v55, 0.0  ;;  %v359_v5 = vadd.f32 %v358_v54, %v356_v45  ;;  %v389_v12 = vmul.f32 %v949_v63, %v890_v24  ;;  %v472_v58 = vmul.f32 %v994_v52, %v884_v21  ;;  %v771_v27 = vld [vmem:[%s866_s27 + $0x92] sm:$0xff] }
  0x2e   : > { %v383_v40 = vadd.f32 %v382_v42, %v380_v62  ;;  %v457_v4 = vmax.f32 %v456_v46, 0.0  ;;  %v467_v18 = vadd.f32 %v466_v1, %v464_v2  ;;  %v491_v9 = vmul.f32 %v986_v34, %v873_v14  ;;  %v761_v34 = vld [vmem:[%s866_s27 + $0x81] sm:$0xff] }
  0x2f   : > { %427 = vst.msk [vmem:[#allocation2 + $0x20] sm:$0xff] %vm302_vm1, %v426_v57  ;;  %v362_v39 = vadd.f32 %v361_v44, %v359_v5  ;;  %v392_v53 = vmul.f32 %v952_v0, %v871_v13  ;;  %v494_v63 = vmul.f32 %v994_v52, %v875_v15  ;;  %v497_v7 = vmul.f32 %v1008_v3, %v877_v16 }
  0x30   : > { %v521_v10 = vld [vmem:[#allocation2] sm:$0xff]  ;;  %v387_v11 = vadd.f32 %v386_v50, %v383_v40  ;;  %458 = vst.msk [vmem:[#allocation2 + $0x28] sm:$0xff] %vm302_vm1, %v457_v4  ;;  %v470_v41 = vadd.f32 %v469_v38, %v467_v18  ;;  %v475_v14 = vmul.f32 %v1008_v3, %v886_v22  ;;  %v500_v28 = vmul.f32 %v760_v6, %v879_v17  ;;  %v769_v17 = vld [vmem:[%s866_s27 + $0x90] sm:$0xff] }
  0x31   : > { %v363_v19 = vadd.f32 %v1005_v32, %v362_v39  ;;  %v522_v20 = vld [vmem:[#allocation2 + $0x8] sm:$0xff]  ;;  %v495_v0 = vadd.f32 %v494_v63, %v491_v9  ;;  %v479_v16 = vmul.f32 %v760_v6, %v888_v23  ;;  %v503_v8 = vmul.f32 %v761_v34, %v884_v21  ;;  %v772_v40 = vld [vmem:[%s1116_s4] ss:$0 sm:$0xff] }
  0x32   : > { %v390_v25 = vadd.f32 %v389_v12, %v387_v11  ;;  %v529_v29 = vpack.c.bf16 %v522_v20, %v521_v10  ;;  %v473_v52 = vadd.f32 %v472_v58, %v470_v41  ;;  %v482_v33 = vmul.f32 %v761_v34, %v890_v24 }
  0x33   : > { %v364_v15 = vmax.f32 %v363_v19, 0.0  ;;  %v498_v60 = vadd.f32 %v497_v7, %v495_v0  ;;  %v506_v51 = vmul.f32 %v762_v30, %v886_v22  ;;  %v485_v61 = vmul.f32 %v762_v30, %v871_v13 }
  0x34   : > { %v393_v31 = vadd.f32 %v392_v53, %v390_v25  ;;  %787 = vmatprep.mubr.msk.bf16.mxu0 %vm302_vm1, %v529_v29  ;;  %v476_v3 = vadd.f32 %v475_v14, %v473_v52  ;;  %v510_v48 = vmul.f32 %v769_v17, %v888_v23  ;;  %v513_v56 = vmul.f32 %v770_v26, %v890_v24 }
  0x35   : > { %365 = vst.msk [vmem:[#allocation2 + $0x10] sm:$0xff] %vm302_vm1, %v364_v15  ;;  %v501_v47 = vadd.f32 %v500_v28, %v498_v60  ;;  %v516_v59 = vmul.f32 %v771_v27, %v871_v13 }
  0x36   : > { %v525_v35 = vld [vmem:[#allocation2 + $0x20] sm:$0xff]  ;;  %v394_v43 = vadd.f32 %v1005_v32, %v393_v31  ;;  %v480_v54 = vadd.f32 %v479_v16, %v476_v3 }
  0x37   : > { %v526_v21 = vld [vmem:[#allocation2 + $0x28] sm:$0xff]  ;;  %v504_v55 = vadd.f32 %v503_v8, %v501_v47 }
  0x38   : > { %v395_v36 = vmax.f32 %v394_v43, 0.0  ;;  %v531_v49 = vpack.c.bf16 %v526_v21, %v525_v35  ;;  %v483_v44 = vadd.f32 %v482_v33, %v480_v54 }
  0x39   : > { %v507_v42 = vadd.f32 %v506_v51, %v504_v55 }
  0x3a   : > { %396 = vst.msk [vmem:[#allocation2 + $0x18] sm:$0xff] %vm302_vm1, %v395_v36  ;;  %791 = vmatprep.mubr.msk.bf16.mxu1 %vm302_vm1, %v531_v49  ;;  %v486_v22 = vadd.f32 %v485_v61, %v483_v44 }
  0x3b   : > { %v511_v57 = vadd.f32 %v510_v48, %v507_v42 }
  0x3c   : > { %v487_v45 = vadd.f32 %v1005_v32, %v486_v22  ;;  %v523_v62 = vld [vmem:[#allocation2 + $0x10] sm:$0xff] }
  0x3d   : > { %v514_v37 = vadd.f32 %v513_v56, %v511_v57 }
  0x3e   : > { %v488_v23 = vmax.f32 %v487_v45, 0.0 }
  0x3f   : > { %v517_v50 = vadd.f32 %v516_v59, %v514_v37 }
  0x40   : > { %489 = vst.msk [vmem:[#allocation2 + $0x30] sm:$0xff] %vm302_vm1, %v488_v23 }
  0x41   : > { %v524_v1 = vld [vmem:[#allocation2 + $0x18] sm:$0xff]  ;;  %v518_v5 = vadd.f32 %v1005_v32, %v517_v50 }
  0x42   : > { %v530_v46 = vpack.c.bf16 %v524_v1, %v523_v62 }
  0x43   : > { %v519_v24 = vmax.f32 %v518_v5, 0.0 }
  0x44   : > { %788 = vmatmul.mubr.msk.bf16.vlgmr.msra.gmra.mrb[0].mxu0 %vm302_vm1, %v530_v46 }
  0x45   : > { %520 = vst.msk [vmem:[#allocation2 + $0x38] sm:$0xff] %vm302_vm1, %v519_v24 }
  0x47   : > { %v527_v2 = vld [vmem:[#allocation2 + $0x30] sm:$0xff] }
  0x4c   : > { %v528_v13 = vld [vmem:[#allocation2 + $0x38] sm:$0xff] }
  0x4d   : > { %v532_v38 = vpack.c.bf16 %v528_v13, %v527_v2 }
  0x4f   : > { %792 = vmatmul.mubr.msk.bf16.vlgmr.msra.gmra.mrb[0].mxu1 %vm302_vm1, %v532_v38 }
 0x117   : > { %v789_v12 = vpop.f32.mrb[0].mxu0 }
 0x118   : > { %v600_v58 = vadd.f32 %v789_v12, %v772_v40  ;;  %v591_v4 = vpop.f32.mrb[1].mxu0 }
 0x119   : > { %v592_v32 = vadd.f32 %v772_v40, %v591_v4  ;;  %v790_v39 = vpop.f32.mrb[2].mxu0 }
 0x11a   : > { %v624_v18 = vmax.f32 %v600_v58, 0.0  ;;  %v603_v6 = vadd.f32 %v790_v39, %v772_v40  ;;  %v594_v9 = vpop.f32.mrb[3].mxu0 }
 0x11b   : > { %v622_v10 = vmax.f32 %v592_v32, 0.0  ;;  %v595_v11 = vadd.f32 %v772_v40, %v594_v9 }
 0x11c   : > { %632 = vst.msk [vmem:[%s224_s12 + $0x10] sm:$0xff] %vm302_vm1, %v624_v18  ;;  %v625_v53 = vmax.f32 %v603_v6, 0.0 }
 0x11d   : > { %630 = vst.msk [vmem:[%s224_s12] sm:$0xff] %vm302_vm1, %v622_v10  ;;  %v623_v63 = vmax.f32 %v595_v11, 0.0 }
 0x11e   : > { %633 = vst.msk [vmem:[%s224_s12 + $0x18] sm:$0xff] %vm302_vm1, %v625_v53 }
 0x11f   : > { %631 = vst.msk [vmem:[%s224_s12 + $0x8] sm:$0xff] %vm302_vm1, %v623_v63 }
 0x122   : > { %v793_v7 = vpop.f32.mrb[0].mxu1 }
 0x123   : > { %v616_v19 = vadd.f32 %v793_v7, %v772_v40  ;;  %v607_v41 = vpop.f32.mrb[1].mxu1 }
 0x124   : > { %v608_v14 = vadd.f32 %v772_v40, %v607_v41  ;;  %v794_v34 = vpop.f32.mrb[2].mxu1 }
 0x125   : > { %v628_v20 = vmax.f32 %v616_v19, 0.0  ;;  %v619_v25 = vadd.f32 %v794_v34, %v772_v40  ;;  %v610_v0 = vpop.f32.mrb[3].mxu1 }
 0x126   : > { %v626_v28 = vmax.f32 %v608_v14, 0.0  ;;  %v611_v29 = vadd.f32 %v772_v40, %v610_v0 }
 0x127   : > { %636 = vst.msk [vmem:[%s224_s12 + $0x30] sm:$0xff] %vm302_vm1, %v628_v20  ;;  %v629_v15 = vmax.f32 %v619_v25, 0.0 }
 0x128   : > { %634 = vst.msk [vmem:[%s224_s12 + $0x20] sm:$0xff] %vm302_vm1, %v626_v28  ;;  %v627_v52 = vmax.f32 %v611_v29, 0.0 }
 0x129   : > { %637 = vst.msk [vmem:[%s224_s12 + $0x38] sm:$0xff] %vm302_vm1, %v629_v15 }
 0x12a   : > { %635 = vst.msk [vmem:[%s224_s12 + $0x28] sm:$0xff] %vm302_vm1, %v627_v52 }
 0x12b PF: > { %s15_s18 = sadd.s32 1, %s814_s18  }
 0x12c   : > { %p12_p4 = scmp.ge.s32.totalorder %s15_s18, 4  }
 0x12e   :  { %14 = sbr.rel (!%p12_p4) target bundleno = 1 (0x1), region = 79 }

// kernel: _lambda_.7
= control target key start
LH: loop header
LB: loop body
LE: loop exit
PB: predicated region body
PF: predicated region fallthrough
CT: control target
= control target key end

     0   :  { %s647_s18 = smov 0   ;;  %s767_s0 = inlined_call_operand.vmem [shape: f32[2,30,4,8], index: 0, kind: input, shape index: {}]   ;;  %s768_s1 = inlined_call_operand.vmem [shape: f32[9,8], index: 1, kind: input, shape index: {}]   ;;  %s769_s2 = inlined_call_operand.vmem [shape: f32[1,8], index: 2, kind: input, shape index: {}]   ;;  %s770_s3 = inlined_call_operand.vmem [shape: bf16[8,16], index: 3, kind: input, shape index: {}]   ;;  %s771_s4 = inlined_call_operand.vmem [shape: f32[1,16], index: 4, kind: input, shape index: {}]   ;;  %s772_s5 = inlined_call_operand.vmem [shape: f32[2,16,16], index: 5, kind: output, shape index: {}]  }
   0x1 LB: > { %s538_s19 = sadd.s32 4294967295, %s613_s18   ;;  %p542_p0 = scmp.ge.s32.totalorder %s613_s18, 1  ;;  %s613_s18 = sphi %s647_s18, %s15_s18  }
   0x2   : > { %p187_p1 = scmp.lt.s32.totalorder %s613_s18, 3 }
   0x4   : > { %p188_p2 = pnand %p542_p0, %p187_p1 }
   0x5   : > { %v421_v0 = vld [vmem:[%s770_s3] sm:$0xf] (!%p188_p2)  ;;  %vm433_vm0 = vcmask (!%p188_p2), 1043456   ;;  %p215_p3 = scmp.lt.s32.totalorder (!%p188_p2), %s538_s19, 1  ;;  %v230_v1 = vlaneseq (!%p188_p2)  ;;  %v615_v2 = vmov (!%p188_p2), 0.0   ;;  %vm616_vm1 = vmmov (!%p188_p2), 0  }
   0x6   : > { %191 = sbr.rel (%p188_p2) target bundleno = 276 (0x114), region = 40  ;;  %590 = vmatprep.subr.bf16.mxu0 (!%p188_p2), %v615_v2  ;;  %v435_v3 = vsel (!%p188_p2), %vm433_vm0, %v421_v0, 0  ;;  %592 = vmatprep.mubr.msk.bf16.mxu0 (!%p188_p2), %vm616_vm1, %v615_v2  ;;  %v226_v5 = vld [vmem:[%s768_s1] sm:$0xff] (!%p188_p2)  ;;  %v709_v57 = vld [vmem:[%s768_s1 + $0x8] ss:$0 sm:$0xff] (!%p188_p2)  ;;  %vm308_vm2 = vcmask (!%p188_p2), 60416  }
   0x7   : > { %591 = vmatpush3.bf16.msra.mxu0 (!%p188_p2), %v435_v3  ;;  %v231_v4 = vshrl.u32 (!%p188_p2), %v230_v1, 7  ;;  %vm429_vm3 = vcmask (!%p188_p2), 64512   ;;  %vm480_vm4 = vcmask (!%p188_p2), 130048  }
   0x9   : > { %v232_v6 = vsub.s32 (!%p188_p2), 0, %v231_v4  ;;  %v240_v7 = vsub.s32 (!%p188_p2), 1, %v231_v4  ;;  %v248_v8 = vsub.s32 (!%p188_p2), 2, %v231_v4  ;;  %v256_v9 = vsub.s32 (!%p188_p2), 3, %v231_v4 }
   0xa   : > { %v264_v10 = vsub.s32 (!%p188_p2), 4, %v231_v4  ;;  %v272_v11 = vsub.s32 (!%p188_p2), 5, %v231_v4  ;;  %v280_v12 = vsub.s32 (!%p188_p2), 6, %v231_v4  ;;  %v288_v13 = vsub.s32 (!%p188_p2), 7, %v231_v4 }
   0xb   : > { %v233_v14 = vrot.slane (!%p188_p2), %v226_v5, %v232_v6  ;;  %v241_v15 = vrot.slane (!%p188_p2), %v226_v5, %v240_v7  ;;  %v669_v16 = vrot.slane (!%p188_p2), %v226_v5, %v248_v8  ;;  %v671_v17 = vrot.slane (!%p188_p2), %v226_v5, %v256_v9 }
   0xc   : > { %v678_v25 = vrot.slane (!%p188_p2), %v226_v5, %v264_v10  ;;  %v682_v28 = vrot.slane (!%p188_p2), %v226_v5, %v272_v11  ;;  %v688_v34 = vrot.slane (!%p188_p2), %v226_v5, %v280_v12  ;;  %v695_v43 = vrot.slane (!%p188_p2), %v226_v5, %v288_v13 }
   0xd   : > { %s774_s19 = smov (!%p215_p3, %s538_s19), 1 }
   0xe   : > { %s596_s24 = smul.u32 120, %s774_s19  ;;  %s587_s9 = sshll.u32 %s774_s19, 4 }
   0xf   : > { %s224_s12 = scalar_lea.vmem %s772_s5, %s587_s9 }
  0x10   : > { %s667_s27 = scalar_lea.vmem %s767_s0, %s596_s24 }
  0x11   : > { %v229_v18 = vld [vmem:[%s667_s27] sm:$0xf]  ;;  %v546_v19 = vld [vmem:[%s667_s27 + $0x28] sm:$0xf]  ;;  %v547_v20 = vld [vmem:[%s667_s27 + $0x50] sm:$0xf] }
  0x12   : > { %v234_v21 = vmul.f32 %v233_v14, %v229_v18  ;;  %v242_v22 = vmul.f32 %v546_v19, %v241_v15  ;;  %v250_v23 = vmul.f32 %v547_v20, %v669_v16  ;;  %v548_v24 = vld [vmem:[%s667_s27 + $0x4] sm:$0xf]  ;;  %v549_v26 = vld [vmem:[%s667_s27 + $0x2c] sm:$0xf]  ;;  %v550_v27 = vld [vmem:[%s667_s27 + $0x54] sm:$0xf] }
  0x13   : > { %v258_v30 = vmul.f32 %v548_v24, %v671_v17  ;;  %v556_v31 = vld [vmem:[%s667_s27 + $0x8] sm:$0xf]  ;;  %v557_v32 = vld [vmem:[%s667_s27 + $0x30] sm:$0xf]  ;;  %v558_v33 = vld [vmem:[%s667_s27 + $0x58] sm:$0xf]  ;;  %v266_v40 = vmul.f32 %v549_v26, %v678_v25  ;;  %v274_v45 = vmul.f32 %v550_v27, %v682_v28 }
  0x14   : > { %v243_v29 = vadd.f32 %v242_v22, %v234_v21  ;;  %v311_v35 = vmul.f32 %v556_v31, %v233_v14  ;;  %v314_v36 = vmul.f32 %v557_v32, %v241_v15  ;;  %v317_v37 = vmul.f32 %v558_v33, %v669_v16  ;;  %v559_v38 = vld [vmem:[%s667_s27 + $0xc] sm:$0xf]  ;;  %v551_v41 = vld [vmem:[%s667_s27 + $0x8] sm:$0xf]  ;;  %v552_v42 = vld [vmem:[%s667_s27 + $0x30] sm:$0xf] }
  0x15   : > { %v560_v44 = vld [vmem:[%s667_s27 + $0x34] sm:$0xf]  ;;  %v321_v47 = vmul.f32 %v559_v38, %v671_v17  ;;  %v565_v48 = vld [vmem:[%s667_s27 + $0x10] sm:$0xf]  ;;  %v566_v49 = vld [vmem:[%s667_s27 + $0x38] sm:$0xf]  ;;  %v282_v58 = vmul.f32 %v551_v41, %v688_v34  ;;  %v290_v0 = vmul.f32 %v552_v42, %v695_v43 }
  0x16   : > { %v251_v39 = vadd.f32 %v250_v23, %v243_v29  ;;  %v315_v46 = vadd.f32 %v314_v36, %v311_v35  ;;  %v567_v50 = vld [vmem:[%s667_s27 + $0x60] sm:$0xf]  ;;  %v561_v52 = vld [vmem:[%s667_s27 + $0x5c] sm:$0xf]  ;;  %v347_v53 = vmul.f32 %v565_v48, %v233_v14  ;;  %v350_v54 = vmul.f32 %v566_v49, %v241_v15  ;;  %v568_v56 = vld [vmem:[%s667_s27 + $0x14] sm:$0xf] }
  0x17   : > { %v353_v55 = vmul.f32 %v567_v50, %v669_v16  ;;  %v325_v60 = vmul.f32 %v560_v44, %v678_v25  ;;  %v562_v61 = vld [vmem:[%s667_s27 + $0x10] sm:$0xf]  ;;  %v569_v62 = vld [vmem:[%s667_s27 + $0x3c] sm:$0xf]  ;;  %v357_v2 = vmul.f32 %v568_v56, %v671_v17  ;;  %v574_v3 = vld [vmem:[%s667_s27 + $0x18] sm:$0xf]  ;;  %v329_v8 = vmul.f32 %v561_v52, %v682_v28 }
  0x18   : > { %v259_v51 = vadd.f32 %v258_v30, %v251_v39  ;;  %v318_v59 = vadd.f32 %v317_v37, %v315_v46  ;;  %v351_v1 = vadd.f32 %v350_v54, %v347_v53  ;;  %v575_v4 = vld [vmem:[%s667_s27 + $0x40] sm:$0xf]  ;;  %v576_v5 = vld [vmem:[%s667_s27 + $0x68] sm:$0xf]  ;;  %v553_v6 = vld [vmem:[%s667_s27 + $0x58] sm:$0xf]  ;;  %v383_v10 = vmul.f32 %v574_v3, %v233_v14 }
  0x19   : > { %v570_v9 = vld [vmem:[%s667_s27 + $0x64] sm:$0xf]  ;;  %v386_v11 = vmul.f32 %v575_v4, %v241_v15  ;;  %v577_v12 = vld [vmem:[%s667_s27 + $0x1c] sm:$0xf]  ;;  %v563_v18 = vld [vmem:[%s667_s27 + $0x38] sm:$0xf]  ;;  %v361_v20 = vmul.f32 %v569_v62, %v678_v25  ;;  %v389_v21 = vmul.f32 %v576_v5, %v669_v16  ;;  %v333_v24 = vmul.f32 %v562_v61, %v688_v34 }
  0x1a   : > { %v267_v63 = vadd.f32 %v266_v40, %v259_v51  ;;  %v322_v7 = vadd.f32 %v321_v47, %v318_v59  ;;  %v354_v19 = vadd.f32 %v353_v55, %v351_v1  ;;  %v578_v22 = vld [vmem:[%s667_s27 + $0x44] sm:$0xf]  ;;  %v571_v26 = vld [vmem:[%s667_s27 + $0x18] sm:$0xf]  ;;  %v393_v14 = vmul.f32 %v577_v12, %v671_v17  ;;  %v564_v30 = vld [vmem:[%s667_s27 + $0x60] sm:$0xf] }
  0x1b   : > { %v387_v27 = vadd.f32 %v386_v11, %v383_v10  ;;  %v298_v29 = vmul.f32 %v709_v57, %v553_v6  ;;  %v365_v32 = vmul.f32 %v570_v9, %v682_v28  ;;  %v579_v33 = vld [vmem:[%s667_s27 + $0x6c] sm:$0xf]  ;;  %v337_v16 = vmul.f32 %v563_v18, %v695_v43  ;;  %v572_v36 = vld [vmem:[%s667_s27 + $0x40] sm:$0xf]  ;;  %v573_v46 = vld [vmem:[%s667_s27 + $0x68] sm:$0xf] }
  0x1c   : > { %v275_v13 = vadd.f32 %v274_v45, %v267_v63  ;;  %v326_v23 = vadd.f32 %v325_v60, %v322_v7  ;;  %v358_v31 = vadd.f32 %v357_v2, %v354_v19  ;;  %v397_v38 = vmul.f32 %v578_v22, %v678_v25  ;;  %v580_v41 = vld [vmem:[%s667_s27 + $0x20] sm:$0xf]  ;;  %v581_v51 = vld [vmem:[%s667_s27 + $0x48] sm:$0xf]  ;;  %v582_v59 = vld [vmem:[%s667_s27 + $0x70] sm:$0xf] }
  0x1d   : > { %v390_v37 = vadd.f32 %v389_v21, %v387_v27  ;;  %v369_v17 = vmul.f32 %v571_v26, %v688_v34  ;;  %v555_v42 = vld [vmem:[%s769_s2] ss:$0 sm:$0xff]  ;;  %v341_v45 = vmul.f32 %v564_v30, %v709_v57  ;;  %v401_v48 = vmul.f32 %v579_v33, %v682_v28 }
  0x1e   : > { %v283_v15 = vadd.f32 %v282_v58, %v275_v13  ;;  %v330_v35 = vadd.f32 %v329_v8, %v326_v23  ;;  %v362_v40 = vadd.f32 %v361_v20, %v358_v31  ;;  %v373_v25 = vmul.f32 %v572_v36, %v695_v43  ;;  %v583_v11 = vld [vmem:[%s771_s4] ss:$0 sm:$0xff] }
  0x1f   : > { %v394_v47 = vadd.f32 %v393_v14, %v390_v37  ;;  %v405_v54 = vmul.f32 %v580_v41, %v688_v34  ;;  %v377_v58 = vmul.f32 %v573_v46, %v709_v57  ;;  %v409_v62 = vmul.f32 %v581_v51, %v695_v43 }
  0x20   : > { %v291_v39 = vadd.f32 %v290_v0, %v283_v15  ;;  %v334_v44 = vadd.f32 %v333_v24, %v330_v35  ;;  %v366_v50 = vadd.f32 %v365_v32, %v362_v40  ;;  %v413_v2 = vmul.f32 %v582_v59, %v709_v57 }
  0x21   : > { %v398_v53 = vadd.f32 %v397_v38, %v394_v47 }
  0x22   : > { %v299_v49 = vadd.f32 %v298_v29, %v291_v39  ;;  %v338_v52 = vadd.f32 %v337_v16, %v334_v44  ;;  %v370_v56 = vadd.f32 %v369_v17, %v366_v50 }
  0x23   : > { %v402_v61 = vadd.f32 %v401_v48, %v398_v53 }
  0x24   : > { %v306_v55 = vadd.f32 %v555_v42, %v299_v49  ;;  %v342_v60 = vadd.f32 %v341_v45, %v338_v52  ;;  %v374_v63 = vadd.f32 %v373_v25, %v370_v56 }
  0x25   : > { %v406_v1 = vadd.f32 %v405_v54, %v402_v61 }
  0x26   : > { %v307_v28 = vmax.f32 %v306_v55, 0.0  ;;  %v343_v0 = vadd.f32 %v555_v42, %v342_v60  ;;  %v378_v3 = vadd.f32 %v377_v58, %v374_v63 }
  0x27   : > { %v410_v4 = vadd.f32 %v409_v62, %v406_v1 }
  0x28   : > { %309 = vst.msk [vmem:[#allocation2] sm:$0xf] %vm308_vm2, %v307_v28  ;;  %v344_v34 = vmax.f32 %v343_v0, 0.0  ;;  %v379_v5 = vadd.f32 %v555_v42, %v378_v3 }
  0x29   : > { %v414_v6 = vadd.f32 %v413_v2, %v410_v4 }
  0x2a   : > { %345 = vst.msk [vmem:[#allocation2 + $0x4] sm:$0xf] %vm308_vm2, %v344_v34  ;;  %v380_v7 = vmax.f32 %v379_v5, 0.0 }
  0x2b   : > { %v415_v8 = vadd.f32 %v555_v42, %v414_v6 }
  0x2c   : > { %381 = vst.msk [vmem:[#allocation2 + $0x8] sm:$0xf] %vm308_vm2, %v380_v7 }
  0x2d   : > { %v416_v43 = vmax.f32 %v415_v8, 0.0 }
  0x2f   : > { %417 = vst.msk [vmem:[#allocation2 + $0xc] sm:$0xf] %vm308_vm2, %v416_v43 }
  0x31   : > { %v418_v9 = vld [vmem:[#allocation2] sm:$0xff] }
  0x36   : > { %v419_v10 = vld [vmem:[#allocation2 + $0x8] sm:$0xff] }
  0x37   : > { %v420_v57 = vpack.c.bf16 %v419_v10, %v418_v9 }
  0x39   : > { %593 = vmatmul.mubr.msk.bf16.vlgmr.msra.gmra.mrb[0].mxu0 %vm429_vm3, %v420_v57 }
 0x10c   : > { %v471_v12 = vpop.f32.mrb[0].mxu0 }
 0x10d   : > { %v472_v13 = vadd.f32 %v583_v11, %v471_v12  ;;  %v594_v18 = vpop.f32.mrb[1].mxu0 }
 0x10e   : > { %v474_v19 = vpop.f32.mrb[2].mxu0 }
 0x10f   : > { %v478_v20 = vmax.f32 %v472_v13, 0.0  ;;  %v475_v21 = vadd.f32 %v583_v11, %v474_v19  ;;  %v595_v22 = vpop.f32.mrb[3].mxu0 }
 0x111   : > { %481 = vst.msk [vmem:[%s224_s12] sm:$0xff] %vm480_vm4, %v478_v20  ;;  %v479_v23 = vmax.f32 %v475_v21, 0.0 }
 0x113   : > { %482 = vst.msk [vmem:[%s224_s12 + $0x8] sm:$0xff] %vm480_vm4, %v479_v23 }
 0x114 PF: > { %s15_s18 = sadd.s32 1, %s613_s18  }
 0x115   : > { %p12_p4 = scmp.ge.s32.totalorder %s15_s18, 4  }
 0x117   :  { %14 = sbr.rel (!%p12_p4) target bundleno = 1 (0x1), region = 96 }

// kernel: _lambda_.8
= control target key start
LH: loop header
LB: loop body
LE: loop exit
PB: predicated region body
PF: predicated region fallthrough
CT: control target
= control target key end

     0   :  { %s628_s18 = smov 0   ;;  %s760_s0 = inlined_call_operand.vmem [shape: f32[2,6,6,16], index: 0, kind: input, shape index: {}]   ;;  %s761_s1 = inlined_call_operand.vmem [shape: f32[9,16], index: 1, kind: input, shape index: {}]   ;;  %s762_s2 = inlined_call_operand.vmem [shape: f32[1,16], index: 2, kind: input, shape index: {}]   ;;  %s763_s3 = inlined_call_operand.vmem [shape: bf16[16,16], index: 3, kind: input, shape index: {}]   ;;  %s764_s4 = inlined_call_operand.vmem [shape: f32[1,16], index: 4, kind: input, shape index: {}]   ;;  %s765_s5 = inlined_call_operand.vmem [shape: f32[2,16,16], index: 5, kind: output, shape index: {}]  }
   0x1 LB: > { %s519_s19 = sadd.s32 4294967295, %s594_s18   ;;  %p523_p0 = scmp.ge.s32.totalorder %s594_s18, 1  ;;  %s594_s18 = sphi %s628_s18, %s15_s18  }
   0x2   : > { %p187_p1 = scmp.lt.s32.totalorder %s594_s18, 3 }
   0x4   : > { %p188_p2 = pnand %p523_p0, %p187_p1 }
   0x5   : > { %v587_v0 = vld [vmem:[%s763_s3] sm:$0xff] (!%p188_p2)   ;;  %v230_v1 = vlaneseq (!%p188_p2)  ;;  %v596_v2 = vmov (!%p188_p2), 0.0   ;;  %p215_p3 = scmp.lt.s32.totalorder (!%p188_p2), %s519_s19, 1  ;;  %vm597_vm0 = vmmov (!%p188_p2), 0   ;;  %v700_v56 = vld [vmem:[%s761_s1 + $0x8] ss:$0 sm:$0xff] (!%p188_p2) }
   0x6   : > { %191 = sbr.rel (%p188_p2) target bundleno = 276 (0x114), region = 40  ;;  %570 = vmatprep.subr.bf16.mxu0 (!%p188_p2), %v596_v2  ;;  %572 = vmatprep.mubr.msk.bf16.mxu0 (!%p188_p2), %vm597_vm0, %v596_v2  ;;  %v226_v4 = vld [vmem:[%s761_s1] sm:$0xff] (!%p188_p2)  ;;  %vm302_vm1 = vcmask (!%p188_p2), 125952   ;;  %vm415_vm2 = vcmask (!%p188_p2), 130048  }
   0x7   : > { %571 = vmatpush3.bf16.msra.mxu0 (!%p188_p2), %v587_v0  ;;  %v231_v3 = vshrl.u32 (!%p188_p2), %v230_v1, 7 }
   0x9   : > { %v232_v5 = vsub.s32 (!%p188_p2), 0, %v231_v3  ;;  %v239_v6 = vsub.s32 (!%p188_p2), 1, %v231_v3  ;;  %v246_v7 = vsub.s32 (!%p188_p2), 2, %v231_v3  ;;  %v254_v8 = vsub.s32 (!%p188_p2), 3, %v231_v3 }
   0xa   : > { %v261_v9 = vsub.s32 (!%p188_p2), 4, %v231_v3  ;;  %v268_v13 = vsub.s32 (!%p188_p2), 5, %v231_v3  ;;  %v276_v15 = vsub.s32 (!%p188_p2), 6, %v231_v3  ;;  %v283_v16 = vsub.s32 (!%p188_p2), 7, %v231_v3 }
   0xb   : > { %v645_v10 = vrot.slane (!%p188_p2), %v226_v4, %v232_v5  ;;  %v647_v11 = vrot.slane (!%p188_p2), %v226_v4, %v239_v6  ;;  %v649_v12 = vrot.slane (!%p188_p2), %v226_v4, %v246_v7  ;;  %v656_v14 = vrot.slane (!%p188_p2), %v226_v4, %v254_v8 }
   0xc   : > { %v665_v24 = vrot.slane (!%p188_p2), %v226_v4, %v261_v9  ;;  %v669_v27 = vrot.slane (!%p188_p2), %v226_v4, %v268_v13  ;;  %v675_v33 = vrot.slane (!%p188_p2), %v226_v4, %v276_v15  ;;  %v684_v42 = vrot.slane (!%p188_p2), %v226_v4, %v283_v16 }
   0xd   : > { %s767_s19 = smov (!%p215_p3, %s519_s19), 1 }
   0xe   : > { %s576_s24 = smul.u32 48, %s767_s19  ;;  %s567_s9 = sshll.u32 %s767_s19, 4 }
   0xf   : > { %s224_s12 = scalar_lea.vmem %s765_s5, %s567_s9 }
  0x10   : > { %s654_s27 = scalar_lea.vmem %s760_s0, %s576_s24 }
  0x11   : > { %v229_v17 = vld [vmem:[%s654_s27] sm:$0xf]  ;;  %v527_v23 = vld [vmem:[%s654_s27 + $0x8] sm:$0xf]  ;;  %v538_v37 = vld [vmem:[%s654_s27 + $0x10] sm:$0xf] }
  0x12   : > { %v236_v18 = vld [vmem:[%s654_s27 + $0x1] sm:$0xf]  ;;  %v234_v20 = vmul.f32 %v645_v10, %v229_v17  ;;  %v528_v25 = vld [vmem:[%s654_s27 + $0x9] sm:$0xf]  ;;  %v256_v29 = vmul.f32 %v527_v23, %v656_v14  ;;  %v530_v40 = vld [vmem:[%s654_s27 + $0x10] sm:$0xf]  ;;  %v314_v46 = vmul.f32 %v538_v37, %v656_v14 }
  0x13   : > { %v243_v19 = vld [vmem:[%s654_s27 + $0x2] sm:$0xf]  ;;  %v241_v21 = vmul.f32 %v647_v11, %v236_v18  ;;  %v529_v26 = vld [vmem:[%s654_s27 + $0xa] sm:$0xf]  ;;  %v263_v39 = vmul.f32 %v528_v25, %v665_v24  ;;  %v531_v41 = vld [vmem:[%s654_s27 + $0x11] sm:$0xf]  ;;  %v278_v57 = vmul.f32 %v530_v40, %v675_v33 }
  0x14   : > { %v248_v22 = vmul.f32 %v649_v12, %v243_v19  ;;  %v535_v30 = vld [vmem:[%s654_s27 + $0x8] sm:$0xf]  ;;  %v539_v43 = vld [vmem:[%s654_s27 + $0x11] sm:$0xf]  ;;  %v270_v44 = vmul.f32 %v529_v26, %v669_v27  ;;  %v547_v55 = vld [vmem:[%s654_s27 + $0x18] sm:$0xf]  ;;  %v285_v63 = vmul.f32 %v531_v41, %v684_v42 }
  0x15   : > { %v242_v28 = vadd.f32 %v241_v21, %v234_v20  ;;  %v536_v31 = vld [vmem:[%s654_s27 + $0x9] sm:$0xf]  ;;  %v305_v34 = vmul.f32 %v535_v30, %v645_v10  ;;  %v544_v47 = vld [vmem:[%s654_s27 + $0x10] sm:$0xf]  ;;  %v317_v59 = vmul.f32 %v539_v43, %v665_v24  ;;  %v541_v60 = vld [vmem:[%s654_s27 + $0x18] sm:$0xf]  ;;  %v345_v1 = vmul.f32 %v547_v55, %v656_v14 }
  0x16   : > { %v537_v32 = vld [vmem:[%s654_s27 + $0xa] sm:$0xf]  ;;  %v308_v35 = vmul.f32 %v536_v31, %v647_v11  ;;  %v545_v48 = vld [vmem:[%s654_s27 + $0x11] sm:$0xf]  ;;  %v336_v52 = vmul.f32 %v544_v47, %v645_v10  ;;  %v548_v61 = vld [vmem:[%s654_s27 + $0x19] sm:$0xf]  ;;  %v324_v23 = vmul.f32 %v541_v60, %v675_v33 }
  0x17   : > { %v311_v36 = vmul.f32 %v537_v32, %v649_v12  ;;  %v249_v38 = vadd.f32 %v248_v22, %v242_v28  ;;  %v546_v49 = vld [vmem:[%s654_s27 + $0x12] sm:$0xf]  ;;  %v339_v53 = vmul.f32 %v545_v48, %v647_v11  ;;  %v553_v2 = vld [vmem:[%s654_s27 + $0x18] sm:$0xf]  ;;  %v556_v15 = vld [vmem:[%s654_s27 + $0x20] sm:$0xf]  ;;  %v348_v19 = vmul.f32 %v548_v61, %v665_v24 }
  0x18   : > { %v309_v45 = vadd.f32 %v308_v35, %v305_v34  ;;  %v540_v51 = vld [vmem:[%s654_s27 + $0x12] sm:$0xf]  ;;  %v342_v54 = vmul.f32 %v546_v49, %v649_v12  ;;  %v554_v3 = vld [vmem:[%s654_s27 + $0x19] sm:$0xf]  ;;  %v367_v9 = vmul.f32 %v553_v2, %v645_v10  ;;  %v557_v21 = vld [vmem:[%s654_s27 + $0x21] sm:$0xf]  ;;  %v376_v10 = vmul.f32 %v556_v15, %v656_v14 }
  0x19   : > { %v257_v50 = vadd.f32 %v256_v29, %v249_v38  ;;  %v340_v0 = vadd.f32 %v339_v53, %v336_v52  ;;  %v555_v4 = vld [vmem:[%s654_s27 + $0x1a] sm:$0xf]  ;;  %v532_v5 = vld [vmem:[%s654_s27 + $0x12] sm:$0xf]  ;;  %v320_v7 = vmul.f32 %v540_v51, %v669_v27  ;;  %v370_v13 = vmul.f32 %v554_v3, %v647_v11  ;;  %v550_v25 = vld [vmem:[%s654_s27 + $0x20] sm:$0xf] }
  0x1a   : > { %v312_v58 = vadd.f32 %v311_v36, %v309_v45  ;;  %v549_v8 = vld [vmem:[%s654_s27 + $0x1a] sm:$0xf]  ;;  %v373_v20 = vmul.f32 %v555_v4, %v649_v12  ;;  %v292_v28 = vmul.f32 %v700_v56, %v532_v5  ;;  %v558_v32 = vld [vmem:[%s654_s27 + $0x22] sm:$0xf]  ;;  %v379_v37 = vmul.f32 %v557_v21, %v665_v24  ;;  %v559_v40 = vld [vmem:[%s654_s27 + $0x28] sm:$0xf] }
  0x1b   : > { %v264_v62 = vadd.f32 %v263_v39, %v257_v50  ;;  %v542_v17 = vld [vmem:[%s654_s27 + $0x19] sm:$0xf]  ;;  %v343_v18 = vadd.f32 %v342_v54, %v340_v0  ;;  %v371_v26 = vadd.f32 %v370_v13, %v367_v9  ;;  %v351_v31 = vmul.f32 %v549_v8, %v669_v27  ;;  %v551_v35 = vld [vmem:[%s654_s27 + $0x21] sm:$0xf]  ;;  %v534_v41 = vld [vmem:[%s762_s2] ss:$0 sm:$0xff] }
  0x1c   : > { %v315_v6 = vadd.f32 %v314_v46, %v312_v58  ;;  %v543_v29 = vld [vmem:[%s654_s27 + $0x1a] sm:$0xf]  ;;  %v327_v12 = vmul.f32 %v542_v17, %v684_v42  ;;  %v355_v14 = vmul.f32 %v550_v25, %v675_v33  ;;  %v552_v45 = vld [vmem:[%s654_s27 + $0x22] sm:$0xf]  ;;  %v382_v47 = vmul.f32 %v558_v32, %v669_v27  ;;  %v560_v50 = vld [vmem:[%s654_s27 + $0x29] sm:$0xf] }
  0x1d   : > { %v271_v16 = vadd.f32 %v270_v44, %v264_v62  ;;  %v346_v30 = vadd.f32 %v345_v1, %v343_v18  ;;  %v374_v36 = vadd.f32 %v373_v20, %v371_v26  ;;  %v330_v44 = vmul.f32 %v543_v29, %v700_v56  ;;  %v561_v58 = vld [vmem:[%s654_s27 + $0x2a] sm:$0xf]  ;;  %v562_v13 = vld [vmem:[%s764_s4] ss:$0 sm:$0xff] }
  0x1e   : > { %v318_v22 = vadd.f32 %v317_v59, %v315_v6  ;;  %v358_v24 = vmul.f32 %v551_v35, %v684_v42  ;;  %v386_v53 = vmul.f32 %v559_v40, %v675_v33  ;;  %v389_v61 = vmul.f32 %v560_v50, %v684_v42 }
  0x1f   : > { %v279_v11 = vadd.f32 %v278_v57, %v271_v16  ;;  %v349_v39 = vadd.f32 %v348_v19, %v346_v30  ;;  %v377_v46 = vadd.f32 %v376_v10, %v374_v36  ;;  %v361_v57 = vmul.f32 %v552_v45, %v700_v56 }
  0x20   : > { %v321_v34 = vadd.f32 %v320_v7, %v318_v22  ;;  %v392_v1 = vmul.f32 %v561_v58, %v700_v56 }
  0x21   : > { %v286_v38 = vadd.f32 %v285_v63, %v279_v11  ;;  %v352_v49 = vadd.f32 %v351_v31, %v349_v39  ;;  %v380_v52 = vadd.f32 %v379_v37, %v377_v46 }
  0x22   : > { %v325_v43 = vadd.f32 %v324_v23, %v321_v34 }
  0x23   : > { %v293_v48 = vadd.f32 %v292_v28, %v286_v38  ;;  %v356_v55 = vadd.f32 %v355_v14, %v352_v49  ;;  %v383_v60 = vadd.f32 %v382_v47, %v380_v52 }
  0x24   : > { %v328_v51 = vadd.f32 %v327_v12, %v325_v43 }
  0x25   : > { %v300_v54 = vadd.f32 %v534_v41, %v293_v48  ;;  %v359_v62 = vadd.f32 %v358_v24, %v356_v55  ;;  %v387_v0 = vadd.f32 %v386_v53, %v383_v60 }
  0x26   : > { %v331_v59 = vadd.f32 %v330_v44, %v328_v51 }
  0x27   : > { %v301_v27 = vmax.f32 %v300_v54, 0.0  ;;  %v362_v2 = vadd.f32 %v361_v57, %v359_v62  ;;  %v390_v3 = vadd.f32 %v389_v61, %v387_v0 }
  0x28   : > { %v332_v63 = vadd.f32 %v534_v41, %v331_v59 }
  0x29   : > { %303 = vst.msk [vmem:[#allocation2] sm:$0xf] %vm302_vm1, %v301_v27  ;;  %v363_v4 = vadd.f32 %v534_v41, %v362_v2  ;;  %v393_v5 = vadd.f32 %v392_v1, %v390_v3 }
  0x2a   : > { %v333_v33 = vmax.f32 %v332_v63, 0.0 }
  0x2b   : > { %v364_v6 = vmax.f32 %v363_v4, 0.0  ;;  %v394_v7 = vadd.f32 %v534_v41, %v393_v5 }
  0x2c   : > { %334 = vst.msk [vmem:[#allocation2 + $0x4] sm:$0xf] %vm302_vm1, %v333_v33 }
  0x2d   : > { %365 = vst.msk [vmem:[#allocation2 + $0x8] sm:$0xf] %vm302_vm1, %v364_v6  ;;  %v395_v42 = vmax.f32 %v394_v7, 0.0 }
  0x2f   : > { %396 = vst.msk [vmem:[#allocation2 + $0xc] sm:$0xf] %vm302_vm1, %v395_v42 }
  0x33   : > { %v397_v8 = vld [vmem:[#allocation2] sm:$0xff] }
  0x36   : > { %v398_v9 = vld [vmem:[#allocation2 + $0x8] sm:$0xff] }
  0x37   : > { %v399_v56 = vpack.c.bf16 %v398_v9, %v397_v8 }
  0x39   : > { %573 = vmatmul.mubr.msk.bf16.vlgmr.msra.gmra.mrb[0].mxu0 %vm415_vm2, %v399_v56 }
 0x10c   : > { %v453_v15 = vpop.f32.mrb[0].mxu0 }
 0x10d   : > { %v454_v16 = vadd.f32 %v562_v13, %v453_v15  ;;  %v574_v17 = vpop.f32.mrb[1].mxu0 }
 0x10e   : > { %v456_v18 = vpop.f32.mrb[2].mxu0 }
 0x10f   : > { %v460_v19 = vmax.f32 %v454_v16, 0.0  ;;  %v457_v20 = vadd.f32 %v562_v13, %v456_v18  ;;  %v575_v21 = vpop.f32.mrb[3].mxu0 }
 0x111   : > { %462 = vst.msk [vmem:[%s224_s12] sm:$0xff] %vm415_vm2, %v460_v19  ;;  %v461_v22 = vmax.f32 %v457_v20, 0.0 }
 0x113   : > { %463 = vst.msk [vmem:[%s224_s12 + $0x8] sm:$0xff] %vm415_vm2, %v461_v22 }
 0x114 PF: > { %s15_s18 = sadd.s32 1, %s594_s18  }
 0x115   : > { %p12_p4 = scmp.ge.s32.totalorder %s15_s18, 4  }
 0x117   :  { %14 = sbr.rel (!%p12_p4) target bundleno = 1 (0x1), region = 75 }

</bundles_post_ra>
